<compile_context>
chip_gen: v6e
topology: v6e:2x2x1
jax: 0.10.0
libtpu: 0.0.40
codegen_flags: <defaults>
</compile_context>

<pallas_src>
import numpy as np

import jax
import jax.numpy as jnp
from jax import lax
from jax.experimental import pallas as pl
from jax.experimental.pallas import tpu as pltpu


def _round_up(a, b):
    return (a + b - 1) // b * b


def _make_fused_siren_kernel(*, K, p, TL, HALO, SLAB_IN, L, n_sine,
                             compute_dtype):
    """Build the fused Siren kernel body (channels-on-sublane layout).

    Per grid step (n, j):
      x_ref : (1, 1, C_in, SLAB_IN)  input slab covering global columns
                                     [j*TL - HALO, j*TL - HALO + SLAB_IN)
      w_l   : (C_out_l, K*C_in_l)    fused conv taps (omega folded in)
      b_l   : (C_out_l, 1)           bias, f32 (omega folded in)
      o_ref : (1, C_out, TL)         output columns [j*TL, j*TL + TL)
    """

    def kernel(x_ref, *args):
        o_ref = args[-1]
        wb = args[:-1]
        w_refs = wb[0::2]
        b_refs = wb[1::2]

        j = pl.program_id(1)
        g0 = j * TL - HALO                      # global column of slab col 0
        # Only tiles whose slab touches a column outside [0, L) need the
        # per-layer 'same'-padding zero mask (interior tiles skip it).
        needs_mask = jnp.logical_or(g0 < 0, g0 + SLAB_IN > L)

        cur = x_ref[0, 0].astype(compute_dtype)  # (C_in, SLAB_IN)
        cur_len = SLAB_IN

        # Sine conv layers: y = sin(W x + b), omega folded into W and b.
        for l in range(n_sine):
            w = w_refs[l][...]                  # (H, K*C_in_l)
            b = b_refs[l][...]                  # (H, 1) f32
            out_len = cur_len - 2 * p
            # im2col of width K along the lane axis -> single MXU contraction
            # of depth K*C_in instead of K small per-tap matmuls.
            if K > 1:
                rhs = jnp.concatenate(
                    [cur[:, k:k + out_len] for k in range(K)], axis=0)
            else:
                rhs = cur[:, :out_len]
            acc = jnp.dot(w, rhs, preferred_element_type=jnp.float32) + b
            act = jnp.sin(acc)

            # Conv1d(padding='same') zero-pads EVERY layer: columns of this
            # layer's output whose global index is outside [0, L) must be
            # exactly zero before the next layer consumes them as halo.
            # Gated to boundary tiles only.
            off = p * (l + 1)                   # global col of act[:, 0] is g0+off

            def _mask(a, off=off, n=out_len):
                cols = (g0 + off) + lax.broadcasted_iota(jnp.int32, (1, n), 1)
                return jnp.where((cols >= 0) & (cols < L), a, 0.0)

            act = lax.cond(needs_mask, _mask, lambda a: a, act)

            cur = act.astype(compute_dtype)
            cur_len = out_len

        # Final 1x1 conv (no sine) on the central TL columns; result is
        # already (C_out, TL) -> lane-dense store, no transpose anywhere.
        w_fin = w_refs[n_sine][...]             # (C_out, H)
        b_fin = b_refs[n_sine][...]             # (C_out, 1) f32
        y = jnp.dot(w_fin, cur[:, :TL],
                    preferred_element_type=jnp.float32) + b_fin
        o_ref[0] = y.astype(o_ref.dtype)

    return kernel


def siren_forward(params, coords_ncl, *, tile_l=None, use_bf16=True):
    """Fused Siren forward. coords_ncl: (N, C_in, L) (PyTorch NCL).

    Returns (N, C_out, L) float32 (NCL), with no layout transposes anywhere.
    """
    x = jnp.asarray(coords_ncl, jnp.float32)           # consumed directly in NCL
    N, C_in, L = x.shape

    n_layers = len(params)
    n_sine = n_layers - 1
    K = int(params[0]["w"].shape[0])
    assert K % 2 == 1, "fused kernel implements 'same' padding only for odd K"
    assert all(int(pr["w"].shape[0]) == K for pr in params[:n_sine]), \
        "all SineLayers must share the same kernel size"
    assert int(params[-1]["w"].shape[0]) == 1, "final layer must be a 1x1 conv"
    p = (K - 1) // 2                 # odd K -> symmetric 'same' halo per layer
    HALO = n_sine * p                # total halo the fused network needs
    C_out = int(params[-1]["w"].shape[2])

    # L tiling: TL multiple of 128 (lane aligned stores); 1024 by default.
    if tile_l is None:
        tile_l = 1024
    TL = _round_up(max(int(tile_l), 128), 128)
    if TL >= L:
        TL = _round_up(L, 128)
    num_tiles = -(-L // TL)
    L_pad = num_tiles * TL
    SLAB_IN = _round_up(TL + 2 * HALO, 128)      # lane-aligned slab width
    Lp_total = (num_tiles - 1) * TL + SLAB_IN    # padded input length

    # Zero-pad the tiny C_in-channel input once and materialize overlapping
    # halo slabs so the per-tile input block is bounded and auto-pipelined.
    x_pad = jnp.pad(x, ((0, 0), (0, 0), (HALO, Lp_total - HALO - L)))
    starts = jnp.arange(num_tiles) * TL
    idx = starts[:, None] + jnp.arange(SLAB_IN)[None, :]     # (nt, SLAB_IN)
    x_slabs = jnp.transpose(x_pad[:, :, idx], (0, 2, 1, 3))  # (N, nt, C_in, SLAB_IN)

    w_dtype = jnp.bfloat16 if use_bf16 else jnp.float32

    flat_inputs = [x_slabs]
    in_specs = [pl.BlockSpec((1, 1, C_in, SLAB_IN), lambda n, j: (n, j, 0, 0))]
    bytes_w = 0
    h_max = C_in
    for layer in params:
        w = jnp.asarray(layer["w"], jnp.float32)   # (K_l, C_in_l, C_out_l)
        b = jnp.asarray(layer["b"], jnp.float32)
        omega = layer["omega"]
        if omega is not None:                      # fold omega_0 into W and b
            w = w * jnp.float32(omega)
            b = b * jnp.float32(omega)
        K_l, ci, co = w.shape
        # (K, C_in, C_out) -> (C_out, K*C_in): rows of the in-kernel im2col
        # RHS are ordered [tap0: cin0..cinC-1, tap1: ..., ...].
        w_f = jnp.transpose(w.reshape(K_l * ci, co)).astype(w_dtype)
        b_f = b.reshape(co, 1)
        flat_inputs += [w_f, b_f]
        in_specs += [pl.BlockSpec((co, K_l * ci), lambda n, j: (0, 0)),
                     pl.BlockSpec((co, 1), lambda n, j: (0, 0))]
        bytes_w += K_l * ci * co * (2 if use_bf16 else 4) + co * 4
        h_max = max(h_max, co, K_l * ci)

    kernel = _make_fused_siren_kernel(
        K=K, p=p, TL=TL, HALO=HALO, SLAB_IN=SLAB_IN, L=L, n_sine=n_sine,
        compute_dtype=w_dtype)

    # VMEM budget from the actual tile sizes: double-buffered I/O blocks +
    # resident weights + in-flight working slabs, 2x headroom, capped at
    # 48 MiB (safe for v7x's 64 MiB physical VMEM, generous on v5e/v6e).
    act_bytes = h_max * SLAB_IN * (4 + (2 if use_bf16 else 4))
    est = (2 * (C_in * SLAB_IN * 4 + C_out * TL * 4)
           + 2 * bytes_w + 4 * act_bytes)
    vmem_limit = int(min(48 * 2 ** 20, max(8 * 2 ** 20, 2 * est)))

    out = pl.pallas_call(
        kernel,
        out_shape=jax.ShapeDtypeStruct((N, C_out, L_pad), jnp.float32),
        grid=(N, num_tiles),
        in_specs=in_specs,
        out_specs=pl.BlockSpec((1, C_out, TL), lambda n, j: (n, 0, j)),
        compiler_params=pltpu.CompilerParams(
            dimension_semantics=("parallel", "parallel"),
            vmem_limit_bytes=vmem_limit),
    )(*flat_inputs)

    return out[:, :, :L]                          # already NCL, no transpose


def init_siren_params(key, in_features, hidden_features, hidden_layers,
                      out_features, ksize, first_omega_0=10.0,
                      hidden_omega_0=3.0):
    """Deterministic params mirroring Siren.__init__ init ranges.

    Weight layout: (K, C_in, C_out); bias: (C_out,).
    Returns list of dicts: {"w", "b", "omega" (None for final linear)}.
    """
    params = []

    def uniform(k, shape, lo, hi):
        return jax.random.uniform(k, shape, jnp.float32, lo, hi)

    def bias_init(k, fan_in, c_out):
        bound = 1.0 / np.sqrt(fan_in)      # PyTorch Conv1d default bias init
        return uniform(k, (c_out,), -bound, bound)

    # first SineLayer
    key, kw, kb = jax.random.split(key, 3)
    w = uniform(kw, (ksize, in_features, hidden_features),
                -1.0 / in_features, 1.0 / in_features)
    b = bias_init(kb, in_features * ksize, hidden_features)
    params.append(dict(w=w, b=b, omega=float(first_omega_0)))

    # hidden SineLayers
    for _ in range(hidden_layers):
        key, kw, kb = jax.random.split(key, 3)
        bound = np.sqrt(6.0 / hidden_features) / hidden_omega_0
        w = uniform(kw, (ksize, hidden_features, hidden_features), -bound, bound)
        b = bias_init(kb, hidden_features * ksize, hidden_features)
        params.append(dict(w=w, b=b, omega=float(hidden_omega_0)))

    # final Conv1d(hidden, out, 1) -- no sine
    key, kw, kb = jax.random.split(key, 3)
    bound = np.sqrt(6.0 / hidden_features) / hidden_omega_0
    w = uniform(kw, (1, hidden_features, out_features), -bound, bound)
    b = bias_init(kb, hidden_features * 1, out_features)
    params.append(dict(w=w, b=b, omega=None))

    return params


def _reference_forward(params, coords_ncl, *, use_bf16=True):
    """Plain-JAX reference (same math: omega folded, optional bf16 operands)."""
    x = jnp.transpose(coords_ncl, (0, 2, 1)).astype(jnp.float32)
    N, L, _ = x.shape
    cdt = jnp.bfloat16 if use_bf16 else jnp.float32
    for layer in params:
        w = jnp.asarray(layer["w"], jnp.float32)
        b = jnp.asarray(layer["b"], jnp.float32)
        omega = layer["omega"]
        if omega is not None:
            w = w * jnp.float32(omega)
            b = b * jnp.float32(omega)
        K = w.shape[0]
        pad_l = (K - 1) // 2
        pad_r = (K - 1) - pad_l
        xp = jnp.pad(x, ((0, 0), (pad_l, pad_r), (0, 0)))
        xc = xp.astype(cdt).astype(jnp.float32)
        wc = w.astype(cdt).astype(jnp.float32)
        y = jnp.broadcast_to(b[None, None, :], (N, L, w.shape[2]))
        for k in range(K):
            y = y + jnp.einsum('nlc,cd->nld', xc[:, k:k + L, :], wc[k])
        if omega is not None:
            x = jnp.sin(y).astype(cdt).astype(jnp.float32)
        else:
            x = y
    return jnp.transpose(x, (0, 2, 1))


if __name__ == "__main__":
    # Small, Siren-consistent shapes.
    N, C_IN, L = 2, 2, 520
    HIDDEN, HIDDEN_LAYERS, C_OUT, KSIZE = 32, 2, 1, 3
    FIRST_OMEGA, HIDDEN_OMEGA = 10.0, 3.0

    key = jax.random.PRNGKey(0)
    key, kx = jax.random.split(key)
    coords = jax.random.normal(kx, (N, C_IN, L), jnp.float32)   # NCL like PyTorch

    params = init_siren_params(key, C_IN, HIDDEN, HIDDEN_LAYERS, C_OUT,
                               KSIZE, FIRST_OMEGA, HIDDEN_OMEGA)

    # 1) Exact-f32 path, L tiled into 5 tiles of 128: exercises halo slabs,
    #    boundary-gated masking (both branches of the cond at runtime) and the
    #    padded tail past L; strict check against the plain-JAX reference.
    out32 = jax.block_until_ready(
        siren_forward(params, coords, tile_l=128, use_bf16=False))
    assert out32.shape == (N, C_OUT, L), out32.shape
    ref32 = jax.block_until_ready(
        _reference_forward(params, coords, use_bf16=False))
    np.testing.assert_allclose(np.asarray(out32), np.asarray(ref32),
                               rtol=1e-4, atol=1e-4)

    # 2) Default bf16-MXU path (single lane-aligned tile): check against a
    #    bf16-matched reference with tolerance for bf16 rounding.
    out16 = jax.block_until_ready(siren_forward(params, coords))
    assert out16.shape == (N, C_OUT, L), out16.shape
    ref16 = jax.block_until_ready(
        _reference_forward(params, coords, use_bf16=True))
    np.testing.assert_allclose(np.asarray(out16), np.asarray(ref16),
                               rtol=5e-2, atol=5e-2)

    print("KERNEL_OK")
</pallas_src>

<mosaic_0001>
module attributes {stable_mosaic.version = 11 : i64} {
  func.func @kernel(%arg0: i32, %arg1: i32, %arg2: memref<1x1x2x256xf32, #tpu.memory_space<vmem>>, %arg3: memref<32x6xf32, #tpu.memory_space<vmem>>, %arg4: memref<32x1xf32, #tpu.memory_space<vmem>>, %arg5: memref<32x96xf32, #tpu.memory_space<vmem>>, %arg6: memref<32x1xf32, #tpu.memory_space<vmem>>, %arg7: memref<32x96xf32, #tpu.memory_space<vmem>>, %arg8: memref<32x1xf32, #tpu.memory_space<vmem>>, %arg9: memref<1x32xf32, #tpu.memory_space<vmem>>, %arg10: memref<1x1xf32, #tpu.memory_space<vmem>>, %arg11: memref<1x1x128xf32, #tpu.memory_space<vmem>>) attributes {dimension_semantics = [#tpu.dimension_semantics<parallel>, #tpu.dimension_semantics<parallel>], iteration_bounds = array<i64: 2, 5>, scalar_prefetch = 0 : i64, scratch_operands = 0 : i64, tpu.core_type = #tpu.core_type<tc>, window_params = [{transform_indices = @transform_0, window_bounds = array<i64: 1, 1, 2, 256>}, {pipeline_mode = #tpu.pipeline_mode<synchronous>, transform_indices = @transform_1, window_bounds = array<i64: 32, 6>}, {pipeline_mode = #tpu.pipeline_mode<synchronous>, transform_indices = @transform_2, window_bounds = array<i64: 32, 1>}, {pipeline_mode = #tpu.pipeline_mode<synchronous>, transform_indices = @transform_3, window_bounds = array<i64: 32, 96>}, {pipeline_mode = #tpu.pipeline_mode<synchronous>, transform_indices = @transform_4, window_bounds = array<i64: 32, 1>}, {pipeline_mode = #tpu.pipeline_mode<synchronous>, transform_indices = @transform_5, window_bounds = array<i64: 32, 96>}, {pipeline_mode = #tpu.pipeline_mode<synchronous>, transform_indices = @transform_6, window_bounds = array<i64: 32, 1>}, {pipeline_mode = #tpu.pipeline_mode<synchronous>, transform_indices = @transform_7, window_bounds = array<i64: 1, 32>}, {pipeline_mode = #tpu.pipeline_mode<synchronous>, transform_indices = @transform_8, window_bounds = array<i64: 1, 1>}, {transform_indices = @transform_9, window_bounds = array<i64: 1, 1, 128>}]} {
    %c128_i32 = arith.constant 128 : i32
    %0 = arith.muli %arg1, %c128_i32 : i32
    %c3_i32 = arith.constant 3 : i32
    %1 = arith.subi %0, %c3_i32 : i32
    %c0_i32 = arith.constant 0 : i32
    %2 = arith.cmpi slt, %1, %c0_i32 : i32
    %c256_i32 = arith.constant 256 : i32
    %3 = arith.addi %1, %c256_i32 : i32
    %c520_i32 = arith.constant 520 : i32
    %4 = arith.cmpi sgt, %3, %c520_i32 : i32
    %5 = arith.ori %2, %4 : i1
    %c0 = arith.constant 0 : index
    %c0_0 = arith.constant 0 : index
    %c0_1 = arith.constant 0 : index
    %c0_2 = arith.constant 0 : index
    %6 = vector.load %arg2[%c0, %c0_0, %c0_1, %c0_2] : memref<1x1x2x256xf32, #tpu.memory_space<vmem>>, vector<1x1x2x256xf32>
    %7 = vector.shape_cast %6 : vector<1x1x2x256xf32> to vector<2x256xf32>
    %c0_3 = arith.constant 0 : index
    %c0_4 = arith.constant 0 : index
    %8 = vector.load %arg3[%c0_3, %c0_4] : memref<32x6xf32, #tpu.memory_space<vmem>>, vector<32x6xf32>
    %c0_5 = arith.constant 0 : index
    %c0_6 = arith.constant 0 : index
    %9 = vector.load %arg4[%c0_5, %c0_6] : memref<32x1xf32, #tpu.memory_space<vmem>>, vector<32x1xf32>
    %10 = vector.extract_strided_slice %7 {offsets = [0, 0], sizes = [2, 254], strides = [1, 1]} : vector<2x256xf32> to vector<2x254xf32>
    %11 = vector.extract_strided_slice %7 {offsets = [0, 1], sizes = [2, 254], strides = [1, 1]} : vector<2x256xf32> to vector<2x254xf32>
    %12 = vector.extract_strided_slice %7 {offsets = [0, 2], sizes = [2, 254], strides = [1, 1]} : vector<2x256xf32> to vector<2x254xf32>
    %13 = tpu.concatenate %10, %11, %12 in 0 : vector<2x254xf32>, vector<2x254xf32>, vector<2x254xf32> -> vector<6x254xf32>
    %cst = arith.constant dense<0.000000e+00> : vector<32x254xf32>
    %14 = tpu.matmul %8, %13, %cst {dimension_numbers = #tpu.dot_dimension_numbers<[1], [0], [0], [1], [0, 0, 1, 1], [], []>} : vector<32x6xf32>, vector<6x254xf32>, vector<32x254xf32> -> vector<32x254xf32>
    %15 = vector.broadcast %9 : vector<32x1xf32> to vector<32x254xf32>
    %16 = arith.addf %14, %15 : vector<32x254xf32>
    %17 = math.sin %16 : vector<32x254xf32>
    %18 = arith.extui %5 : i1 to i32
    %c0_i32_7 = arith.constant 0 : i32
    %19 = arith.cmpi ne, %18, %c0_i32_7 : i32
    %20 = scf.if %19 -> (vector<32x254xf32>) {
      %c1_i32 = arith.constant 1 : i32
      %56 = arith.addi %1, %c1_i32 : i32
      %57 = tpu.iota {dimensions = array<i32: 1>} : vector<1x254xi32>
      %58 = vector.broadcast %56 : i32 to vector<1x254xi32>
      %59 = arith.addi %58, %57 : vector<1x254xi32>
      %c0_i32_28 = arith.constant 0 : i32
      %60 = vector.broadcast %c0_i32_28 : i32 to vector<1x254xi32>
      %61 = arith.cmpi sge, %59, %60 : vector<1x254xi32>
      %c520_i32_29 = arith.constant 520 : i32
      %62 = vector.broadcast %c520_i32_29 : i32 to vector<1x254xi32>
      %63 = arith.cmpi slt, %59, %62 : vector<1x254xi32>
      %64 = arith.andi %61, %63 : vector<1x254xi1>
      %cst_30 = arith.constant 0.000000e+00 : f32
      %65 = vector.shape_cast %64 : vector<1x254xi1> to vector<1x254xi1>
      %66 = vector.broadcast %65 : vector<1x254xi1> to vector<32x254xi1>
      %67 = vector.broadcast %cst_30 : f32 to vector<32x254xf32>
      %68 = arith.select %66, %17, %67 : vector<32x254xi1>, vector<32x254xf32>
      scf.yield %68 : vector<32x254xf32>
    } else {
      scf.yield %17 : vector<32x254xf32>
    }
    %c0_8 = arith.constant 0 : index
    %c0_9 = arith.constant 0 : index
    %21 = vector.load %arg5[%c0_8, %c0_9] : memref<32x96xf32, #tpu.memory_space<vmem>>, vector<32x96xf32>
    %c0_10 = arith.constant 0 : index
    %c0_11 = arith.constant 0 : index
    %22 = vector.load %arg6[%c0_10, %c0_11] : memref<32x1xf32, #tpu.memory_space<vmem>>, vector<32x1xf32>
    %23 = vector.extract_strided_slice %20 {offsets = [0, 0], sizes = [32, 252], strides = [1, 1]} : vector<32x254xf32> to vector<32x252xf32>
    %24 = vector.extract_strided_slice %20 {offsets = [0, 1], sizes = [32, 252], strides = [1, 1]} : vector<32x254xf32> to vector<32x252xf32>
    %25 = vector.extract_strided_slice %20 {offsets = [0, 2], sizes = [32, 252], strides = [1, 1]} : vector<32x254xf32> to vector<32x252xf32>
    %26 = tpu.concatenate %23, %24, %25 in 0 : vector<32x252xf32>, vector<32x252xf32>, vector<32x252xf32> -> vector<96x252xf32>
    %cst_12 = arith.constant dense<0.000000e+00> : vector<32x252xf32>
    %27 = tpu.matmul %21, %26, %cst_12 {dimension_numbers = #tpu.dot_dimension_numbers<[1], [0], [0], [1], [0, 0, 1, 1], [], []>} : vector<32x96xf32>, vector<96x252xf32>, vector<32x252xf32> -> vector<32x252xf32>
    %28 = vector.broadcast %22 : vector<32x1xf32> to vector<32x252xf32>
    %29 = arith.addf %27, %28 : vector<32x252xf32>
    %30 = math.sin %29 : vector<32x252xf32>
    %31 = arith.extui %5 : i1 to i32
    %c0_i32_13 = arith.constant 0 : i32
    %32 = arith.cmpi ne, %31, %c0_i32_13 : i32
    %33 = scf.if %32 -> (vector<32x252xf32>) {
      %c2_i32 = arith.constant 2 : i32
      %56 = arith.addi %1, %c2_i32 : i32
      %57 = tpu.iota {dimensions = array<i32: 1>} : vector<1x252xi32>
      %58 = vector.broadcast %56 : i32 to vector<1x252xi32>
      %59 = arith.addi %58, %57 : vector<1x252xi32>
      %c0_i32_28 = arith.constant 0 : i32
      %60 = vector.broadcast %c0_i32_28 : i32 to vector<1x252xi32>
      %61 = arith.cmpi sge, %59, %60 : vector<1x252xi32>
      %c520_i32_29 = arith.constant 520 : i32
      %62 = vector.broadcast %c520_i32_29 : i32 to vector<1x252xi32>
      %63 = arith.cmpi slt, %59, %62 : vector<1x252xi32>
      %64 = arith.andi %61, %63 : vector<1x252xi1>
      %cst_30 = arith.constant 0.000000e+00 : f32
      %65 = vector.shape_cast %64 : vector<1x252xi1> to vector<1x252xi1>
      %66 = vector.broadcast %65 : vector<1x252xi1> to vector<32x252xi1>
      %67 = vector.broadcast %cst_30 : f32 to vector<32x252xf32>
      %68 = arith.select %66, %30, %67 : vector<32x252xi1>, vector<32x252xf32>
      scf.yield %68 : vector<32x252xf32>
    } else {
      scf.yield %30 : vector<32x252xf32>
    }
    %c0_14 = arith.constant 0 : index
    %c0_15 = arith.constant 0 : index
    %34 = vector.load %arg7[%c0_14, %c0_15] : memref<32x96xf32, #tpu.memory_space<vmem>>, vector<32x96xf32>
    %c0_16 = arith.constant 0 : index
    %c0_17 = arith.constant 0 : index
    %35 = vector.load %arg8[%c0_16, %c0_17] : memref<32x1xf32, #tpu.memory_space<vmem>>, vector<32x1xf32>
    %36 = vector.extract_strided_slice %33 {offsets = [0, 0], sizes = [32, 250], strides = [1, 1]} : vector<32x252xf32> to vector<32x250xf32>
    %37 = vector.extract_strided_slice %33 {offsets = [0, 1], sizes = [32, 250], strides = [1, 1]} : vector<32x252xf32> to vector<32x250xf32>
    %38 = vector.extract_strided_slice %33 {offsets = [0, 2], sizes = [32, 250], strides = [1, 1]} : vector<32x252xf32> to vector<32x250xf32>
    %39 = tpu.concatenate %36, %37, %38 in 0 : vector<32x250xf32>, vector<32x250xf32>, vector<32x250xf32> -> vector<96x250xf32>
    %cst_18 = arith.constant dense<0.000000e+00> : vector<32x250xf32>
    %40 = tpu.matmul %34, %39, %cst_18 {dimension_numbers = #tpu.dot_dimension_numbers<[1], [0], [0], [1], [0, 0, 1, 1], [], []>} : vector<32x96xf32>, vector<96x250xf32>, vector<32x250xf32> -> vector<32x250xf32>
    %41 = vector.broadcast %35 : vector<32x1xf32> to vector<32x250xf32>
    %42 = arith.addf %40, %41 : vector<32x250xf32>
    %43 = math.sin %42 : vector<32x250xf32>
    %44 = arith.extui %5 : i1 to i32
    %c0_i32_19 = arith.constant 0 : i32
    %45 = arith.cmpi ne, %44, %c0_i32_19 : i32
    %46 = scf.if %45 -> (vector<32x250xf32>) {
      %c3_i32_28 = arith.constant 3 : i32
      %56 = arith.addi %1, %c3_i32_28 : i32
      %57 = tpu.iota {dimensions = array<i32: 1>} : vector<1x250xi32>
      %58 = vector.broadcast %56 : i32 to vector<1x250xi32>
      %59 = arith.addi %58, %57 : vector<1x250xi32>
      %c0_i32_29 = arith.constant 0 : i32
      %60 = vector.broadcast %c0_i32_29 : i32 to vector<1x250xi32>
      %61 = arith.cmpi sge, %59, %60 : vector<1x250xi32>
      %c520_i32_30 = arith.constant 520 : i32
      %62 = vector.broadcast %c520_i32_30 : i32 to vector<1x250xi32>
      %63 = arith.cmpi slt, %59, %62 : vector<1x250xi32>
      %64 = arith.andi %61, %63 : vector<1x250xi1>
      %cst_31 = arith.constant 0.000000e+00 : f32
      %65 = vector.shape_cast %64 : vector<1x250xi1> to vector<1x250xi1>
      %66 = vector.broadcast %65 : vector<1x250xi1> to vector<32x250xi1>
      %67 = vector.broadcast %cst_31 : f32 to vector<32x250xf32>
      %68 = arith.select %66, %43, %67 : vector<32x250xi1>, vector<32x250xf32>
      scf.yield %68 : vector<32x250xf32>
    } else {
      scf.yield %43 : vector<32x250xf32>
    }
    %c0_20 = arith.constant 0 : index
    %c0_21 = arith.constant 0 : index
    %47 = vector.load %arg9[%c0_20, %c0_21] : memref<1x32xf32, #tpu.memory_space<vmem>>, vector<1x32xf32>
    %c0_22 = arith.constant 0 : index
    %c0_23 = arith.constant 0 : index
    %48 = vector.load %arg10[%c0_22, %c0_23] : memref<1x1xf32, #tpu.memory_space<vmem>>, vector<1x1xf32>
    %49 = vector.extract_strided_slice %46 {offsets = [0, 0], sizes = [32, 128], strides = [1, 1]} : vector<32x250xf32> to vector<32x128xf32>
    %cst_24 = arith.constant dense<0.000000e+00> : vector<1x128xf32>
    %50 = tpu.matmul %47, %49, %cst_24 {dimension_numbers = #tpu.dot_dimension_numbers<[1], [0], [0], [1], [0, 0, 1, 1], [], []>} : vector<1x32xf32>, vector<32x128xf32>, vector<1x128xf32> -> vector<1x128xf32>
    %51 = vector.broadcast %48 : vector<1x1xf32> to vector<1x128xf32>
    %52 = arith.addf %50, %51 : vector<1x128xf32>
    %c0_25 = arith.constant 0 : index
    %c0_26 = arith.constant 0 : index
    %c0_27 = arith.constant 0 : index
    %53 = vector.load %arg11[%c0_25, %c0_26, %c0_27] : memref<1x1x128xf32, #tpu.memory_space<vmem>>, vector<1x1x128xf32>
    %54 = vector.shape_cast %53 : vector<1x1x128xf32> to vector<1x128xf32>
    %55 = vector.shape_cast %52 : vector<1x128xf32> to vector<1x1x128xf32>
    tpu.vector_store %arg11[%c0_25, %c0_26, %c0_27], %55 {strides = array<i32>} : memref<1x1x128xf32, #tpu.memory_space<vmem>>, vector<1x1x128xf32>,
    return
  }
  func.func @transform_0(%arg0: i32, %arg1: i32) -> (i32, i32, i32, i32) {
    %c0_i32 = arith.constant 0 : i32
    %c0_i32_0 = arith.constant 0 : i32
    %c0_i32_1 = arith.constant 0 : i32
    return %arg0, %arg1, %c0_i32, %c0_i32_0 : i32, i32, i32, i32
  }
  func.func @transform_1(%arg0: i32, %arg1: i32) -> (i32, i32) {
    %c0_i32 = arith.constant 0 : i32
    %c0_i32_0 = arith.constant 0 : i32
    %c0_i32_1 = arith.constant 0 : i32
    return %c0_i32, %c0_i32_0 : i32, i32
  }
  func.func @transform_2(%arg0: i32, %arg1: i32) -> (i32, i32) {
    %c0_i32 = arith.constant 0 : i32
    %c0_i32_0 = arith.constant 0 : i32
    %c0_i32_1 = arith.constant 0 : i32
    return %c0_i32, %c0_i32_0 : i32, i32
  }
  func.func @transform_3(%arg0: i32, %arg1: i32) -> (i32, i32) {
    %c0_i32 = arith.constant 0 : i32
    %c0_i32_0 = arith.constant 0 : i32
    %c0_i32_1 = arith.constant 0 : i32
    return %c0_i32, %c0_i32_0 : i32, i32
  }
  func.func @transform_4(%arg0: i32, %arg1: i32) -> (i32, i32) {
    %c0_i32 = arith.constant 0 : i32
    %c0_i32_0 = arith.constant 0 : i32
    %c0_i32_1 = arith.constant 0 : i32
    return %c0_i32, %c0_i32_0 : i32, i32
  }
  func.func @transform_5(%arg0: i32, %arg1: i32) -> (i32, i32) {
    %c0_i32 = arith.constant 0 : i32
    %c0_i32_0 = arith.constant 0 : i32
    %c0_i32_1 = arith.constant 0 : i32
    return %c0_i32, %c0_i32_0 : i32, i32
  }
  func.func @transform_6(%arg0: i32, %arg1: i32) -> (i32, i32) {
    %c0_i32 = arith.constant 0 : i32
    %c0_i32_0 = arith.constant 0 : i32
    %c0_i32_1 = arith.constant 0 : i32
    return %c0_i32, %c0_i32_0 : i32, i32
  }
  func.func @transform_7(%arg0: i32, %arg1: i32) -> (i32, i32) {
    %c0_i32 = arith.constant 0 : i32
    %c0_i32_0 = arith.constant 0 : i32
    %c0_i32_1 = arith.constant 0 : i32
    return %c0_i32, %c0_i32_0 : i32, i32
  }
  func.func @transform_8(%arg0: i32, %arg1: i32) -> (i32, i32) {
    %c0_i32 = arith.constant 0 : i32
    %c0_i32_0 = arith.constant 0 : i32
    %c0_i32_1 = arith.constant 0 : i32
    return %c0_i32, %c0_i32_0 : i32, i32
  }
  func.func @transform_9(%arg0: i32, %arg1: i32) -> (i32, i32, i32) {
    %c0_i32 = arith.constant 0 : i32
    %c0_i32_0 = arith.constant 0 : i32
    return %arg0, %c0_i32, %arg1 : i32, i32, i32
  }
}

</mosaic_0001>

<bundles_post_ra>
// kernel: tpu_custom_call.1
= control target key start
LH: loop header
LB: loop body
LE: loop exit
PB: predicated region body
PF: predicated region fallthrough
CT: control target
= control target key end

     0   :  { %s6211_s0 = inlined_call_operand.vmem [shape: f32[2,5,2,256], index: 0, kind: input, shape index: {}]   ;;  %s6212_s1 = inlined_call_operand.vmem [shape: f32[32,6], index: 1, kind: input, shape index: {}]   ;;  %s6213_s2 = inlined_call_operand.vmem [shape: f32[32,1], index: 2, kind: input, shape index: {}]   ;;  %s6214_s3 = inlined_call_operand.vmem [shape: f32[32,96], index: 3, kind: input, shape index: {}]   ;;  %s6215_s4 = inlined_call_operand.vmem [shape: f32[32,1], index: 4, kind: input, shape index: {}]   ;;  %s6216_s5 = inlined_call_operand.vmem [shape: f32[32,96], index: 5, kind: input, shape index: {}]   ;;  %s6217_s6 = inlined_call_operand.vmem [shape: f32[32,1], index: 6, kind: input, shape index: {}]   ;;  %s6218_s7 = inlined_call_operand.vmem [shape: f32[1,32], index: 7, kind: input, shape index: {}]   ;;  %s6219_s8 = inlined_call_operand.<no memory space> [shape: f32[1,1], index: 8, kind: input, shape index: {}]   ;;  %s6220_s9 = inlined_call_operand.hbm [shape: f32[2,1,640], index: 9, kind: output, shape index: {}]  }
   0x1   :  { %6262 = sst [smem:[#allocation10_spill]] %s6211_s0  ;;  %v14_v0 = vstv %s6219_s8 }
   0x2   :  { %15 = vst [vmem:[#allocation2] sm:$0x1] %v14_v0 }
   0x3   :  { %16 = vsyncpa [#allocation4], 0 }
   0x4   :  { %18 = vsyncpa [#allocation4 + $0x1], 0  ;;  %s4023_s11 = smov 0   ;;  %s4025_s12 = smov 0  }
   0x5   :  { %s4027_s13 = smov 0   ;;  %s4029_s14 = smov 0  }
   0x6   :  { %s4031_s15 = smov 0   ;;  %s4033_s16 = smov 0  }
   0x7   :  { %s4035_s17 = smov 0   ;;  %s4037_s18 = smov 0  }
   0x8 LB: > { %s3309_s8 = sadd.s32 4294967295, %s3955_s18   ;;  %s3310_s19 = sadd.s32 4294967294, %s3955_s18   ;;  %s3955_s18 = sphi %s4037_s18, %s24_s18   ;;  %s3951_s17 = sphi %s4035_s17, %s6390_s17   ;;  %s3947_s16 = sphi %s4033_s16, %s6389_s16   ;;  %s3943_s15 = sphi %s4031_s15, %s6388_s15   ;;  %s3939_s14 = sphi %s4029_s14, %s6387_s14   ;;  %s3935_s13 = sphi %s4027_s13, %s6386_s13   ;;  %s3931_s12 = sphi %s4025_s12, %s6385_s12   ;;  %s3927_s11 = sphi %s4023_s11, %s6384_s11  }
   0x9   : > { %s33_s20 = sadd.s32 1, %s3947_s16  ;;  %s36_s21 = sadd.s32 1, %s3951_s17 }
   0xa   : > { %p34_p0 = scmp.ge.s32.totalorder %s33_s20, 5  ;;  %p251_p1 = scmp.ne.s32.totalorder %s3935_s13, %s3931_s12 }
   0xb   : > { %p252_p2 = scmp.eq.s32.totalorder %s3309_s8, 9  ;;  %p257_p5 = scmp.ne.s32.totalorder %s3931_s12, %s3927_s11 }
   0xc   : > { %s6392_s20 = smov (%p34_p0, %s33_s20), 0  ;;  %s6394_s21 = smov (!%p34_p0, %s36_s21), %s3951_s17 }
   0xd   : > { %s237_s22 = ssub.s32 %s3947_s16, %s6392_s20  ;;  %p4074_p3 = por %p252_p2, %p251_p1 }
   0xe   : > { %p38_p4 = scmp.ge.s32.totalorder %s6394_s21, 2  ;;  %p258_p6 = scmp.eq.s32.totalorder %s3310_s19, 9 }
   0xf   : > { %p3313_p7 = scmp.ge.s32.totalorder %s3955_s18, 1  ;;  %p312_p9 = scmp.lt.s32.totalorder %s3955_s18, 11 }
  0x10   : > { %s6396_s21 = smov (%p38_p4, %s6394_s21), 0  ;;  %p4083_p8 = por %p258_p6, %p257_p5 }
  0x11   : > { %s236_s25 = ssub.s32 %s3951_s17, %s6396_s21  ;;  %s241_s26 = sadd.s32 1, %s3935_s13 }
  0x12   : > { %s238_s27 = sor.u32 %s237_s22, %s236_s25  ;;  %p313_p10 = pnand %p3313_p7, %p312_p9 }
  0x13   : > { %p239_p11 = scmp.eq.s32.totalorder %s238_s27, 0 }
  0x14   : > { %316 = sbr.rel (%p313_p10) target bundleno = 1829 (0x725), region = 56 }
  0x15   : > { %s4092_s28 = scalar_select %p239_p11, %s3935_s13, %s241_s26  }
  0x19   : > { %p351_p12 = scmp.lt.s32.totalorder %s3943_s15, 1  ;;  %p353_p13 = scmp.lt.s32.totalorder %s3939_s14, 4  ;;  %v379_v1 = vlaneseq  ;;  %v3957_v2 = vmov 1983009808   ;;  %v6223_v7 = vmov 0.0   ;;  %v374_v14 = vld [vmem:[%s6213_s2 + $0x18] sm:$0xff] }
  0x1a   : > { %v377_v3 = vunpack.c.l.s4 %v3957_v2  ;;  %s6266_s0 = sld [smem:[#allocation10_spill]]  ;;  %522 = vmatprep.mubr.f32.mxu0 %v6223_v7  ;;  %1595 = vmatprep.mubr.f32.mxu1 %v6223_v7  ;;  %v373_v15 = vld [vmem:[%s6213_s2 + $0x10] sm:$0xff]  ;;  %v3961_v16 = vmov 0   ;;  %v371_v17 = vld [vmem:[%s6213_s2] sm:$0xff]  ;;  %v372_v18 = vld [vmem:[%s6213_s2 + $0x8] sm:$0xff]  ;;  %vm6237_vm0 = vcmask 1039360  }
  0x1b   : > { %s352_s29 = scalar_select %p351_p12, %s3943_s15, 1  ;;  %v4098_v4 = vshrl.u32 %v379_v1, 7  ;;  %3780 = vset.pattern.permute.xlu0 %v3961_v16  ;;  %3781 = vset.pattern.permute.xlu1 %v3961_v16  ;;  %vm412_vm1 = vcmask 1041408   ;;  %vm6238_vm2 = vcmask 1031168   ;;  %vm415_vm3 = vcmask 1043456   ;;  %v367_v29 = vld [vmem:[%s6212_s1] sm:$0xff] }
  0x1c   : > { %s354_s30 = scalar_select %p353_p13, %s3939_s14, 4  ;;  %v378_v5 = vunpack.c.0.s8 %v377_v3  ;;  %vm451_vm4 = vcmask 1045504   ;;  %vm438_vm5 = vcmask 48128   ;;  %v368_v31 = vld [vmem:[%s6212_s1 + $0x8] sm:$0xff]  ;;  %v369_v32 = vld [vmem:[%s6212_s1 + $0x10] sm:$0xff]  ;;  %v370_v33 = vld [vmem:[%s6212_s1 + $0x18] sm:$0xff] }
  0x1d   : > { %6265 = vst [vmem:[#allocation6_spill] sm:$0xff] %v4098_v4  ;;  %s3432_s10 = smul.u32 10, %s352_s29  ;;  %s6221_s29 = smov 127   ;;  %v6230_v16 = vmov 2131351028  }
  0x1e   : > { %s3314_s8 = sshll.u32 %s354_s30, 1  ;;  %v381_v6 = vsub.s32 %v378_v5, %v4098_v4  ;;  %s3960_s30 = smov 126  }
  0x1f   : > { %s357_s19 = sadd.s32 %s3432_s10, %s3314_s8 }
  0x20   : > { %s3315_s22 = sshll.u32 %s357_s19, 1  ;;  %s349_s19 = sand.u32 1, %s3931_s12  }
  0x21   : > { %s359_s27 = scalar_lea.vmem %s6266_s0, %s3315_s22 }
  0x22   : > { %v366_v8 = vld [vmem:[%s359_s27] sm:$0xf] }
  0x23   : > { %v386_v9 = vcombine.low %v366_v8, %v366_v8  ;;  %v382_v10 = vrot.slane %v366_v8, %v381_v6 }
  0x25   : > { %v393_v11 = vrot.slane %v386_v9, %v381_v6  ;;  %v403_v12 = vcombine.low %v382_v10, %v382_v10  ;;  %v383_v21 = vcombine.high %v382_v10, %v382_v10 }
  0x27   : > { %395 = vrot.lane.b32.xlu0 %v393_v11, %s6221_s29  ;;  %v394_v13 = vcombine.high %v393_v11, %v393_v11  ;;  %404 = vrot.lane.b32.xlu1 %v403_v12, %s3960_s30  ;;  %v6235_v11 = vmov 683565275  }
  0x2b   : > { %397 = vrot.lane.b32.xlu0 %v394_v13, %s6221_s29  ;;  %406 = vrot.lane.b32.xlu1 %v382_v10, %s3960_s30  ;;  %v6232_v13 = vmov 2475754826   ;;  %s4355_s29 = sshll.u32 %s3939_s14, 7 }
  0x2c   : > { %s3317_s10 = sadd.s32 4294967293, %s4355_s29  ;;  %s363_s8 = sadd.s32 253, %s4355_s29 }
  0x2d   : > { %p4366_p0 = scmp.lt.s32.totalorder %s3317_s10, 0  ;;  %p4370_p1 = scmp.gt.s32.totalorder %s363_s8, 520 }
  0x2e   : > { %s1382_s25 = sadd.s32 4294967294, %s4355_s29  ;;  %s6304_s10 = smov 127  }
  0x2f   : > { %435 = vperm.xlu0 %3780, %v374_v14   ;;  %430 = vperm.xlu1 %3781, %v373_v15   ;;  %p365_p2 = por %p4370_p1, %p4366_p0  ;;  %s3513_s8 = smul.u32 5, %s3943_s15 }
  0x30   : > { %s3218_s15 = scalar_lea.sflag [#allocation4], %s349_s19 }
  0x31   : > { %s3514_s26 = scalar_select %p365_p2, 1, 0 }
  0x32   : > { %s3683_s27 = scalar_select %p365_p2, 0, 1 }
  0x33   : > { %420 = vperm.xlu0 %3780, %v371_v17   ;;  %425 = vperm.xlu1 %3781, %v372_v18   ;;  %v6228_v18 = vmov 2102212464   ;;  %s3228_s22 = sadd.s32 %s3939_s14, %s3513_s8  ;;  %s3969_s14 = smov [#allocation3]  }
  0x34   : > { %s3867_s8 = sshll.u32 %s3969_s14, 4  ;;  %s3868_s8 = int_to_ptr.vmem [resolvable:$false] %s3867_s8 }
  0x99   : > { %v396_v19 = vpop.permute.xlu0 %395  ;;  %v405_v20 = vpop.permute.xlu1 %404 }
  0x9d   : > { %v398_v22 = vpop.permute.xlu0 %397  ;;  %v407_v23 = vpop.permute.xlu1 %406 }
  0x9e   : > { %v400_v24 = vsel %vm6237_vm0, %v396_v19, %v398_v22  ;;  %v414_v25 = vsel %vm412_vm1, %v383_v21, %v398_v22  ;;  %v409_v26 = vsel %vm6238_vm2, %v405_v20, %v407_v23  ;;  %v3966_v20 = vmov 920167782  }
  0x9f   : > { %v417_v27 = vsel %vm415_vm3, %v414_v25, %v407_v23  ;;  %v413_v28 = vsel %vm412_vm1, %v382_v10, %v400_v24 }
  0xa0   : > { %3318 = vmatprep.subr.msk.mxu0 %vm451_vm4, %v417_v27  ;;  %v416_v30 = vsel %vm415_vm3, %v413_v28, %v409_v26  ;;  %v6247_v27 = vmov 1326507024  }
  0xa1   : > { %3319 = vmatpush1.msk.msra.mxu0 %vm451_vm4, %v416_v30 }
  0xa2   : > { %3320 = vmatmul.mubr.msk.f32.vlgmr.msra.gmra.mxu0 %vm438_vm5, %v367_v29 }
  0xa3   : > { %528 = vmatprep.mubr.f32.mxu0 %v6223_v7 }
  0xa6   : > { %3321 = vmatmul.mubr.msk.f32.gmra.mxu0 %vm438_vm5, %v368_v31 }
  0xa7   : > { %534 = vmatprep.mubr.f32.mxu0 %v6223_v7 }
  0xaa   : > { %3322 = vmatmul.mubr.msk.f32.gmra.mxu0 %vm438_vm5, %v369_v32  ;;  %v4141_v34 = vpop.permute.xlu0 %435  ;;  %v4143_v35 = vpop.permute.xlu1 %430 }
  0xab   : > { %540 = vmatprep.mubr.f32.mxu0 %v6223_v7 }
  0xae   : > { %3323 = vmatmul.mubr.msk.f32.gmra.mxu0 %vm438_vm5, %v370_v33  ;;  %v421_v36 = vpop.permute.xlu0 %420  ;;  %v426_v46 = vpop.permute.xlu1 %425 }
  0xaf   : > { %2667 = vmatprep.mubr.f32.mxu0 %v6223_v7 }
 0x162   : > { %v524_v37 = vpop.f32.mrf.mxu0 }
 0x163   : > { %v4145_v38 = vadd.f32 %v524_v37, %v421_v36 }
 0x164   : > { %v526_v39 = vpop.f32.mrf.mxu0 }
 0x165   : > { %v547_v40 = vand.u32 2147483647, %v4145_v38  ;;  %v550_v41 = vand.u32 2139095040, %v4145_v38  ;;  %v4149_v42 = vadd.f32 %v526_v39, %v421_v36  ;;  %vm639_vm0 = vweird.f32 %v4145_v38 }
 0x166   : > { %v530_v43 = vpop.f32.mrf.mxu0 }
 0x167   : > { %v551_v44 = vshrl.u32 %v550_v41, 23  ;;  %v554_v45 = vand.u32 8388607, %v547_v40  ;;  %v651_v47 = vand.u32 2147483647, %v4149_v42  ;;  %v654_v48 = vand.u32 2139095040, %v4149_v42 }
 0x168   : > { %v4155_v49 = vadd.f32 %v530_v43, %v426_v46  ;;  %v532_v50 = vpop.f32.mrf.mxu0 }
 0x169   : > { %v3324_v51 = vadd.s32 4294967169, %v551_v44  ;;  %v655_v52 = vshrl.u32 %v654_v48, 23  ;;  %v658_v53 = vand.u32 8388607, %v651_v47  ;;  %v555_v54 = vor.u32 8388608, %v554_v45 }
 0x16a   : > { %v758_v56 = vand.u32 2139095040, %v4155_v49  ;;  %v4160_v57 = vadd.f32 %v532_v50, %v426_v46  ;;  %v755_v60 = vand.u32 2147483647, %v4155_v49 }
 0x16b   : > { %v557_v55 = vadd.s32 1, %v3324_v51  ;;  %v3328_v58 = vadd.s32 4294967169, %v655_v52  ;;  %v659_v59 = vor.u32 8388608, %v658_v53  ;;  %v4163_v3 = vshll.u32 %v555_v54, 8 }
 0x16c   : > { %v759_v61 = vshrl.u32 %v758_v56, 23  ;;  %v859_v5 = vand.u32 2147483647, %v4160_v57  ;;  %v4172_v9 = vand.u32 8388607, %v755_v60  ;;  %v862_v15 = vand.u32 2139095040, %v4160_v57 }
 0x16d   : > { %vm558_vm6 = vcmp.gt.s32.totalorder %v557_v55, 0  ;;  %v661_v63 = vadd.s32 1, %v3328_v58  ;;  %v4166_v6 = vshll.u32 %v659_v59, 8 }
 0x16e   : > { %v559_v62 = vsel %vm558_vm6, %v557_v55, 0  ;;  %v4168_v8 = vadd.s32 4294967169, %v759_v61 }
 0x16f   : > { %v560_v0 = vshrl.u32 %v559_v62, 5  ;;  %v561_v2 = vand.u32 31, %v559_v62  ;;  %vm662_vm7 = vcmp.gt.s32.totalorder %v661_v63, 0 }
 0x170   : > { %v663_v32 = vsel %vm662_vm7, %v661_v63, 0 }
 0x171   : > { %v562_v10 = vsub.s32 32, %v561_v2  ;;  %v564_v12 = vshll.u32 %v6235_v11, %v561_v2  ;;  %v567_v14 = vshll.u32 %v6232_v13, %v561_v2  ;;  %v570_v17 = vshll.u32 %v6230_v16, %v561_v2 }
 0x172   : > { %v573_v19 = vshll.u32 %v6228_v18, %v561_v2  ;;  %v576_v21 = vshll.u32 %v3966_v20, %v561_v2  ;;  %vm579_vm8 = vcmp.lt.s32.totalorder %v560_v0, 1  ;;  %vm580_vm9 = vcmp.lt.s32.totalorder %v560_v0, 2 }
 0x173   : > { %v565_v22 = vshrl.u32 %v6232_v13, %v562_v10  ;;  %v568_v23 = vshrl.u32 %v6230_v16, %v562_v10  ;;  %v571_v24 = vshrl.u32 %v6228_v18, %v562_v10  ;;  %v563_v25 = vshrl.u32 %v6235_v11, %v562_v10 }
 0x174   : > { %v574_v26 = vshrl.u32 %v3966_v20, %v562_v10  ;;  %v577_v28 = vshrl.u32 %v6247_v27, %v562_v10  ;;  %vm581_vm10 = vcmp.lt.s32.totalorder %v560_v0, 3  ;;  %vm582_vm11 = vcmp.lt.s32.totalorder %v560_v0, 4 }
 0x175   : > { %v566_v29 = vor.u32 %v565_v22, %v564_v12  ;;  %v569_v30 = vor.u32 %v568_v23, %v567_v14  ;;  %v572_v31 = vor.u32 %v571_v24, %v570_v17  ;;  %v665_v37 = vand.u32 31, %v663_v32 }
 0x176   : > { %v575_v33 = vor.u32 %v574_v26, %v573_v19  ;;  %v578_v36 = vor.u32 %v577_v28, %v576_v21  ;;  %v664_v54 = vshrl.u32 %v663_v32, 5 }
 0x177   : > { %v583_v39 = vsel %vm579_vm8, %v563_v25, %v566_v29  ;;  %v584_v41 = vsel %vm582_vm11, %v572_v31, 2102212464  ;;  %v587_v43 = vsel %vm579_vm8, %v566_v29, %v569_v30  ;;  %v591_v44 = vsel %vm579_vm8, %v569_v30, %v572_v31 }
 0x178   : > { %v585_v45 = vsel %vm581_vm10, %v569_v30, %v584_v41  ;;  %v588_v46 = vsel %vm582_vm11, %v575_v33, 920167782  ;;  %v592_v48 = vsel %vm582_vm11, %v578_v36, 1326507024  ;;  %v666_v50 = vsub.s32 32, %v665_v37 }
 0x179   : > { %v586_v51 = vsel %vm580_vm9, %v583_v39, %v585_v45  ;;  %v589_v52 = vsel %vm581_vm10, %v572_v31, %v588_v46  ;;  %v593_v53 = vsel %vm581_vm10, %v575_v33, %v592_v48  ;;  %v668_v59 = vshll.u32 %v6235_v11, %v665_v37 }
 0x17a   : > { %v590_v55 = vsel %vm580_vm9, %v587_v43, %v589_v52  ;;  %v594_v56 = vsel %vm580_vm9, %v591_v44, %v593_v53  ;;  %v602_v58 = vmul.u32 %v4163_v3, %v586_v51  ;;  %v667_v10 = vshrl.u32 %v6235_v11, %v666_v50 }
 0x17b   : > { %v4199_v61 = vmul.u32.u64.low %v4163_v3, %v594_v56  ;;  %v4200_v62 = vmul.u32.u64.high %v4163_v3, %v594_v56, %v4199_v61  ;;  %v4203_v63 = vmul.u32.u64.low %v4163_v3, %v590_v55  ;;  %v4204_v2 = vmul.u32.u64.high %v4163_v3, %v590_v55, %v4203_v63 }
 0x17c   : > { %v669_v12 = vshrl.u32 %v6232_v13, %v666_v50  ;;  %v671_v14 = vshll.u32 %v6232_v13, %v665_v37  ;;  %v672_v0 = vshrl.u32 %v6230_v16, %v666_v50  ;;  %v674_v17 = vshll.u32 %v6230_v16, %v665_v37 }
 0x17d   : > { %v675_v19 = vshrl.u32 %v6228_v18, %v666_v50  ;;  %v677_v21 = vshll.u32 %v6228_v18, %v665_v37  ;;  %v678_v22 = vshrl.u32 %v3966_v20, %v666_v50  ;;  %v680_v3 = vshll.u32 %v3966_v20, %v665_v37 }
 0x17e   : > { %v670_v23 = vor.u32 %v669_v12, %v668_v59  ;;  %v673_v24 = vor.u32 %v672_v0, %v671_v14  ;;  %v681_v25 = vshrl.u32 %v6247_v27, %v666_v50  ;;  %vm604_vm12 = vc.u32 %v4200_v62, %v4203_v63  ;;  %v536_v59 = vpop.f32.mrf.mxu0 }
 0x17f   : > { %v605_v26 = vadd.s32 1, %v4204_v2  ;;  %v676_v28 = vor.u32 %v675_v19, %v674_v17  ;;  %vm683_vm13 = vcmp.lt.s32.totalorder %v664_v54, 1  ;;  %v679_v29 = vor.u32 %v678_v22, %v677_v21 }
 0x180   : > { %v682_v30 = vor.u32 %v681_v25, %v680_v3  ;;  %vm684_vm14 = vcmp.lt.s32.totalorder %v664_v54, 2  ;;  %vm685_vm15 = vcmp.lt.s32.totalorder %v664_v54, 3  ;;  %vm686_vm1 = vcmp.lt.s32.totalorder %v664_v54, 4 }
 0x181   : > { %v606_v31 = vsel %vm604_vm12, %v605_v26, %v4204_v2  ;;  %v687_v32 = vsel %vm683_vm13, %v667_v10, %v670_v23  ;;  %v691_v33 = vsel %vm683_vm13, %v670_v23, %v673_v24  ;;  %v688_v39 = vsel %vm686_vm1, %v676_v28, 2102212464 }
 0x182   : > { %v607_v36 = vadd.s32 %v606_v31, %v602_v58  ;;  %v692_v37 = vsel %vm686_vm1, %v679_v29, 920167782  ;;  %v695_v41 = vsel %vm683_vm13, %v673_v24, %v676_v28  ;;  %v689_v43 = vsel %vm685_vm15, %v673_v24, %v688_v39 }
 0x183   : > { %v693_v44 = vsel %vm685_vm15, %v676_v28, %v692_v37  ;;  %v696_v45 = vsel %vm686_vm1, %v682_v30, 1326507024  ;;  %v765_v46 = vadd.s32 1, %v4168_v8  ;;  %v763_v52 = vor.u32 8388608, %v4172_v9 }
 0x184   : > { %v608_v48 = vadd.s32 536870912, %v607_v36  ;;  %v694_v50 = vsel %vm684_vm14, %v691_v33, %v693_v44  ;;  %v697_v51 = vsel %vm685_vm15, %v679_v29, %v696_v45  ;;  %v690_v53 = vsel %vm684_vm14, %v687_v32, %v689_v43 }
 0x185   : > { %v698_v55 = vsel %vm684_vm14, %v695_v41, %v697_v51  ;;  %v4225_v56 = vmul.u32.u64.low %v4166_v6, %v694_v50  ;;  %v4226_v58 = vmul.u32.u64.high %v4166_v6, %v694_v50, %v4225_v56  ;;  %vm766_vm3 = vcmp.gt.s32.totalorder %v765_v46, 0 }
 0x186   : > { %v4229_v61 = vshrl.u32 %v608_v48, 30  ;;  %v4232_v8 = vmul.u32.u64.low %v4166_v6, %v698_v55  ;;  %v4233_v2 = vmul.u32.u64.high %v4166_v6, %v698_v55, %v4232_v8  ;;  %v767_v10 = vsel %vm766_vm3, %v765_v46, 0 }
 0x187   : > { %v863_v9 = vshrl.u32 %v862_v15, 23  ;;  %v769_v12 = vand.u32 31, %v767_v10  ;;  %v4240_v14 = vand.u32 8388607, %v859_v5  ;;  %v4243_v0 = vadd.f32 %v536_v59, %v4143_v35 }
 0x188   : > { %v610_v54 = vshll.u32 %v4229_v61, 30  ;;  %v603_v17 = vadd.s32 %v4203_v63, %v4200_v62  ;;  %v706_v19 = vmul.u32 %v4166_v6, %v690_v53  ;;  %v709_v21 = vadd.s32 1, %v4226_v58 }
 0x189   : > { %v4248_v22 = vshll.u32 %v763_v52, 8  ;;  %vm708_vm4 = vc.u32 %v4233_v2, %v4225_v56  ;;  %v768_v15 = vshrl.u32 %v767_v10, 5  ;;  %v770_v24 = vsub.s32 32, %v769_v12 }
 0x18a   : > { %v4250_v23 = vsub.s32 %v607_v36, %v610_v54  ;;  %v710_v3 = vsel %vm708_vm4, %v709_v21, %v4226_v58  ;;  %v772_v25 = vshll.u32 %v6235_v11, %v769_v12  ;;  %v775_v26 = vshll.u32 %v6232_v13, %v769_v12 }
 0x18b   : > { %v3336_v62 = vadd.s32 4294967169, %v863_v9  ;;  %v711_v63 = vadd.s32 %v710_v3, %v706_v19  ;;  %v773_v28 = vshrl.u32 %v6232_v13, %v770_v24  ;;  %v778_v29 = vshll.u32 %v6230_v16, %v769_v12 }
 0x18c   : > { %v613_v6 = vsub.s32 0, %v4250_v23  ;;  %v776_v30 = vshrl.u32 %v6230_v16, %v770_v24  ;;  %v779_v31 = vshrl.u32 %v6228_v18, %v770_v24  ;;  %v781_v32 = vshll.u32 %v6228_v18, %v769_v12 }
 0x18d   : > { %v782_v33 = vshrl.u32 %v3966_v20, %v770_v24  ;;  %v712_v39 = vadd.s32 536870912, %v711_v63  ;;  %v774_v37 = vor.u32 %v773_v28, %v772_v25  ;;  %v784_v41 = vshll.u32 %v3966_v20, %v769_v12 }
 0x18e   : > { %v3325_v36 = vmin.u32 %v613_v6, %v4250_v23  ;;  %v777_v43 = vor.u32 %v776_v30, %v775_v26  ;;  %v780_v44 = vor.u32 %v779_v31, %v778_v29  ;;  %v785_v46 = vshrl.u32 %v6247_v27, %v770_v24 }
 0x18f   : > { %v783_v45 = vor.u32 %v782_v33, %v781_v32  ;;  %v4267_v50 = vshrl.u32 %v712_v39, 30  ;;  %v771_v51 = vshrl.u32 %v6235_v11, %v770_v24  ;;  %vm787_vm5 = vcmp.lt.s32.totalorder %v768_v15, 1 }
 0x190   : > { %v615_v48 = vclz %v3325_v36  ;;  %v786_v52 = vor.u32 %v785_v46, %v784_v41  ;;  %vm788_vm6 = vcmp.lt.s32.totalorder %v768_v15, 2  ;;  %vm789_vm7 = vcmp.lt.s32.totalorder %v768_v15, 3 }
 0x191   : > { %vm790_vm8 = vcmp.lt.s32.totalorder %v768_v15, 4  ;;  %v714_v55 = vshll.u32 %v4267_v50, 30  ;;  %v795_v59 = vsel %vm787_vm5, %v774_v37, %v777_v43  ;;  %v791_v8 = vsel %vm787_vm5, %v771_v51, %v774_v37 }
 0x192   : > { %v3326_v53 = vadd.s32 4294967294, %v615_v48  ;;  %v792_v58 = vsel %vm790_vm8, %v780_v44, 2102212464  ;;  %v796_v9 = vsel %vm790_vm8, %v783_v45, 920167782  ;;  %v799_v21 = vsel %vm787_vm5, %v777_v43, %v780_v44 }
 0x193   : > { %v793_v10 = vsel %vm789_vm7, %v777_v43, %v792_v58  ;;  %v800_v54 = vsel %vm790_vm8, %v786_v52, 1326507024  ;;  %v4274_v12 = vsub.s32 %v711_v63, %v714_v55  ;;  %v797_v19 = vsel %vm789_vm7, %v780_v44, %v796_v9 }
 0x194   : > { %vm3327_vm9 = vcmp.lt.s32.totalorder %v3326_v53, 0  ;;  %v798_v3 = vsel %vm788_vm6, %v795_v59, %v797_v19  ;;  %v801_v25 = vsel %vm789_vm7, %v783_v45, %v800_v54  ;;  %v867_v26 = vor.u32 8388608, %v4240_v14 }
 0x195   : > { %v618_v24 = vsel %vm3327_vm9, 0, %v3326_v53  ;;  %v717_v29 = vsub.s32 0, %v4274_v12  ;;  %v794_v30 = vsel %vm788_vm6, %v791_v8, %v793_v10  ;;  %v802_v63 = vsel %vm788_vm6, %v799_v21, %v801_v25 }
 0x196   : > { %v619_v6 = vsub.s32 32, %v618_v24  ;;  %v623_v28 = vsub.s32 4294967266, %v618_v24  ;;  %v4285_v31 = vmul.u32.u64.low %v4248_v22, %v798_v3  ;;  %v4286_v32 = vmul.u32.u64.high %v4248_v22, %v798_v3, %v4285_v31 }
 0x197   : > { %v869_v33 = vadd.s32 1, %v3336_v62  ;;  %v620_v36 = vshll.u32 %v4250_v23, %v618_v24  ;;  %v3329_v14 = vmin.u32 %v717_v29, %v4274_v12  ;;  %v966_v15 = vand.u32 2139095040, %v4243_v0 }
 0x198   : > { %v621_v39 = vshrl.u32 %v603_v17, %v619_v6  ;;  %v624_v37 = vadd.s32 127, %v623_v28  ;;  %v4292_v41 = vmul.u32.u64.low %v4248_v22, %v802_v63  ;;  %v4293_v43 = vmul.u32.u64.high %v4248_v22, %v802_v63, %v4292_v41 }
 0x199   : > { %vm870_vm10 = vcmp.gt.s32.totalorder %v869_v33, 0  ;;  %v719_v46 = vclz %v3329_v14  ;;  %vm549_vm11 = vcmp.lt.s32.totalorder %v4145_v38, 0  ;;  %v813_v62 = vadd.s32 1, %v4286_v32 }
 0x19a   : > { %v622_v44 = vor.u32 %v621_v39, %v620_v36  ;;  %v625_v45 = vshll.u32 %v624_v37, 23  ;;  %v871_v48 = vsel %vm870_vm10, %v869_v33, 0  ;;  %v4298_v17 = vshll.u32 %v867_v26, 8 }
 0x19b   : > { %v873_v23 = vand.u32 31, %v871_v48  ;;  %v963_v51 = vand.u32 2147483647, %v4243_v0  ;;  %v707_v53 = vadd.s32 %v4225_v56, %v4233_v2  ;;  %v3330_v55 = vadd.s32 4294967294, %v719_v46 }
 0x19c   : > { %v626_v52 = vor.u32 4788187, %v625_v45  ;;  %v810_v58 = vmul.u32 %v4248_v22, %v794_v30  ;;  %vm812_vm12 = vc.u32 %v4293_v43, %v4285_v31  ;;  %v4306_v59 = vshrl.u32 %v871_v48, 5 }
 0x19d   : > { %v874_v8 = vsub.s32 32, %v873_v23  ;;  %v4308_v10 = vshrl.u32 %v966_v15, 23  ;;  %vm4312_vm13 = vcmp.le.f32.partialorder %v547_v40, 0.7853982  ;;  %v629_v19 = vcvt.s32.f32 %v622_v44 }
 0x19e   : > { %v627_v54 = vand.u32 2147483647, %v626_v52  ;;  %vm3331_vm14 = vcmp.lt.s32.totalorder %v3330_v55, 0  ;;  %v814_v56 = vsel %vm812_vm12, %v813_v62, %v4286_v32  ;;  %v876_v21 = vshll.u32 %v6235_v11, %v873_v23 }
 0x19f   : > { %v722_v2 = vsel %vm3331_vm14, 0, %v3330_v55  ;;  %v815_v22 = vadd.s32 %v814_v56, %v810_v58  ;;  %v4320_v24 = vand.u32 8388607, %v963_v51  ;;  %v879_v40 = vshll.u32 %v6232_v13, %v873_v23 }
 0x1a0   : > { %v630_v3 = vmul.f32 %v629_v19, %v627_v54  ;;  %v723_v25 = vsub.s32 32, %v722_v2  ;;  %v727_v26 = vsub.s32 4294967266, %v722_v2  ;;  %v724_v6 = vshll.u32 %v4274_v12, %v722_v2 }
 0x1a1   : > { %v816_v28 = vadd.s32 536870912, %v815_v22  ;;  %v877_v29 = vshrl.u32 %v6232_v13, %v874_v8  ;;  %v880_v30 = vshrl.u32 %v6230_v16, %v874_v8  ;;  %v883_v36 = vshrl.u32 %v6228_v18, %v874_v8 }
 0x1a2   : > { %v631_v63 = vxor.u32 2147483648, %v630_v3  ;;  %v725_v32 = vshrl.u32 %v707_v53, %v723_v25  ;;  %v728_v33 = vadd.s32 127, %v727_v26  ;;  %v875_v37 = vshrl.u32 %v6235_v11, %v874_v8 }
 0x1a3   : > { %v4327_v39 = vshrl.u32 %v816_v28, 30  ;;  %v882_v14 = vshll.u32 %v6230_v16, %v873_v23  ;;  %v886_v41 = vshrl.u32 %v3966_v20, %v874_v8  ;;  %v885_v45 = vshll.u32 %v6228_v18, %v873_v23 }
 0x1a4   : > { %v632_v12 = vsel %vm549_vm11, %v631_v63, %v630_v3  ;;  %v726_v15 = vor.u32 %v725_v32, %v724_v6  ;;  %v729_v44 = vshll.u32 %v728_v33, 23  ;;  %vm653_vm15 = vcmp.lt.s32.totalorder %v4149_v42, 0 }
 0x1a5   : > { %v818_v46 = vshll.u32 %v4327_v39, 30  ;;  %v878_v48 = vor.u32 %v877_v29, %v876_v21  ;;  %v881_v62 = vor.u32 %v880_v30, %v879_v40  ;;  %v884_v52 = vor.u32 %v883_v36, %v882_v14 }
 0x1a6   : > { %v730_v53 = vor.u32 4788187, %v729_v44  ;;  %v887_v55 = vor.u32 %v886_v41, %v885_v45  ;;  %v888_v58 = vshll.u32 %v3966_v20, %v873_v23  ;;  %v889_v54 = vshrl.u32 %v6247_v27, %v874_v8 }
 0x1a7   : > { %v635_v19 = vsel %vm4312_vm13, %v4145_v38, %v632_v12  ;;  %v733_v56 = vcvt.s32.f32 %v726_v15  ;;  %v4342_v2 = vsub.s32 %v815_v22, %v818_v46  ;;  %vm891_vm1 = vcmp.lt.s32.totalorder %v4306_v59, 1 }
 0x1a8   : > { %v731_v3 = vand.u32 2147483647, %v730_v53  ;;  %v890_v21 = vor.u32 %v889_v54, %v888_v58  ;;  %vm893_vm3 = vcmp.lt.s32.totalorder %v4306_v59, 3  ;;  %vm894_vm4 = vcmp.lt.s32.totalorder %v4306_v59, 4 }
 0x1a9   : > { %v821_v23 = vsub.s32 0, %v4342_v2  ;;  %v895_v25 = vsel %vm891_vm1, %v875_v37, %v878_v48  ;;  %v896_v8 = vsel %vm894_vm4, %v884_v52, 2102212464  ;;  %v899_v26 = vsel %vm891_vm1, %v878_v48, %v881_v62 }
 0x1aa   : > { %v734_v40 = vmul.f32 %v733_v56, %v731_v3  ;;  %v897_v6 = vsel %vm893_vm3, %v881_v62, %v896_v8  ;;  %v900_v22 = vsel %vm894_vm4, %v887_v55, 920167782  ;;  %v903_v28 = vsel %vm891_vm1, %v881_v62, %v884_v52 }
 0x1ab   : > { %v3333_v29 = vmin.u32 %v821_v23, %v4342_v2  ;;  %vm892_vm5 = vcmp.lt.s32.totalorder %v4306_v59, 2  ;;  %v901_v30 = vsel %vm893_vm3, %v884_v52, %v900_v22  ;;  %v904_v63 = vsel %vm894_vm4, %v890_v21, 1326507024  ;;  %v538_v52 = vpop.f32.mrf.mxu0 }
 0x1ac   : > { %v735_v32 = vxor.u32 2147483648, %v734_v40  ;;  %v898_v33 = vsel %vm892_vm5, %v895_v25, %v897_v6  ;;  %v902_v36 = vsel %vm892_vm5, %v899_v26, %v901_v30  ;;  %v905_v37 = vsel %vm893_vm3, %v887_v55, %v904_v63 }
 0x1ad   : > { %v823_v14 = vclz %v3333_v29  ;;  %v906_v41 = vsel %vm892_vm5, %v903_v28, %v905_v37  ;;  %v4362_v12 = vmul.u32.u64.low %v4298_v17, %v902_v36  ;;  %v4363_v15 = vmul.u32.u64.high %v4298_v17, %v902_v36, %v4362_v12 }
 0x1ae   : > { %v736_v59 = vsel %vm653_vm15, %v735_v32, %v734_v40  ;;  %v4377_v44 = vmul.u32.u64.low %v4298_v17, %v906_v41  ;;  %v4378_v45 = vmul.u32.u64.high %v4298_v17, %v906_v41, %v4377_v44  ;;  %v3340_v46 = vadd.s32 4294967169, %v4308_v10 }
 0x1af   : > { %vm4383_vm6 = vcmp.le.f32.partialorder %v651_v47, 0.7853982  ;;  %v3334_v62 = vadd.s32 4294967294, %v823_v14  ;;  %3783 = vcosq.f32 %v635_v19  ;;  %v811_v53 = vadd.s32 %v4285_v31, %v4293_v43 }
 0x1b0   : > { %v914_v55 = vmul.u32 %v4298_v17, %v898_v33  ;;  %v973_v58 = vadd.s32 1, %v3340_v46  ;;  %v4397_v10 = vsel %vm4383_vm6, %v4149_v42, %v736_v59  ;;  %v917_v47 = vadd.s32 1, %v4363_v15 }
 0x1b1   : > { %vm3335_vm7 = vcmp.lt.s32.totalorder %v3334_v62, 0  ;;  %v971_v54 = vor.u32 8388608, %v4320_v24  ;;  %vm916_vm8 = vc.u32 %v4378_v45, %v4362_v12  ;;  %v4404_v31 = vadd.f32 %v538_v52, %v4143_v35 }
 0x1b2   : > { %v826_v56 = vsel %vm3335_vm7, 0, %v3334_v62  ;;  %vm974_vm9 = vcmp.gt.s32.totalorder %v973_v58, 0  ;;  %3785 = vsinq.f32 %v635_v19  ;;  %v918_v3 = vsel %vm916_vm8, %v917_v47, %v4363_v15 }
 0x1b3   : > { %v827_v43 = vsub.s32 32, %v826_v56  ;;  %v831_v17 = vsub.s32 4294967266, %v826_v56  ;;  %v4408_v21 = vand.u32 127, %v379_v1  ;;  %3787 = vcosq.f32 %v4397_v10 }
 0x1b4   : > { %v919_v23 = vadd.s32 %v918_v3, %v914_v55  ;;  %v975_v24 = vsel %vm974_vm9, %v973_v58, 0  ;;  %v828_v25 = vshll.u32 %v4342_v2, %v826_v56  ;;  %v4412_v22 = vshll.u32 %v971_v54, 8 }
 0x1b5   : > { %v829_v8 = vshrl.u32 %v811_v53, %v827_v43  ;;  %v832_v26 = vadd.s32 127, %v831_v17  ;;  %v977_v40 = vand.u32 31, %v975_v24  ;;  %v976_v35 = vshrl.u32 %v975_v24, 5 }
 0x1b6   : > { %v920_v6 = vadd.s32 536870912, %v919_v23  ;;  %v6227_v19 = vand.u32 2147483647, %v4404_v31  ;;  %vm757_vm10 = vcmp.lt.s32.totalorder %v4155_v49, 0  ;;  %vm4430_vm12 = vcmp.le.f32.partialorder %v755_v60, 0.7853982 }
 0x1b7   : > { %v830_v28 = vor.u32 %v829_v8, %v828_v25  ;;  %v833_v29 = vshll.u32 %v832_v26, 23  ;;  %v978_v30 = vsub.s32 32, %v977_v40  ;;  %v980_v1 = vshll.u32 %v6235_v11, %v977_v40  ;;  %v542_v8 = vpop.f32.mrf.mxu0 }
 0x1b8   : > { %v4417_v63 = vshrl.u32 %v920_v6, 30  ;;  %v983_v2 = vshll.u32 %v6232_v13, %v977_v40  ;;  %v986_v32 = vshll.u32 %v6230_v16, %v977_v40  ;;  %v989_v33 = vshll.u32 %v6228_v18, %v977_v40 }
 0x1b9   : > { %v834_v36 = vor.u32 4788187, %v833_v29  ;;  %v837_v37 = vcvt.s32.f32 %v830_v28  ;;  %v979_v14 = vshrl.u32 %v6235_v11, %v978_v30  ;;  %v981_v41 = vshrl.u32 %v6232_v13, %v978_v30 }
 0x1ba   : > { %v922_v15 = vshll.u32 %v4417_v63, 30  ;;  %v984_v59 = vshrl.u32 %v6230_v16, %v978_v30  ;;  %v987_v44 = vshrl.u32 %v6228_v18, %v978_v30  ;;  %v990_v46 = vshrl.u32 %v3966_v20, %v978_v30 }
 0x1bb   : > { %v835_v52 = vand.u32 2147483647, %v834_v36  ;;  %v982_v53 = vor.u32 %v981_v41, %v980_v1  ;;  %v992_v55 = vshll.u32 %v3966_v20, %v977_v40  ;;  %v993_v58 = vshrl.u32 %v6247_v27, %v978_v30 }
 0x1bc   : > { %v4436_v47 = vsub.s32 %v919_v23, %v922_v15  ;;  %v985_v54 = vor.u32 %v984_v59, %v983_v2  ;;  %v988_v56 = vor.u32 %v987_v44, %v986_v32  ;;  %v991_v43 = vor.u32 %v990_v46, %v989_v33  ;;  %v4438_v17 = vpop.eup %3783  ;;  %v544_v46 = vpop.f32.mrf.mxu0 }
 0x1bd   : > { %v838_v3 = vmul.f32 %v837_v37, %v835_v52  ;;  %v994_v24 = vor.u32 %v993_v58, %v992_v55  ;;  %vm995_vm14 = vcmp.lt.s32.totalorder %v976_v35, 1  ;;  %vm996_vm1 = vcmp.lt.s32.totalorder %v976_v35, 2 }
 0x1be   : > { %v925_v60 = vsub.s32 0, %v4436_v47  ;;  %vm997_vm3 = vcmp.lt.s32.totalorder %v976_v35, 3  ;;  %vm998_vm4 = vcmp.lt.s32.totalorder %v976_v35, 4  ;;  %v999_v25 = vsel %vm995_vm14, %v979_v14, %v982_v53 }
 0x1bf   : > { %v839_v26 = vxor.u32 2147483648, %v838_v3  ;;  %v1000_v40 = vsel %vm998_vm4, %v988_v56, 2102212464  ;;  %v1003_v6 = vsel %vm995_vm14, %v982_v53, %v985_v54  ;;  %v1004_v23 = vsel %vm998_vm4, %v991_v43, 920167782  ;;  %v4441_v28 = vpop.eup %3785 }
 0x1c0   : > { %v3337_v29 = vmin.u32 %v925_v60, %v4436_v47  ;;  %v1001_v30 = vsel %vm997_vm3, %v985_v54, %v1000_v40  ;;  %v1005_v1 = vsel %vm997_vm3, %v988_v56, %v1004_v23  ;;  %v1007_v2 = vsel %vm995_vm14, %v985_v54, %v988_v56  ;;  %v4446_v32 = vpop.eup %3787 }
 0x1c1   : > { %v840_v33 = vsel %vm757_vm10, %v839_v26, %v838_v3  ;;  %v1006_v36 = vsel %vm996_vm1, %v1003_v6, %v1005_v1  ;;  %v1008_v37 = vsel %vm998_vm4, %v994_v24, 1326507024  ;;  %v1070_v14 = vand.u32 2139095040, %v4404_v31 }
 0x1c2   : > { %v927_v41 = vclz %v3337_v29  ;;  %v1009_v15 = vsel %vm997_vm3, %v991_v43, %v1008_v37  ;;  %v1074_v59 = vand.u32 8388607, %v6227_v19  ;;  %v4456_v44 = vadd.f32 %v542_v8, %v4141_v34 }
 0x1c3   : > { %v1002_v52 = vsel %vm996_vm1, %v999_v25, %v1001_v30  ;;  %v1010_v53 = vsel %vm996_vm1, %v1007_v2, %v1009_v15  ;;  %v4461_v55 = vmul.u32.u64.low %v4412_v22, %v1006_v36  ;;  %v4462_v58 = vmul.u32.u64.high %v4412_v22, %v1006_v36, %v4461_v55 }
 0x1c4   : > { %v843_v54 = vsel %vm4430_vm12, %v4155_v49, %v840_v33  ;;  %v3338_v56 = vadd.s32 4294967294, %v927_v41  ;;  %v4468_v43 = vmul.u32.u64.low %v4412_v22, %v1010_v53  ;;  %v4469_v3 = vmul.u32.u64.high %v4412_v22, %v1010_v53, %v4468_v43 }
 0x1c5   : > { %3789 = vsinq.f32 %v4397_v10  ;;  %v915_v24 = vadd.s32 %v4362_v12, %v4378_v45  ;;  %v1071_v35 = vshrl.u32 %v1070_v14, 23  ;;  %v4475_v60 = vadd.f32 %v544_v46, %v4141_v34 }
 0x1c6   : > { %vm3339_vm5 = vcmp.lt.s32.totalorder %v3338_v56, 0  ;;  %v1018_v25 = vmul.u32 %v4412_v22, %v1002_v52  ;;  %v6226_v8 = vand.u32 2147483647, %v4456_v44  ;;  %v1174_v26 = vand.u32 2139095040, %v4456_v44 }
 0x1c7   : > { %3791 = vcosq.f32 %v843_v54  ;;  %v930_v40 = vsel %vm3339_vm5, 0, %v3338_v56  ;;  %v1021_v6 = vadd.s32 1, %v4462_v58  ;;  %v3344_v23 = vadd.s32 4294967169, %v1071_v35 }
 0x1c8   : > { %3793 = vsinq.f32 %v843_v54  ;;  %v931_v10 = vsub.s32 32, %v930_v40  ;;  %v935_v29 = vsub.s32 4294967266, %v930_v40  ;;  %v1075_v12 = vor.u32 8388608, %v1074_v59 }
 0x1c9   : > { %v932_v45 = vshll.u32 %v4436_v47, %v930_v40  ;;  %vm1020_vm7 = vc.u32 %v4469_v3, %v4461_v55  ;;  %v1077_v34 = vadd.s32 1, %v3344_v23  ;;  %v1175_v30 = vshrl.u32 %v1174_v26, 23 }
 0x1ca   : > { %v933_v22 = vshrl.u32 %v915_v24, %v931_v10  ;;  %v936_v1 = vadd.s32 127, %v935_v29  ;;  %v1022_v2 = vsel %vm1020_vm7, %v1021_v6, %v4462_v58  ;;  %v1178_v33 = vand.u32 8388607, %v6226_v8 }
 0x1cb   : > { %v1023_v36 = vadd.s32 %v1022_v2, %v1018_v25  ;;  %vm1078_vm8 = vcmp.gt.s32.totalorder %v1077_v34, 0  ;;  %v3348_v37 = vadd.s32 4294967169, %v1175_v30  ;;  %v6225_v14 = vand.u32 2147483647, %v4475_v60 }
 0x1cc   : > { %v934_v41 = vor.u32 %v933_v22, %v932_v45  ;;  %v937_v15 = vshll.u32 %v936_v1, 23  ;;  %v1079_v59 = vsel %vm1078_vm8, %v1077_v34, 0  ;;  %v4487_v47 = vshll.u32 %v1075_v12, 8 }
 0x1cd   : > { %vm6241_vm9 = vcmp.lt.s32.totalorder %v4160_v57, 0  ;;  %v4491_v46 = vadd.s32 %v4461_v55, %v4469_v3  ;;  %v1024_v52 = vadd.s32 536870912, %v1023_v36  ;;  %v1081_v53 = vand.u32 31, %v1079_v59 }
 0x1ce   : > { %v1179_v58 = vor.u32 8388608, %v1178_v33  ;;  %vm4495_vm14 = vcmp.le.f32.partialorder %v859_v5, 0.7853982  ;;  %v938_v56 = vor.u32 4788187, %v937_v15  ;;  %v941_v43 = vcvt.s32.f32 %v934_v41 }
 0x1cf   : > { %v1080_v24 = vshrl.u32 %v1079_v59, 5  ;;  %v1181_v35 = vadd.s32 1, %v3348_v37  ;;  %v4499_v25 = vshrl.u32 %v1024_v52, 30  ;;  %v1082_v26 = vsub.s32 32, %v1081_v53 }
 0x1d0   : > { %v1084_v40 = vshll.u32 %v6235_v11, %v1081_v53  ;;  %v1278_v55 = vand.u32 2139095040, %v4475_v60  ;;  %v939_v3 = vand.u32 2147483647, %v938_v56  ;;  %v1087_v6 = vshll.u32 %v6232_v13, %v1081_v53 }
 0x1d1   : > { %v1090_v23 = vshll.u32 %v6230_v16, %v1081_v53  ;;  %v1093_v5 = vshll.u32 %v6228_v18, %v1081_v53  ;;  %v1026_v10 = vshll.u32 %v4499_v25, 30  ;;  %v1085_v29 = vshrl.u32 %v6232_v13, %v1082_v26 }
 0x1d2   : > { %v1088_v12 = vshrl.u32 %v6230_v16, %v1082_v26  ;;  %v1096_v45 = vshll.u32 %v3966_v20, %v1081_v53  ;;  %v4510_v34 = vpop.eup %3789  ;;  %v942_v30 = vmul.f32 %v941_v43, %v939_v3  ;;  %v1091_v22 = vshrl.u32 %v6228_v18, %v1082_v26 }
 0x1d3   : > { %v1094_v1 = vshrl.u32 %v3966_v20, %v1082_v26  ;;  %v1097_v2 = vshrl.u32 %v6247_v27, %v1082_v26  ;;  %v4515_v33 = vsub.s32 %v1023_v36, %v1026_v10  ;;  %v1083_v37 = vshrl.u32 %v6235_v11, %v1082_v26 }
 0x1d4   : > { %v1086_v41 = vor.u32 %v1085_v29, %v1084_v40  ;;  %v1089_v15 = vor.u32 %v1088_v12, %v1087_v6  ;;  %v4518_v59 = vpop.eup %3791  ;;  %v943_v52 = vxor.u32 2147483648, %v942_v30  ;;  %v1092_v56 = vor.u32 %v1091_v22, %v1090_v23 }
 0x1d5   : > { %v1095_v53 = vor.u32 %v1094_v1, %v1093_v5  ;;  %vm1099_vm1 = vcmp.lt.s32.totalorder %v1080_v24, 1  ;;  %v4520_v7 = vpop.eup %3793  ;;  %v1029_v43 = vsub.s32 0, %v4515_v33  ;;  %v1098_v3 = vor.u32 %v1097_v2, %v1096_v45 }
 0x1d6   : > { %vm1101_vm3 = vcmp.lt.s32.totalorder %v1080_v24, 3  ;;  %vm1102_vm4 = vcmp.lt.s32.totalorder %v1080_v24, 4  ;;  %v944_v36 = vsel %vm6241_vm9, %v943_v52, %v942_v30  ;;  %v1103_v26 = vsel %vm1099_vm1, %v1083_v37, %v1086_v41 }
 0x1d7   : > { %v1104_v40 = vsel %vm1102_vm4, %v1092_v56, 2102212464  ;;  %v1107_v6 = vsel %vm1099_vm1, %v1086_v41, %v1089_v15  ;;  %v947_v23 = vsel %vm4495_vm14, %v4160_v57, %v944_v36  ;;  %v3341_v5 = vmin.u32 %v1029_v43, %v4515_v33 }
 0x1d8   : > { %v1105_v10 = vsel %vm1101_vm3, %v1089_v15, %v1104_v40  ;;  %v1108_v29 = vsel %vm1102_vm4, %v1095_v53, 920167782  ;;  %vm1100_vm5 = vcmp.lt.s32.totalorder %v1080_v24, 2  ;;  %v1111_v45 = vsel %vm1099_vm1, %v1089_v15, %v1092_v56 }
 0x1d9   : > { %v1109_v12 = vsel %vm1101_vm3, %v1092_v56, %v1108_v29  ;;  %v4536_v30 = vshll.u32 %v1179_v58, 8  ;;  %3795 = vcosq.f32 %v947_v23  ;;  %v1031_v22 = vclz %v3341_v5 }
 0x1da   : > { %v1110_v1 = vsel %vm1100_vm5, %v1107_v6, %v1109_v12  ;;  %v1112_v2 = vsel %vm1102_vm4, %v1098_v3, 1326507024  ;;  %v1106_v37 = vsel %vm1100_vm5, %v1103_v26, %v1105_v10  ;;  %vm1182_vm7 = vcmp.gt.s32.totalorder %v1181_v35, 0 }
 0x1db   : > { %v1113_v41 = vsel %vm1101_vm3, %v1095_v53, %v1112_v2  ;;  %v4541_v52 = vmul.u32.u64.low %v4487_v47, %v1110_v1  ;;  %v4542_v43 = vmul.u32.u64.high %v4487_v47, %v1110_v1, %v4541_v52  ;;  %v3342_v36 = vadd.s32 4294967294, %v1031_v22 }
 0x1dc   : > { %v1114_v40 = vsel %vm1100_vm5, %v1111_v45, %v1113_v41  ;;  %v1279_v29 = vshrl.u32 %v1278_v55, 23  ;;  %v1183_v56 = vsel %vm1182_vm7, %v1181_v35, 0  ;;  %v4551_v3 = vand.u32 8388607, %v6225_v14 }
 0x1dd   : > { %v4546_v58 = vmul.u32.u64.low %v4487_v47, %v1114_v40  ;;  %v4547_v15 = vmul.u32.u64.high %v4487_v47, %v1114_v40, %v4546_v58  ;;  %3797 = vsinq.f32 %v947_v23  ;;  %vm3343_vm8 = vcmp.lt.s32.totalorder %v3342_v36, 0 }
 0x1de   : > { %v1122_v24 = vmul.u32 %v4487_v47, %v1106_v37  ;;  %v1185_v53 = vand.u32 31, %v1183_v56  ;;  %v1034_v26 = vsel %vm3343_vm8, 0, %v3342_v36  ;;  %v1125_v6 = vadd.s32 1, %v4542_v43 }
 0x1df   : > { %v4555_v5 = vshrl.u32 %v1183_v56, 5  ;;  %v4557_v55 = vadd.s32 4294967169, %v1279_v29  ;;  %v1035_v10 = vsub.s32 32, %v1034_v26  ;;  %v1039_v12 = vsub.s32 4294967266, %v1034_v26 }
 0x1e0   : > { %v1186_v45 = vsub.s32 32, %v1185_v53  ;;  %v1283_v35 = vor.u32 8388608, %v4551_v3  ;;  %v1036_v22 = vshll.u32 %v4515_v33, %v1034_v26  ;;  %vm1124_vm1 = vc.u32 %v4547_v15, %v4541_v52 }
 0x1e1   : > { %v1188_v47 = vshll.u32 %v6235_v11, %v1185_v53  ;;  %v633_v23 = vsub.s32 4, %v4229_v61  ;;  %v1037_v1 = vshrl.u32 %v4491_v46, %v1035_v10  ;;  %v1040_v2 = vadd.s32 127, %v1039_v12 }
 0x1e2   : > { %v1126_v37 = vsel %vm1124_vm1, %v1125_v6, %v4542_v43  ;;  %v1191_v41 = vshll.u32 %v6232_v13, %v1185_v53  ;;  %v1187_v40 = vshrl.u32 %v6235_v11, %v1186_v45  ;;  %v1189_v29 = vshrl.u32 %v6232_v13, %v1186_v45 }
 0x1e3   : > { %v1127_v36 = vadd.s32 %v1126_v37, %v1122_v24  ;;  %v1192_v33 = vshrl.u32 %v6230_v16, %v1186_v45  ;;  %v1038_v58 = vor.u32 %v1037_v1, %v1036_v22  ;;  %v1041_v56 = vshll.u32 %v1040_v2, 23 }
 0x1e4   : > { %v1194_v26 = vshll.u32 %v6230_v16, %v1185_v53  ;;  %v1195_v14 = vshrl.u32 %v6228_v18, %v1186_v45  ;;  %vm6240_vm3 = vcmp.lt.s32.totalorder %v4243_v0, 0  ;;  %v1190_v10 = vor.u32 %v1189_v29, %v1188_v47 }
 0x1e5   : > { %v1128_v46 = vadd.s32 536870912, %v1127_v36  ;;  %v1197_v43 = vshll.u32 %v6228_v18, %v1185_v53  ;;  %v1198_v24 = vshrl.u32 %v3966_v20, %v1186_v45  ;;  %vm4578_vm4 = vcmp.le.f32.partialorder %v963_v51, 0.7853982 }
 0x1e6   : > { %v1042_v12 = vor.u32 4788187, %v1041_v56  ;;  %v1045_v22 = vcvt.s32.f32 %v1038_v58  ;;  %v1193_v1 = vor.u32 %v1192_v33, %v1191_v41  ;;  %v1196_v2 = vor.u32 %v1195_v14, %v1194_v26  ;;  %v4582_v37 = vpop.eup %3795 }
 0x1e7   : > { %v4584_v8 = vshrl.u32 %v1128_v46, 30  ;;  %v1199_v19 = vor.u32 %v1198_v24, %v1197_v43  ;;  %v1200_v47 = vshll.u32 %v3966_v20, %v1185_v53  ;;  %v1201_v29 = vshrl.u32 %v6247_v27, %v1186_v45 }
 0x1e8   : > { %v1043_v18 = vand.u32 2147483647, %v1042_v12  ;;  %vm1203_vm5 = vcmp.lt.s32.totalorder %v4555_v5, 1  ;;  %vm1205_vm7 = vcmp.lt.s32.totalorder %v4555_v5, 3  ;;  %vm1206_vm8 = vcmp.lt.s32.totalorder %v4555_v5, 4 }
 0x1e9   : > { %v1130_v51 = vshll.u32 %v4584_v8, 30  ;;  %v1202_v41 = vor.u32 %v1201_v29, %v1200_v47  ;;  %v1207_v14 = vsel %vm1203_vm5, %v1187_v40, %v1190_v10  ;;  %v1208_v33 = vsel %vm1206_vm8, %v1196_v2, 2102212464 }
 0x1ea   : > { %v1046_v58 = vmul.f32 %v1045_v22, %v1043_v18  ;;  %v1209_v53 = vsel %vm1205_vm7, %v1193_v1, %v1208_v33  ;;  %v1211_v56 = vsel %vm1203_vm5, %v1190_v10, %v1193_v1  ;;  %v1212_v45 = vsel %vm1206_vm8, %v1199_v19, 920167782  ;;  %v4598_v26 = vpop.eup %3797 }
 0x1eb   : > { %v4600_v46 = vsub.s32 %v1127_v36, %v1130_v51  ;;  %vm1204_vm1 = vcmp.lt.s32.totalorder %v4555_v5, 2  ;;  %v1213_v40 = vsel %vm1205_vm7, %v1196_v2, %v1212_v45  ;;  %v1215_v43 = vsel %vm1203_vm5, %v1193_v1, %v1196_v2 }
 0x1ec   : > { %v1047_v24 = vxor.u32 2147483648, %v1046_v58  ;;  %v1210_v12 = vsel %vm1204_vm1, %v1207_v14, %v1209_v53  ;;  %v1214_v18 = vsel %vm1204_vm1, %v1211_v56, %v1213_v40  ;;  %v1216_v22 = vsel %vm1206_vm8, %v1202_v41, 1326507024 }
 0x1ed   : > { %v1133_v10 = vsub.s32 0, %v4600_v46  ;;  %v1217_v47 = vsel %vm1205_vm7, %v1199_v19, %v1216_v22  ;;  %v4611_v36 = vmul.u32.u64.low %v4536_v30, %v1214_v18  ;;  %v4612_v29 = vmul.u32.u64.high %v4536_v30, %v1214_v18, %v4611_v36 }
 0x1ee   : > { %v1048_v51 = vsel %vm6240_vm3, %v1047_v24, %v1046_v58  ;;  %v1123_v1 = vadd.s32 %v4541_v52, %v4547_v15  ;;  %v1218_v2 = vsel %vm1204_vm1, %v1215_v43, %v1217_v47  ;;  %v1285_v14 = vadd.s32 1, %v4557_v55 }
 0x1ef   : > { %v1051_v41 = vsel %vm4578_vm4, %v4243_v0, %v1048_v51  ;;  %v3345_v19 = vmin.u32 %v1133_v10, %v4600_v46  ;;  %v4625_v5 = vmul.u32.u64.low %v4536_v30, %v1218_v2  ;;  %v4626_v33 = vmul.u32.u64.high %v4536_v30, %v1218_v2, %v4625_v5 }
 0x1f0   : > { %v1226_v53 = vmul.u32 %v4536_v30, %v1210_v12  ;;  %vm1286_vm5 = vcmp.gt.s32.totalorder %v1285_v14, 0  ;;  %v4631_v58 = vshll.u32 %v1283_v35, 8  ;;  %v634_v52 = vsel %vm549_vm11, %v633_v23, %v4229_v61 }
 0x1f1   : > { %3799 = vcosq.f32 %v1051_v41  ;;  %v1135_v15 = vclz %v3345_v19  ;;  %v1229_v55 = vadd.s32 1, %v4612_v29  ;;  %v1287_v56 = vsel %vm1286_vm5, %v1285_v14, 0 }
 0x1f2   : > { %3801 = vsinq.f32 %v1051_v41  ;;  %v1289_v45 = vand.u32 31, %v1287_v56  ;;  %v636_v30 = vsel %vm4312_vm13, 0, %v634_v52  ;;  %vm1228_vm7 = vc.u32 %v4626_v33, %v4611_v36 }
 0x1f3   : > { %v3346_v35 = vadd.s32 4294967294, %v1135_v15  ;;  %v4644_v40 = vshrl.u32 %v1287_v56, 5  ;;  %v1230_v23 = vsel %vm1228_vm7, %v1229_v55, %v4612_v29  ;;  %v640_v12 = vadd.s32 3, %v636_v30 }
 0x1f4   : > { %v1290_v43 = vsub.s32 32, %v1289_v45  ;;  %v1292_v24 = vshll.u32 %v6235_v11, %v1289_v45  ;;  %v1231_v18 = vadd.s32 %v1230_v23, %v1226_v53  ;;  %v1295_v9 = vshll.u32 %v6232_v13, %v1289_v45 }
 0x1f5   : > { %vm3347_vm11 = vcmp.lt.s32.totalorder %v3346_v35, 0  ;;  %v1298_v22 = vshll.u32 %v6230_v16, %v1289_v45  ;;  %v6279_v2 = vmov 2102212464   ;;  %v1304_v61 = vshll.u32 %v3966_v20, %v1289_v45 }
 0x1f6   : > { %v1138_v10 = vsel %vm3347_vm11, 0, %v3346_v35  ;;  %v1293_v47 = vshrl.u32 %v6232_v13, %v1290_v43  ;;  %v1296_v51 = vshrl.u32 %v6230_v16, %v1290_v43  ;;  %v1301_v14 = vshll.u32 %v6279_v2, %v1289_v45 }
 0x1f7   : > { %v1139_v41 = vsub.s32 32, %v1138_v10  ;;  %v1143_v19 = vsub.s32 4294967266, %v1138_v10  ;;  %v1232_v29 = vadd.s32 536870912, %v1231_v18  ;;  %v1291_v5 = vshrl.u32 %v6235_v11, %v1290_v43 }
 0x1f8   : > { %v1140_v52 = vshll.u32 %v4600_v46, %v1138_v10  ;;  %v1294_v15 = vor.u32 %v1293_v47, %v1292_v24  ;;  %v1299_v53 = vshrl.u32 %v6279_v2, %v1290_v43  ;;  %v1302_v55 = vshrl.u32 %v3966_v20, %v1290_v43 }
 0x1f9   : > { %v1141_v56 = vshrl.u32 %v1123_v1, %v1139_v41  ;;  %v1144_v30 = vadd.s32 127, %v1143_v19  ;;  %v4658_v35 = vshrl.u32 %v1232_v29, 30  ;;  %v1297_v23 = vor.u32 %v1296_v51, %v1295_v9 }
 0x1fa   : > { %v1300_v16 = vor.u32 %v1299_v53, %v1298_v22  ;;  %v1303_v13 = vor.u32 %v1302_v55, %v1301_v14  ;;  %v1305_v3 = vshrl.u32 %v6247_v27, %v1290_v43  ;;  %vm1307_vm13 = vcmp.lt.s32.totalorder %v4644_v40, 1 }
 0x1fb   : > { %v1142_v4 = vor.u32 %v1141_v56, %v1140_v52  ;;  %v1145_v11 = vshll.u32 %v1144_v30, 23  ;;  %v1234_v46 = vshll.u32 %v4658_v35, 30  ;;  %vm6239_vm8 = vcmp.lt.s32.totalorder %v4404_v31, 0 }
 0x1fc   : > { %v1306_v1 = vor.u32 %v1305_v3, %v1304_v61  ;;  %vm1308_vm1 = vcmp.lt.s32.totalorder %v4644_v40, 2  ;;  %vm1309_vm5 = vcmp.lt.s32.totalorder %v4644_v40, 3  ;;  %vm1310_vm7 = vcmp.lt.s32.totalorder %v4644_v40, 4 }
 0x1fd   : > { %v6280_v45 = vand.u32 2147483647, %v4404_v31  ;;  %v6281_v43 = vmov 0  ;;  %v1146_v24 = vor.u32 4788187, %v1145_v11  ;;  %v4674_v9 = vsub.s32 %v1231_v18, %v1234_v46 }
 0x1fe   : > { %v1311_v22 = vsel %vm1307_vm13, %v1291_v5, %v1294_v15  ;;  %v1312_v3 = vsel %vm1310_vm7, %v1300_v16, 2102212464  ;;  %v4680_v61 = vpop.eup %3799  ;;  %v1149_v10 = vcvt.s32.f32 %v1142_v4  ;;  %v1315_v51 = vsel %vm1307_vm13, %v1294_v15, %v1297_v23 }
 0x1ff   : > { %vm4670_vm11 = vcmp.le.f32.partialorder %v6280_v45, 0.7853982  ;;  %v1313_v47 = vsel %vm1309_vm5, %v1297_v23, %v1312_v3  ;;  %v1316_v11 = vsel %vm1310_vm7, %v1303_v13, 920167782  ;;  %v4689_v18 = vpop.eup %3801  ;;  %v1147_v14 = vand.u32 2147483647, %v1146_v24 }
 0x200   : > { %v6282_v43 = vsel %vm4670_vm11, 4294967295, %v6281_v43  ;;  %v1237_v41 = vsub.s32 0, %v4674_v9  ;;  %v1317_v19 = vsel %vm1309_vm5, %v1300_v16, %v1316_v11  ;;  %v1319_v4 = vsel %vm1307_vm13, %v1297_v23, %v1300_v16 }
 0x201   : > { %v1227_v29 = vadd.s32 %v4611_v36, %v4626_v33  ;;  %v1318_v5 = vsel %vm1308_vm1, %v1315_v51, %v1317_v19  ;;  %v1320_v52 = vsel %vm1310_vm7, %v1306_v1, 1326507024  ;;  %v641_v15 = vand.u32 3, %v640_v12 }
 0x202   : > { %v1150_v53 = vmul.f32 %v1149_v10, %v1147_v14  ;;  %v3349_v55 = vmin.u32 %v1237_v41, %v4674_v9  ;;  %v1321_v16 = vsel %vm1309_vm5, %v1303_v13, %v1320_v52  ;;  %v4706_v56 = vstv %s1382_s25  ;;  %s350_s25 = scalar_lea.vmem [#allocation3], %s349_s19 }
 0x203   : > { %v1314_v30 = vsel %vm1308_vm1, %v1311_v22, %v1313_v47  ;;  %v1322_v36 = vsel %vm1308_vm1, %v1319_v4, %v1321_v16  ;;  %v4713_v33 = vmul.u32.u64.low %v4631_v58, %v1318_v5  ;;  %v4714_v23 = vmul.u32.u64.high %v4631_v58, %v1318_v5, %v4713_v33 }
 0x204   : > { %v1151_v46 = vxor.u32 2147483648, %v1150_v53  ;;  %v1239_v12 = vclz %v3349_v55  ;;  %v4717_v1 = vmul.u32.u64.low %v4631_v58, %v1322_v36  ;;  %v4718_v45 = vmul.u32.u64.high %v4631_v58, %v1322_v36, %v4717_v1 }
 0x205   : > { %vm642_vm13 = vcmp.lt.s32.totalorder %v641_v15, 2  ;;  %vm643_vm5 = vcmp.eq.s32.totalorder %v641_v15, 0  ;;  %vm646_vm7 = vcmp.eq.s32.totalorder %v641_v15, 2  ;;  %v1387_v13 = vadd.s32 %v4706_v56, %v4408_v21 }
 0x206   : > { %v1152_v40 = vsel %vm6239_vm8, %v1151_v46, %v1150_v53  ;;  %v3350_v24 = vadd.s32 4294967294, %v1239_v12  ;;  %v6283_v22 = vxor.u32 2147483648, %v4441_v28  ;;  %v6284_v10 = vxor.u32 2147483648, %v4438_v17  ;;  %v6383_v53 = vld [vmem:[#allocation6_spill] sm:$0xff] }
 0x207   : > { %v1155_v51 = vsel %vm4670_vm11, %v4404_v31, %v1152_v40  ;;  %v1330_v11 = vmul.u32 %v4631_v58, %v1314_v30  ;;  %v1333_v14 = vadd.s32 1, %v4714_v23  ;;  %vm1389_vm2 = vcmp.ge.s32.totalorder %v1387_v13, 0 }
 0x208   : > { %v645_v3 = vsel %vm643_vm5, %v4438_v17, %v6283_v22  ;;  %v648_v47 = vsel %vm646_vm7, %v6284_v10, %v4441_v28  ;;  %vm3351_vm1 = vcmp.lt.s32.totalorder %v3350_v24, 0  ;;  %vm1332_vm5 = vc.u32 %v4718_v45, %v4713_v33 }
 0x209   : > { %v649_v41 = vsel %vm642_vm13, %v645_v3, %v648_v47  ;;  %v3515_v19 = vstv %s3514_s26  ;;  %3803 = vcosq.f32 %v1155_v51  ;;  %v1242_v17 = vsel %vm3351_vm1, 0, %v3350_v24  ;;  %s2455_s26 = sadd.s32 4294967295, %s4355_s29 }
 0x20a   : > { %v1334_v28 = vsel %vm1332_vm5, %v1333_v14, %v4714_v23  ;;  %v650_v4 = vsel %vm639_vm0, nan, %v649_v41  ;;  %v1243_v58 = vsub.s32 32, %v1242_v17  ;;  %v1244_v5 = vshll.u32 %v4674_v9, %v1242_v17 }
 0x20b   : > { %v1247_v52 = vsub.s32 4294967266, %v1242_v17  ;;  %v1335_v15 = vadd.s32 %v1334_v28, %v1330_v11  ;;  %vm1391_vm13 = vcmp.lt.s32.totalorder %v1387_v13, 520  ;;  %vm4750_vm7 = vcmp.ne.s32.totalorder %v3515_v19, 0 }
 0x20c   : > { %v3548_v55 = vstv %s3683_s27  ;;  %v737_v16 = vsub.s32 4, %v4267_v50  ;;  %v1245_v30 = vshrl.u32 %v1227_v29, %v1243_v58  ;;  %vm4756_vm1 = vmand %vm1389_vm2, %vm1391_vm13  ;;  %3805 = vsinq.f32 %v1155_v51 }
 0x20d   : > { %v1248_v36 = vadd.s32 127, %v1247_v52  ;;  %v1336_v46 = vadd.s32 536870912, %v1335_v15  ;;  %vm4760_vm0 = vcmp.ne.s32.totalorder %v3548_v55, 0  ;;  %v4765_v23 = vadd.s32 %v4713_v33, %v4718_v45 }
 0x20e   : > { %v1399_v12 = vsel %vm4756_vm1, %v650_v4, 0.0  ;;  %v738_v29 = vsel %vm653_vm15, %v737_v16, %v4267_v50  ;;  %v1246_v1 = vor.u32 %v1245_v30, %v1244_v5  ;;  %vm1173_vm2 = vcmp.lt.s32.totalorder %v4456_v44, 0 }
 0x20f   : > { %v1249_v13 = vshll.u32 %v1248_v36, 23  ;;  %v4772_v40 = vshrl.u32 %v1336_v46, 30  ;;  %v3517_v24 = vsel %vm4750_vm7, %v1399_v12, 0  ;;  %v740_v45 = vsel %vm4383_vm6, 0, %v738_v29 }
 0x210   : > { %v4779_v33 = vsel %vm4760_vm0, %v650_v4, %v3517_v24  ;;  %v4785_v50 = vadd.s32 128, %v4408_v21  ;;  %v841_v22 = vsub.s32 4, %v4327_v39  ;;  %v6291_v3 = vand.u32 2147483647, %v4456_v44 }
 0x211   : > { %v1250_v47 = vor.u32 4788187, %v1249_v13  ;;  %v1338_v51 = vshll.u32 %v4772_v40, 30  ;;  %1470 = vrot.lane.b32.xlu1 %v4779_v33, %s3960_s30  ;;  %v744_v48 = vadd.s32 3, %v740_v45  ;;  %v748_v11 = vxor.u32 2147483648, %v4510_v34 }
 0x212   : > { %vm4790_vm15 = vcmp.le.f32.partialorder %v6291_v3, 0.7853982  ;;  %v1253_v14 = vcvt.s32.f32 %v1246_v1  ;;  %v751_v41 = vxor.u32 2147483648, %v4446_v32  ;;  %v1388_v19 = vadd.s32 %v4706_v56, %v4785_v50  ;;  %v1431_v1 = vld [vmem:[%s6215_s4 + $0x8] sm:$0xff] }
 0x213   : > { %v842_v17 = vsel %vm757_vm10, %v841_v22, %v4327_v39  ;;  %v1251_v28 = vand.u32 2147483647, %v1250_v47  ;;  %v4804_v4 = vsub.s32 %v1335_v15, %v1338_v51  ;;  %v745_v58 = vand.u32 3, %v744_v48 }
 0x214   : > { %v844_v5 = vsel %vm4430_vm12, 0, %v842_v17  ;;  %vm1390_vm6 = vcmp.ge.s32.totalorder %v1388_v19, 0  ;;  %vm1392_vm13 = vcmp.lt.s32.totalorder %v1388_v19, 520  ;;  %v852_v55 = vxor.u32 2147483648, %v4520_v7 }
 0x215   : > { %v848_v52 = vadd.s32 3, %v844_v5  ;;  %v1254_v16 = vmul.f32 %v1253_v14, %v1251_v28  ;;  %v1341_v30 = vsub.s32 0, %v4804_v4  ;;  %vm747_vm8 = vcmp.eq.s32.totalorder %v745_v58, 0  ;;  %vm4819_vm3 = vmand %vm1390_vm6, %vm1392_vm13 }
 0x216   : > { %v855_v56 = vxor.u32 2147483648, %v4518_v59  ;;  %v749_v39 = vsel %vm747_vm8, %v4446_v32, %v748_v11  ;;  %vm750_vm10 = vcmp.eq.s32.totalorder %v745_v58, 2  ;;  %v945_v36 = vsub.s32 4, %v4417_v63  ;;  %v4813_v46 = vpop.eup %3803 }
 0x217   : > { %v849_v15 = vand.u32 3, %v848_v52  ;;  %v1255_v62 = vxor.u32 2147483648, %v1254_v16  ;;  %v3353_v12 = vmin.u32 %v1341_v30, %v4804_v4  ;;  %vm746_vm12 = vcmp.lt.s32.totalorder %v745_v58, 2 }
 0x218   : > { %v752_v29 = vsel %vm750_vm10, %v751_v41, %v4510_v34  ;;  %vm6296_vm11 = vweird.f32 %v4149_v42  ;;  %vm6297_vm6 = vcmp.lt.s32.totalorder %v4160_v57, 0  ;;  %v956_v28 = vxor.u32 2147483648, %v4598_v26 }
 0x219   : > { %v753_v13 = vsel %vm746_vm12, %v749_v39, %v752_v29  ;;  %vm850_vm8 = vcmp.lt.s32.totalorder %v849_v15, 2  ;;  %vm851_vm9 = vcmp.eq.s32.totalorder %v849_v15, 0  ;;  %vm854_vm5 = vcmp.eq.s32.totalorder %v849_v15, 2  ;;  %v4837_v48 = vpop.eup %3805 }
 0x21a   : > { %v1256_v32 = vsel %vm1173_vm2, %v1255_v62, %v1254_v16  ;;  %v1343_v24 = vclz %v3353_v12  ;;  %v754_v45 = vsel %vm6296_vm11, nan, %v753_v13  ;;  %v853_v22 = vsel %vm851_vm9, %v4518_v59, %v852_v55 }
 0x21b   : > { %v1259_v34 = vsel %vm4790_vm15, %v4456_v44, %v1256_v32  ;;  %v1400_v3 = vsel %vm4819_vm3, %v754_v45, 0.0  ;;  %v856_v47 = vsel %vm854_vm5, %v855_v56, %v4520_v7  ;;  %v946_v51 = vsel %vm6297_vm6, %v945_v36, %v4417_v63 }
 0x21c   : > { %v3354_v11 = vadd.s32 4294967294, %v1343_v24  ;;  %v3521_v42 = vsel %vm4750_vm7, %v1400_v3, 0  ;;  %vm847_vm9 = vweird.f32 %v4155_v49  ;;  %v857_v59 = vsel %vm850_vm8, %v853_v22, %v856_v47 }
 0x21d   : > { %3807 = vcosq.f32 %v1259_v34  ;;  %v4844_v14 = vsel %vm4760_vm0, %v754_v45, %v3521_v42  ;;  %v858_v41 = vsel %vm847_vm9, nan, %v857_v59  ;;  %v948_v7 = vsel %vm4495_vm14, 0, %v946_v51 }
 0x21e   : > { %3809 = vsinq.f32 %v1259_v34  ;;  %vm3355_vm11 = vcmp.lt.s32.totalorder %v3354_v11, 0  ;;  %1472 = vrot.lane.b32.xlu0 %v4844_v14, %s3960_s30  ;;  %v1401_v63 = vsel %vm4756_vm1, %v858_v41, 0.0  ;;  %v952_v19 = vadd.s32 3, %v948_v7 }
 0x21f   : > { %v1346_v49 = vsel %vm3355_vm11, 0, %v3354_v11  ;;  %v3525_v17 = vsel %vm4750_vm7, %v1401_v63, 0  ;;  %v1049_v58 = vsub.s32 4, %v4499_v25  ;;  %v959_v55 = vxor.u32 2147483648, %v4582_v37 }
 0x220   : > { %v1347_v5 = vsub.s32 32, %v1346_v49  ;;  %v1351_v54 = vsub.s32 4294967266, %v1346_v49  ;;  %v4858_v52 = vsel %vm4760_vm0, %v858_v41, %v3525_v17  ;;  %v1348_v16 = vshll.u32 %v4804_v4, %v1346_v49 }
 0x221   : > { %1474 = vrot.lane.b32.xlu1 %v4858_v52, %s3960_s30  ;;  %v953_v30 = vand.u32 3, %v952_v19  ;;  %vm6298_vm14 = vcmp.lt.s32.totalorder %v4243_v0, 0  ;;  %v1060_v39 = vxor.u32 2147483648, %v4689_v18  ;;  %v1063_v12 = vxor.u32 2147483648, %v4680_v61 }
 0x222   : > { %v1050_v56 = vsel %vm6298_vm14, %v1049_v58, %v4499_v25  ;;  %v1349_v15 = vshrl.u32 %v4765_v23, %v1347_v5  ;;  %v1352_v36 = vadd.s32 127, %v1351_v54  ;;  %vm951_vm12 = vweird.f32 %v4160_v57 }
 0x223   : > { %v1052_v62 = vsel %vm4578_vm4, 0, %v1050_v56  ;;  %vm954_vm5 = vcmp.lt.s32.totalorder %v953_v30, 2  ;;  %vm955_vm13 = vcmp.eq.s32.totalorder %v953_v30, 0  ;;  %vm958_vm10 = vcmp.eq.s32.totalorder %v953_v30, 2 }
 0x224   : > { %v1056_v4 = vadd.s32 3, %v1052_v62  ;;  %v1350_v29 = vor.u32 %v1349_v15, %v1348_v16  ;;  %v1353_v13 = vshll.u32 %v1352_v36, 23  ;;  %v957_v32 = vsel %vm955_vm13, %v4582_v37, %v956_v28 }
 0x225   : > { %v960_v25 = vsel %vm958_vm10, %v959_v55, %v4598_v26  ;;  %v1153_v45 = vsub.s32 4, %v4584_v8  ;;  %vm1277_vm4 = vcmp.lt.s32.totalorder %v4475_v60, 0  ;;  %vm1055_vm11 = vweird.f32 %v4243_v0 }
 0x226   : > { %v961_v24 = vsel %vm954_vm5, %v957_v32, %v960_v25  ;;  %v1057_v23 = vand.u32 3, %v1056_v4  ;;  %v1354_v6 = vor.u32 4788187, %v1353_v13  ;;  %v1357_v22 = vcvt.s32.f32 %v1350_v29 }
 0x227   : > { %v962_v34 = vsel %vm951_vm12, nan, %v961_v24  ;;  %vm6299_vm14 = vcmp.lt.s32.totalorder %v4404_v31, 0  ;;  %vm6300_vm5 = vnez %v6282_v43  ;;  %v6301_v19 = vand.u32 2147483647, %v4475_v60 }
 0x228   : > { %v1402_v3 = vsel %vm4819_vm3, %v962_v34, 0.0  ;;  %vm1058_vm8 = vcmp.lt.s32.totalorder %v1057_v23, 2  ;;  %vm1059_vm6 = vcmp.eq.s32.totalorder %v1057_v23, 0  ;;  %vm1062_vm9 = vcmp.eq.s32.totalorder %v1057_v23, 2 }
 0x229   : > { %v1355_v37 = vand.u32 2147483647, %v1354_v6  ;;  %v3529_v26 = vsel %vm4750_vm7, %v1402_v3, 0  ;;  %v1061_v57 = vsel %vm1059_vm6, %v4680_v61, %v1060_v39  ;;  %v1064_v47 = vsel %vm1062_vm9, %v1063_v12, %v4689_v18 }
 0x22a   : > { %v4885_v51 = vsel %vm4760_vm0, %v962_v34, %v3529_v26  ;;  %v1065_v11 = vsel %vm1058_vm8, %v1061_v57, %v1064_v47  ;;  %v1154_v42 = vsel %vm6299_vm14, %v1153_v45, %v4584_v8  ;;  %v3808_v59 = vpop.eup %3807  ;;  %v1257_v18 = vsub.s32 4, %v4658_v35 }
 0x22b   : > { %v1358_v41 = vmul.f32 %v1357_v22, %v1355_v37  ;;  %1476 = vrot.lane.b32.xlu0 %v4885_v51, %s3960_s30  ;;  %v1066_v7 = vsel %vm1055_vm11, nan, %v1065_v11  ;;  %v1156_v61 = vsel %vm6300_vm5, 0, %v1154_v42  ;;  %v3810_v63 = vpop.eup %3809  ;;  %vm4898_vm13 = vcmp.le.f32.partialorder %v6301_v19, 0.7853982 }
 0x22c   : > { %v1403_v8 = vsel %vm4756_vm1, %v1066_v7, 0.0  ;;  %v1160_v49 = vadd.s32 3, %v1156_v61  ;;  %v1164_v17 = vxor.u32 2147483648, %v4837_v48  ;;  %v1167_v58 = vxor.u32 2147483648, %v4813_v46  ;;  %v1432_v61 = vld [vmem:[%s6215_s4 + $0x10] sm:$0xff] }
 0x22d   : > { %v1359_v28 = vxor.u32 2147483648, %v1358_v41  ;;  %v3533_v43 = vsel %vm4750_vm7, %v1403_v8, 0  ;;  %v1258_v5 = vsel %vm1173_vm2, %v1257_v18, %v4658_v35  ;;  %v1361_v30 = vsub.s32 4, %v4772_v40  ;;  %v1430_v18 = vld [vmem:[%s6215_s4] sm:$0xff] }
 0x22e   : > { %v4913_v54 = vsel %vm4760_vm0, %v1066_v7, %v3533_v43  ;;  %v1161_v55 = vand.u32 3, %v1160_v49  ;;  %v1260_v16 = vsel %vm4790_vm15, 0, %v1258_v5  ;;  %v1268_v15 = vxor.u32 2147483648, %v3810_v63 }
 0x22f   : > { %v1360_v56 = vsel %vm1277_vm4, %v1359_v28, %v1358_v41  ;;  %1478 = vrot.lane.b32.xlu1 %v4913_v54, %s3960_s30  ;;  %v1264_v39 = vadd.s32 3, %v1260_v16  ;;  %v1271_v36 = vxor.u32 2147483648, %v3808_v59  ;;  %vm1159_vm15 = vweird.f32 %v4404_v31 }
 0x230   : > { %v1363_v35 = vsel %vm4898_vm13, %v4475_v60, %v1360_v56  ;;  %vm1162_vm2 = vcmp.lt.s32.totalorder %v1161_v55, 2  ;;  %vm1163_vm10 = vcmp.eq.s32.totalorder %v1161_v55, 0  ;;  %vm1166_vm12 = vcmp.eq.s32.totalorder %v1161_v55, 2 }
 0x231   : > { %3811 = vcosq.f32 %v1363_v35  ;;  %v1165_v10 = vsel %vm1163_vm10, %v4813_v46, %v1164_v17  ;;  %v1168_v62 = vsel %vm1166_vm12, %v1167_v58, %v4837_v48  ;;  %v1265_v12 = vand.u32 3, %v1264_v39 }
 0x232   : > { %3813 = vsinq.f32 %v1363_v35  ;;  %v1169_v4 = vsel %vm1162_vm2, %v1165_v10, %v1168_v62  ;;  %v1362_v29 = vsel %vm1277_vm4, %v1361_v30, %v4772_v40  ;;  %vm1263_vm11 = vweird.f32 %v4456_v44 }
 0x233   : > { %v1170_v13 = vsel %vm1159_vm15, nan, %v1169_v4  ;;  %vm1267_vm8 = vcmp.eq.s32.totalorder %v1265_v12, 0  ;;  %vm1270_vm6 = vcmp.eq.s32.totalorder %v1265_v12, 2  ;;  %vm1266_vm9 = vcmp.lt.s32.totalorder %v1265_v12, 2 }
 0x234   : > { %v1404_v32 = vsel %vm4819_vm3, %v1170_v13, 0.0  ;;  %v1269_v25 = vsel %vm1267_vm8, %v3808_v59, %v1268_v15  ;;  %v1272_v46 = vsel %vm1270_vm6, %v1271_v36, %v3810_v63  ;;  %v1364_v24 = vsel %vm4898_vm13, 0, %v1362_v29 }
 0x235   : > { %v3537_v48 = vsel %vm4750_vm7, %v1404_v32, 0  ;;  %v1273_v31 = vsel %vm1266_vm9, %v1269_v25, %v1272_v46  ;;  %v1368_v22 = vadd.s32 3, %v1364_v24  ;;  %vm1367_vm5 = vweird.f32 %v4475_v60  ;;  %v1433_v60 = vld [vmem:[%s6215_s4 + $0x18] sm:$0xff]  ;;  %v1426_v32 = vld [vmem:[%s6214_s3] sm:$0xff] }
 0x236   : > { %v4940_v40 = vsel %vm4760_vm0, %v1170_v13, %v3537_v48  ;;  %v1274_v23 = vsel %vm1263_vm11, nan, %v1273_v31  ;;  %vm6309_vm12 = vcmask 1039360   ;;  %vm6252_vm9 = vcmask 785408  }
 0x237   : > { %1480 = vrot.lane.b32.xlu0 %v4940_v40, %s3960_s30  ;;  %v1405_v45 = vsel %vm4756_vm1, %v1274_v23, 0.0  ;;  %v1369_v34 = vand.u32 3, %v1368_v22  ;;  %vm6310_vm15 = vmmov %vm6309_vm12  ;;  %v6313_v25 = vmov 0.0  }
 0x238   : > { %v3541_v6 = vsel %vm4750_vm7, %v1405_v45, 0  ;;  %vm6311_vm8 = vmmov %vm6309_vm12 }
 0x239   : > { %v4950_v44 = vsel %vm4760_vm0, %v1274_v23, %v3541_v6  ;;  %vm1374_vm1 = vcmp.eq.s32.totalorder %v1369_v34, 2  ;;  %vm1371_vm4 = vcmp.eq.s32.totalorder %v1369_v34, 0  ;;  %vm1370_vm14 = vcmp.lt.s32.totalorder %v1369_v34, 2  ;;  %vm6312_vm6 = vmmov %vm6311_vm8 }
 0x23a   : > { %1482 = vrot.lane.b32.xlu1 %v4950_v44, %s3960_s30 }
 0x23e   : > { %v3812_v3 = vpop.eup %3811  ;;  %1450 = vrot.lane.b32.xlu1 %v4913_v54, %s6304_s10 }
 0x23f   : > { %v3814_v37 = vpop.eup %3813  ;;  %v1375_v26 = vxor.u32 2147483648, %v3812_v3 }
 0x240   : > { %v1372_v38 = vxor.u32 2147483648, %v3814_v37 }
 0x241   : > { %v1376_v57 = vsel %vm1374_vm1, %v1375_v26, %v3814_v37 }
 0x242   : > { %v1373_v47 = vsel %vm1371_vm4, %v3812_v3, %v1372_v38  ;;  %1454 = vrot.lane.b32.xlu1 %v4950_v44, %s6304_s10 }
 0x243   : > { %v1377_v11 = vsel %vm1370_vm14, %v1373_v47, %v1376_v57 }
 0x244   : > { %v1378_v42 = vsel %vm1367_vm5, nan, %v1377_v11 }
 0x245   : > { %v1406_v59 = vsel %vm4819_vm3, %v1378_v42, 0.0  ;;  %vm6305_vm3 = vcmask 1031168  }
 0x246   : > { %v3545_v41 = vsel %vm4750_vm7, %v1406_v59, 0  ;;  %1446 = vrot.lane.b32.xlu1 %v4858_v52, %s6304_s10  ;;  %vm6306_vm13 = vmmov %vm6305_vm3 }
 0x247   : > { %v3578_v7 = vsel %vm4760_vm0, %v1378_v42, %v3545_v41  ;;  %vm6307_vm2 = vmmov %vm6305_vm3 }
 0x248   : > { %1484 = vrot.lane.b32.xlu0 %v3578_v7, %s3960_s30  ;;  %vm6308_vm10 = vmmov %vm6307_vm2 }
 0x24a   : > { %1442 = vrot.lane.b32.xlu1 %v4779_v33, %s6304_s10 }
 0x24c   : > { %1452 = vrot.lane.b32.xlu0 %v4940_v40, %s6304_s10 }
 0x24e   : > { %1515 = vperm.xlu1 %3781, %v1433_v60  }
 0x250   : > { %1456 = vrot.lane.b32.xlu0 %v3578_v7, %s6304_s10 }
 0x252   : > { %1505 = vperm.xlu1 %3781, %v1431_v1  }
 0x254   : > { %1448 = vrot.lane.b32.xlu0 %v4885_v51, %s6304_s10 }
 0x258   : > { %1444 = vrot.lane.b32.xlu0 %v4844_v14, %s6304_s10 }
 0x25c   : > { %1510 = vperm.xlu0 %3780, %v1432_v61  }
 0x260   : > { %1500 = vperm.xlu0 %3780, %v1430_v18  }
 0x283   : > { %v1471_v63 = vpop.permute.xlu1 %1470 }
 0x290   : > { %v1473_v0 = vpop.permute.xlu0 %1472 }
 0x291   : > { %v1486_v39 = vsel %vm6308_vm10, %v1471_v63, %v1473_v0 }
 0x293   : > { %v1475_v19 = vpop.permute.xlu1 %1474 }
 0x29d   : > { %v1477_v49 = vpop.permute.xlu0 %1476 }
 0x29e   : > { %v1487_v56 = vsel %vm6307_vm2, %v1475_v19, %v1477_v49 }
 0x2a1   : > { %v1479_v8 = vpop.permute.xlu1 %1478 }
 0x2a9   : > { %v1481_v28 = vpop.permute.xlu0 %1480 }
 0x2aa   : > { %v1488_v55 = vsel %vm6306_vm13, %v1479_v8, %v1481_v28 }
 0x2ac   : > { %v1483_v17 = vpop.permute.xlu1 %1482 }
 0x2b0   : > { %v1451_v43 = vpop.permute.xlu1 %1450 }
 0x2b4   : > { %v1455_v30 = vpop.permute.xlu1 %1454 }
 0x2b8   : > { %v1447_v35 = vpop.permute.xlu1 %1446 }
 0x2ba   : > { %v1485_v58 = vpop.permute.xlu0 %1484 }
 0x2bb   : > { %1539 = vmatprep.subr.mxu1 %v1485_v58  ;;  %v1489_v5 = vsel %vm6305_vm3, %v1483_v17, %v1485_v58 }
 0x2bc   : > { %1540 = vmatpush1.msra.mxu1 %v1489_v5  ;;  %v1443_v4 = vpop.permute.xlu1 %1442 }
 0x2bd   : > { %1541 = vmatprep.subr.mxu1 %v1481_v28 }
 0x2be   : > { %v1453_v16 = vpop.permute.xlu0 %1452  ;;  %1542 = vmatpush1.msra.mxu1 %v1488_v55  ;;  %v6314_v55 = vmov 683565275  }
 0x2bf   : > { %1543 = vmatprep.subr.mxu1 %v1477_v49  ;;  %v1460_v10 = vsel %vm6310_vm15, %v1451_v43, %v1453_v16 }
 0x2c0   : > { %1544 = vmatpush1.msra.mxu1 %v1487_v56 }
 0x2c1   : > { %1545 = vmatprep.subr.mxu1 %v1473_v0 }
 0x2c2   : > { %v1457_v15 = vpop.permute.xlu0 %1456  ;;  %1546 = vmatpush1.msra.mxu1 %v1486_v39 }
 0x2c3   : > { %1547 = vmatprep.subr.mxu1 %v1457_v15  ;;  %v1461_v36 = vsel %vm6309_vm12, %v1455_v30, %v1457_v15  ;;  %v6315_v30 = vmov 2475754826   ;;  %v6316_v15 = vmov 2131351028  }
 0x2c4   : > { %1548 = vmatpush1.msra.mxu1 %v1461_v36 }
 0x2c5   : > { %1549 = vmatprep.subr.mxu1 %v1453_v16 }
 0x2c6   : > { %v1449_v62 = vpop.permute.xlu0 %1448  ;;  %1550 = vmatpush1.msra.mxu1 %v1460_v10 }
 0x2c7   : > { %1551 = vmatprep.subr.mxu1 %v1449_v62  ;;  %v1459_v12 = vsel %vm6311_vm8, %v1447_v35, %v1449_v62 }
 0x2c8   : > { %1552 = vmatpush1.msra.mxu1 %v1459_v12 }
 0x2ca   : > { %v1445_v29 = vpop.permute.xlu0 %1444 }
 0x2cb   : > { %1553 = vmatprep.subr.mxu1 %v1445_v29  ;;  %v1458_v13 = vsel %vm6312_vm6, %v1443_v4, %v1445_v29 }
 0x2cc   : > { %1554 = vmatpush1.msra.mxu1 %v1458_v13 }
 0x2cd   : > { %1555 = vmatprep.subr.mxu1 %v3578_v7 }
 0x2ce   : > { %1556 = vmatpush1.msra.mxu1 %v4950_v44 }
 0x2cf   : > { %1557 = vmatprep.subr.mxu1 %v4940_v40 }
 0x2d0   : > { %1558 = vmatpush1.msra.mxu1 %v4913_v54  ;;  %v5026_v54 = vpop.permute.xlu1 %1515 }
 0x2d1   : > { %1559 = vmatprep.subr.mxu1 %v4885_v51  ;;  %v1427_v51 = vld [vmem:[%s6214_s3 + $0x8] sm:$0xff] }
 0x2d2   : > { %1560 = vmatpush1.msra.mxu1 %v4858_v52 }
 0x2d3   : > { %1561 = vmatprep.subr.mxu1 %v4844_v14  ;;  %v1428_v14 = vld [vmem:[%s6214_s3 + $0x10] sm:$0xff] }
 0x2d4   : > { %1562 = vmatpush1.msra.mxu1 %v4779_v33  ;;  %v1429_v33 = vld [vmem:[%s6214_s3 + $0x18] sm:$0xff]  ;;  %v1506_v22 = vpop.permute.xlu1 %1505 }
 0x2d5   : > { %3356 = vmatmul.mubr.msk.f32.vlgmr.msra.gmra.mxu1 %vm6252_vm9, %v1426_v32  ;;  %3421 = vmatprep.subr.mxu1 %v6313_v25 }
 0x2d6   : > { %1601 = vmatprep.mubr.f32.mxu1 %v6313_v25 }
 0x2d7   : > { %v5024_v52 = vpop.permute.xlu0 %1510 }
 0x2d9   : > { %3357 = vmatmul.mubr.msk.f32.gmra.mxu1 %vm6252_vm9, %v1427_v51 }
 0x2da   : > { %1607 = vmatprep.mubr.f32.mxu1 %v6313_v25 }
 0x2db   : > { %v1501_v46 = vpop.permute.xlu0 %1500 }
 0x2dd   : > { %3358 = vmatmul.mubr.msk.f32.gmra.mxu1 %vm6252_vm9, %v1428_v14 }
 0x2de   : > { %1613 = vmatprep.mubr.f32.mxu1 %v6313_v25 }
 0x2e1   : > { %3359 = vmatmul.mubr.msk.f32.gmra.mxu1 %vm6252_vm9, %v1429_v33 }
 0x395   : > { %v1597_v48 = vpop.f32.mrf.mxu1 }
 0x396   : > { %v5028_v31 = vadd.f32 %v1597_v48, %v1501_v46 }
 0x397   : > { %v1599_v24 = vpop.f32.mrf.mxu1 }
 0x398   : > { %v1620_v40 = vand.u32 2147483647, %v5028_v31  ;;  %v1623_v23 = vand.u32 2139095040, %v5028_v31  ;;  %v5032_v45 = vadd.f32 %v1599_v24, %v1501_v46 }
 0x399   : > { %v1603_v6 = vpop.f32.mrf.mxu1 }
 0x39a   : > { %v1624_v44 = vshrl.u32 %v1623_v23, 23  ;;  %v1627_v34 = vand.u32 8388607, %v1620_v40  ;;  %v1724_v3 = vand.u32 2147483647, %v5032_v45  ;;  %v1727_v37 = vand.u32 2139095040, %v5032_v45 }
 0x39b   : > { %v5038_v26 = vadd.f32 %v1603_v6, %v1506_v22  ;;  %v1605_v38 = vpop.f32.mrf.mxu1 }
 0x39c   : > { %v3360_v57 = vadd.s32 4294967169, %v1624_v44  ;;  %v1728_v47 = vshrl.u32 %v1727_v37, 23  ;;  %v1731_v11 = vand.u32 8388607, %v1724_v3  ;;  %v1628_v42 = vor.u32 8388608, %v1627_v34 }
 0x39d   : > { %v1831_v41 = vand.u32 2139095040, %v5038_v26  ;;  %v5043_v7 = vadd.f32 %v1605_v38, %v1506_v22  ;;  %v1828_v61 = vand.u32 2147483647, %v5038_v26 }
 0x39e   : > { %v1630_v59 = vadd.s32 1, %v3360_v57  ;;  %v3364_v60 = vadd.s32 4294967169, %v1728_v47  ;;  %v1732_v1 = vor.u32 8388608, %v1731_v11  ;;  %v5046_v49 = vshll.u32 %v1628_v42, 8 }
 0x39f   : > { %v1832_v18 = vshrl.u32 %v1831_v41, 23  ;;  %v1932_v17 = vand.u32 2147483647, %v5043_v7  ;;  %v5055_v58 = vand.u32 8388607, %v1828_v61  ;;  %v1935_v39 = vand.u32 2139095040, %v5043_v7 }
 0x3a0   : > { %vm1631_vm11 = vcmp.gt.s32.totalorder %v1630_v59, 0  ;;  %v1734_v19 = vadd.s32 1, %v3364_v60  ;;  %v5049_v28 = vshll.u32 %v1732_v1, 8 }
 0x3a1   : > { %v1632_v63 = vsel %vm1631_vm11, %v1630_v59, 0  ;;  %v5051_v43 = vadd.s32 4294967169, %v1832_v18 }
 0x3a2   : > { %v1633_v0 = vshrl.u32 %v1632_v63, 5  ;;  %v1634_v8 = vand.u32 31, %v1632_v63  ;;  %vm1735_vm1 = vcmp.gt.s32.totalorder %v1734_v19, 0 }
 0x3a3   : > { %v1736_v46 = vsel %vm1735_vm1, %v1734_v19, 0 }
 0x3a4   : > { %v1635_v5 = vsub.s32 32, %v1634_v8  ;;  %v1637_v16 = vshll.u32 %v6314_v55, %v1634_v8  ;;  %v1640_v56 = vshll.u32 %v6315_v30, %v1634_v8  ;;  %v1643_v36 = vshll.u32 %v6316_v15, %v1634_v8 }
 0x3a5   : > { %v1646_v35 = vshll.u32 %v6279_v2, %v1634_v8  ;;  %v1649_v10 = vshll.u32 %v3966_v20, %v1634_v8  ;;  %vm1652_vm4 = vcmp.lt.s32.totalorder %v1633_v0, 1  ;;  %vm1653_vm14 = vcmp.lt.s32.totalorder %v1633_v0, 2 }
 0x3a6   : > { %v1638_v62 = vshrl.u32 %v6315_v30, %v1635_v5  ;;  %v1641_v12 = vshrl.u32 %v6316_v15, %v1635_v5  ;;  %v1644_v4 = vshrl.u32 %v6279_v2, %v1635_v5  ;;  %v1636_v29 = vshrl.u32 %v6314_v55, %v1635_v5 }
 0x3a7   : > { %v1647_v13 = vshrl.u32 %v3966_v20, %v1635_v5  ;;  %v1650_v32 = vshrl.u32 %v6247_v27, %v1635_v5  ;;  %vm1654_vm5 = vcmp.lt.s32.totalorder %v1633_v0, 3  ;;  %vm1655_vm3 = vcmp.lt.s32.totalorder %v1633_v0, 4 }
 0x3a8   : > { %v1639_v51 = vor.u32 %v1638_v62, %v1637_v16  ;;  %v1642_v14 = vor.u32 %v1641_v12, %v1640_v56  ;;  %v1645_v33 = vor.u32 %v1644_v4, %v1643_v36  ;;  %v1738_v23 = vand.u32 31, %v1736_v46 }
 0x3a9   : > { %v1648_v48 = vor.u32 %v1647_v13, %v1646_v35  ;;  %v1651_v24 = vor.u32 %v1650_v32, %v1649_v10  ;;  %v1737_v41 = vshrl.u32 %v1736_v46, 5 }
 0x3aa   : > { %v1656_v6 = vsel %vm1652_vm4, %v1636_v29, %v1639_v51  ;;  %v1657_v22 = vsel %vm1655_vm3, %v1645_v33, 2102212464  ;;  %v1660_v44 = vsel %vm1652_vm4, %v1639_v51, %v1642_v14  ;;  %v1664_v34 = vsel %vm1652_vm4, %v1642_v14, %v1645_v33 }
 0x3ab   : > { %v1658_v37 = vsel %vm1654_vm5, %v1642_v14, %v1657_v22  ;;  %v1661_v38 = vsel %vm1655_vm3, %v1648_v48, 920167782  ;;  %v1665_v57 = vsel %vm1655_vm3, %v1651_v24, 1326507024  ;;  %v1739_v47 = vsub.s32 32, %v1738_v23 }
 0x3ac   : > { %v1659_v11 = vsel %vm1653_vm14, %v1656_v6, %v1658_v37  ;;  %v1662_v42 = vsel %vm1654_vm5, %v1645_v33, %v1661_v38  ;;  %v1666_v59 = vsel %vm1654_vm5, %v1648_v48, %v1665_v57  ;;  %v1741_v63 = vshll.u32 %v6314_v55, %v1738_v23 }
 0x3ad   : > { %v1663_v60 = vsel %vm1653_vm14, %v1660_v44, %v1662_v42  ;;  %v1667_v1 = vsel %vm1653_vm14, %v1664_v34, %v1666_v59  ;;  %v1675_v18 = vmul.u32 %v5046_v49, %v1659_v11  ;;  %v1740_v56 = vshrl.u32 %v6314_v55, %v1739_v47 }
 0x3ae   : > { %v5082_v19 = vmul.u32.u64.low %v5046_v49, %v1667_v1  ;;  %v5083_v8 = vmul.u32.u64.high %v5046_v49, %v1667_v1, %v5082_v19  ;;  %v5086_v5 = vmul.u32.u64.low %v5046_v49, %v1663_v60  ;;  %v5087_v16 = vmul.u32.u64.high %v5046_v49, %v1663_v60, %v5086_v5 }
 0x3af   : > { %v1742_v36 = vshrl.u32 %v6315_v30, %v1739_v47  ;;  %v1744_v35 = vshll.u32 %v6315_v30, %v1738_v23  ;;  %v1745_v0 = vshrl.u32 %v6316_v15, %v1739_v47  ;;  %v1747_v10 = vshll.u32 %v6316_v15, %v1738_v23 }
 0x3b0   : > { %v1748_v62 = vshrl.u32 %v6279_v2, %v1739_v47  ;;  %v1750_v12 = vshll.u32 %v6279_v2, %v1738_v23  ;;  %v1751_v4 = vshrl.u32 %v3966_v20, %v1739_v47  ;;  %v1753_v49 = vshll.u32 %v3966_v20, %v1738_v23 }
 0x3b1   : > { %v1743_v29 = vor.u32 %v1742_v36, %v1741_v63  ;;  %v1746_v13 = vor.u32 %v1745_v0, %v1744_v35  ;;  %v1754_v32 = vshrl.u32 %v6247_v27, %v1739_v47  ;;  %vm1677_vm13 = vc.u32 %v5083_v8, %v5086_v5 }
 0x3b2   : > { %v1678_v51 = vadd.s32 1, %v5087_v16  ;;  %v1749_v14 = vor.u32 %v1748_v62, %v1747_v10  ;;  %vm1756_vm2 = vcmp.lt.s32.totalorder %v1737_v41, 1  ;;  %v1752_v33 = vor.u32 %v1751_v4, %v1750_v12 }
 0x3b3   : > { %v1755_v46 = vor.u32 %v1754_v32, %v1753_v49  ;;  %vm1757_vm10 = vcmp.lt.s32.totalorder %v1737_v41, 2  ;;  %vm1758_vm12 = vcmp.lt.s32.totalorder %v1737_v41, 3  ;;  %vm1759_vm15 = vcmp.lt.s32.totalorder %v1737_v41, 4 }
 0x3b4   : > { %v1679_v48 = vsel %vm1677_vm13, %v1678_v51, %v5087_v16  ;;  %v1760_v24 = vsel %vm1756_vm2, %v1740_v56, %v1743_v29  ;;  %v1764_v6 = vsel %vm1756_vm2, %v1743_v29, %v1746_v13  ;;  %v1761_v44 = vsel %vm1759_vm15, %v1749_v14, 2102212464  ;;  %v1609_v16 = vpop.f32.mrf.mxu1 }
 0x3b5   : > { %v1680_v22 = vadd.s32 %v1679_v48, %v1675_v18  ;;  %v1765_v23 = vsel %vm1759_vm15, %v1752_v33, 920167782  ;;  %v1768_v34 = vsel %vm1756_vm2, %v1746_v13, %v1749_v14  ;;  %v1762_v37 = vsel %vm1758_vm12, %v1746_v13, %v1761_v44 }
 0x3b6   : > { %v1766_v38 = vsel %vm1758_vm12, %v1749_v14, %v1765_v23  ;;  %v1769_v57 = vsel %vm1759_vm15, %v1755_v46, 1326507024  ;;  %v1838_v47 = vadd.s32 1, %v5051_v43  ;;  %v1836_v60 = vor.u32 8388608, %v5055_v58 }
 0x3b7   : > { %v1681_v11 = vadd.s32 536870912, %v1680_v22  ;;  %v1767_v42 = vsel %vm1757_vm10, %v1764_v6, %v1766_v38  ;;  %v1770_v59 = vsel %vm1758_vm12, %v1752_v33, %v1769_v57  ;;  %v1763_v1 = vsel %vm1757_vm10, %v1760_v24, %v1762_v37 }
 0x3b8   : > { %v1771_v63 = vsel %vm1757_vm10, %v1768_v34, %v1770_v59  ;;  %v5108_v18 = vmul.u32.u64.low %v5049_v28, %v1767_v42  ;;  %v5109_v19 = vmul.u32.u64.high %v5049_v28, %v1767_v42, %v5108_v18  ;;  %vm1839_vm8 = vcmp.gt.s32.totalorder %v1838_v47, 0 }
 0x3b9   : > { %v5112_v56 = vshrl.u32 %v1681_v11, 30  ;;  %v5115_v43 = vmul.u32.u64.low %v5049_v28, %v1771_v63  ;;  %v5116_v36 = vmul.u32.u64.high %v5049_v28, %v1771_v63, %v5115_v43  ;;  %v1840_v35 = vsel %vm1839_vm8, %v1838_v47, 0 }
 0x3ba   : > { %v1936_v58 = vshrl.u32 %v1935_v39, 23  ;;  %v1842_v0 = vand.u32 31, %v1840_v35  ;;  %v5123_v10 = vand.u32 8388607, %v1932_v17  ;;  %v5126_v62 = vadd.f32 %v1609_v16, %v5024_v52 }
 0x3bb   : > { %v1683_v41 = vshll.u32 %v5112_v56, 30  ;;  %v1676_v12 = vadd.s32 %v5086_v5, %v5083_v8  ;;  %v1779_v4 = vmul.u32 %v5049_v28, %v1763_v1  ;;  %v1782_v29 = vadd.s32 1, %v5109_v19 }
 0x3bc   : > { %v5131_v13 = vshll.u32 %v1836_v60, 8  ;;  %vm1781_vm6 = vc.u32 %v5116_v36, %v5108_v18  ;;  %v1841_v39 = vshrl.u32 %v1840_v35, 5  ;;  %v1843_v32 = vsub.s32 32, %v1842_v0 }
 0x3bd   : > { %v5133_v49 = vsub.s32 %v1680_v22, %v1683_v41  ;;  %v1783_v51 = vsel %vm1781_vm6, %v1782_v29, %v5109_v19  ;;  %v1845_v14 = vshll.u32 %v6314_v55, %v1842_v0  ;;  %v1848_v33 = vshll.u32 %v6315_v30, %v1842_v0 }
 0x3be   : > { %v3372_v8 = vadd.s32 4294967169, %v1936_v58  ;;  %v1784_v5 = vadd.s32 %v1783_v51, %v1779_v4  ;;  %v1846_v46 = vshrl.u32 %v6315_v30, %v1843_v32  ;;  %v1851_v48 = vshll.u32 %v6316_v15, %v1842_v0 }
 0x3bf   : > { %v1686_v28 = vsub.s32 0, %v5133_v49  ;;  %v1849_v24 = vshrl.u32 %v6316_v15, %v1843_v32  ;;  %v1852_v6 = vshrl.u32 %v6279_v2, %v1843_v32  ;;  %v1854_v22 = vshll.u32 %v6279_v2, %v1842_v0 }
 0x3c0   : > { %v1855_v44 = vshrl.u32 %v3966_v20, %v1843_v32  ;;  %v1785_v34 = vadd.s32 536870912, %v1784_v5  ;;  %v1847_v37 = vor.u32 %v1846_v46, %v1845_v14  ;;  %v1857_v38 = vshll.u32 %v3966_v20, %v1842_v0 }
 0x3c1   : > { %v3361_v23 = vmin.u32 %v1686_v28, %v5133_v49  ;;  %v1850_v57 = vor.u32 %v1849_v24, %v1848_v33  ;;  %v1853_v47 = vor.u32 %v1852_v6, %v1851_v48  ;;  %v1858_v42 = vshrl.u32 %v6247_v27, %v1843_v32 }
 0x3c2   : > { %v1856_v11 = vor.u32 %v1855_v44, %v1854_v22  ;;  %v5150_v60 = vshrl.u32 %v1785_v34, 30  ;;  %v1844_v1 = vshrl.u32 %v6314_v55, %v1843_v32  ;;  %vm1860_vm11 = vcmp.lt.s32.totalorder %v1841_v39, 1 }
 0x3c3   : > { %v1688_v59 = vclz %v3361_v23  ;;  %v1859_v63 = vor.u32 %v1858_v42, %v1857_v38  ;;  %vm1861_vm1 = vcmp.lt.s32.totalorder %v1841_v39, 2  ;;  %vm1862_vm4 = vcmp.lt.s32.totalorder %v1841_v39, 3 }
 0x3c4   : > { %vm1863_vm14 = vcmp.lt.s32.totalorder %v1841_v39, 4  ;;  %v1787_v16 = vshll.u32 %v5150_v60, 30  ;;  %v1868_v35 = vsel %vm1860_vm11, %v1847_v37, %v1850_v57  ;;  %v1864_v58 = vsel %vm1860_vm11, %v1844_v1, %v1847_v37 }
 0x3c5   : > { %v3362_v19 = vadd.s32 4294967294, %v1688_v59  ;;  %v1865_v43 = vsel %vm1863_vm14, %v1853_v47, 2102212464  ;;  %v1869_v0 = vsel %vm1863_vm14, %v1856_v11, 920167782  ;;  %v1872_v51 = vsel %vm1860_vm11, %v1850_v57, %v1853_v47 }
 0x3c6   : > { %v1866_v41 = vsel %vm1862_vm4, %v1850_v57, %v1865_v43  ;;  %v1873_v4 = vsel %vm1863_vm14, %v1859_v63, 1326507024  ;;  %v5157_v29 = vsub.s32 %v1784_v5, %v1787_v16  ;;  %v1870_v32 = vsel %vm1862_vm4, %v1853_v47, %v1869_v0 }
 0x3c7   : > { %vm3363_vm5 = vcmp.lt.s32.totalorder %v3362_v19, 0  ;;  %v1871_v33 = vsel %vm1861_vm1, %v1868_v35, %v1870_v32  ;;  %v1874_v28 = vsel %vm1862_vm4, %v1856_v11, %v1873_v4  ;;  %v1940_v46 = vor.u32 8388608, %v5123_v10 }
 0x3c8   : > { %v1691_v14 = vsel %vm3363_vm5, 0, %v3362_v19  ;;  %v1790_v6 = vsub.s32 0, %v5157_v29  ;;  %v1867_v22 = vsel %vm1861_vm1, %v1864_v58, %v1866_v41  ;;  %v1875_v5 = vsel %vm1861_vm1, %v1872_v51, %v1874_v28 }
 0x3c9   : > { %v1692_v48 = vsub.s32 32, %v1691_v14  ;;  %v1696_v24 = vsub.s32 4294967266, %v1691_v14  ;;  %v5168_v44 = vmul.u32.u64.low %v5131_v13, %v1871_v33  ;;  %v5169_v23 = vmul.u32.u64.high %v5131_v13, %v1871_v33, %v5168_v44 }
 0x3ca   : > { %v1942_v34 = vadd.s32 1, %v3372_v8  ;;  %v1693_v37 = vshll.u32 %v5133_v49, %v1691_v14  ;;  %v3365_v10 = vmin.u32 %v1790_v6, %v5157_v29  ;;  %v2039_v39 = vand.u32 2139095040, %v5126_v62 }
 0x3cb   : > { %v1694_v38 = vshrl.u32 %v1676_v12, %v1692_v48  ;;  %v1697_v57 = vadd.s32 127, %v1696_v24  ;;  %v5175_v47 = vmul.u32.u64.low %v5131_v13, %v1875_v5  ;;  %v5176_v11 = vmul.u32.u64.high %v5131_v13, %v1875_v5, %v5175_v47 }
 0x3cc   : > { %vm1943_vm3 = vcmp.gt.s32.totalorder %v1942_v34, 0  ;;  %v1792_v1 = vclz %v3365_v10  ;;  %vm1622_vm13 = vcmp.lt.s32.totalorder %v5028_v31, 0  ;;  %v1886_v8 = vadd.s32 1, %v5169_v23 }
 0x3cd   : > { %v1695_v42 = vor.u32 %v1694_v38, %v1693_v37  ;;  %v1698_v59 = vshll.u32 %v1697_v57, 23  ;;  %v1944_v63 = vsel %vm1943_vm3, %v1942_v34, 0  ;;  %v5181_v12 = vshll.u32 %v1940_v46, 8 }
 0x3ce   : > { %v1946_v49 = vand.u32 31, %v1944_v63  ;;  %v6245_v19 = vand.u32 2147483647, %v5126_v62  ;;  %v1780_v43 = vadd.s32 %v5108_v18, %v5116_v36  ;;  %v3366_v35 = vadd.s32 4294967294, %v1792_v1 }
 0x3cf   : > { %v1699_v16 = vor.u32 4788187, %v1698_v59  ;;  %v1883_v58 = vmul.u32 %v5131_v13, %v1867_v22  ;;  %vm1885_vm2 = vc.u32 %v5176_v11, %v5168_v44  ;;  %v5189_v41 = vshrl.u32 %v1944_v63, 5 }
 0x3d0   : > { %v1947_v0 = vsub.s32 32, %v1946_v49  ;;  %v5191_v4 = vshrl.u32 %v2039_v39, 23  ;;  %vm5195_vm10 = vcmp.le.f32.partialorder %v1620_v40, 0.7853982  ;;  %v1702_v14 = vcvt.s32.f32 %v1695_v42 }
 0x3d1   : > { %v1700_v51 = vand.u32 2147483647, %v1699_v16  ;;  %vm3367_vm12 = vcmp.lt.s32.totalorder %v3366_v35, 0  ;;  %v1887_v18 = vsel %vm1885_vm2, %v1886_v8, %v5169_v23  ;;  %v1949_v33 = vshll.u32 %v6314_v55, %v1946_v49 }
 0x3d2   : > { %v1795_v36 = vsel %vm3367_vm12, 0, %v3366_v35  ;;  %v1888_v13 = vadd.s32 %v1887_v18, %v1883_v58  ;;  %v5203_v28 = vand.u32 8388607, %v6245_v19  ;;  %v1952_v40 = vshll.u32 %v6315_v30, %v1946_v49 }
 0x3d3   : > { %v1703_v46 = vmul.f32 %v1702_v14, %v1700_v51  ;;  %v1796_v48 = vsub.s32 32, %v1795_v36  ;;  %v1800_v24 = vsub.s32 4294967266, %v1795_v36  ;;  %v1797_v6 = vshll.u32 %v5157_v29, %v1795_v36 }
 0x3d4   : > { %v1889_v22 = vadd.s32 536870912, %v1888_v13  ;;  %v1950_v5 = vshrl.u32 %v6315_v30, %v1947_v0  ;;  %v1953_v23 = vshrl.u32 %v6316_v15, %v1947_v0  ;;  %v1956_v57 = vshrl.u32 %v6279_v2, %v1947_v0 }
 0x3d5   : > { %v1704_v34 = vxor.u32 2147483648, %v1703_v46  ;;  %v1798_v37 = vshrl.u32 %v1780_v43, %v1796_v48  ;;  %v1801_v38 = vadd.s32 127, %v1800_v24  ;;  %v1948_v47 = vshrl.u32 %v6314_v55, %v1947_v0 }
 0x3d6   : > { %v5210_v10 = vshrl.u32 %v1889_v22, 30  ;;  %v1955_v39 = vshll.u32 %v6316_v15, %v1946_v49  ;;  %v1959_v42 = vshrl.u32 %v3966_v20, %v1947_v0  ;;  %v1958_v63 = vshll.u32 %v6279_v2, %v1946_v49 }
 0x3d7   : > { %v1705_v29 = vsel %vm1622_vm13, %v1704_v34, %v1703_v46  ;;  %v1799_v59 = vor.u32 %v1798_v37, %v1797_v6  ;;  %v1802_v1 = vshll.u32 %v1801_v38, 23  ;;  %vm1726_vm15 = vcmp.lt.s32.totalorder %v5032_v45, 0 }
 0x3d8   : > { %v1891_v8 = vshll.u32 %v5210_v10, 30  ;;  %v1951_v16 = vor.u32 %v1950_v5, %v1949_v33  ;;  %v1954_v43 = vor.u32 %v1953_v23, %v1952_v40  ;;  %v1957_v35 = vor.u32 %v1956_v57, %v1955_v39 }
 0x3d9   : > { %v1803_v58 = vor.u32 4788187, %v1802_v1  ;;  %v1960_v51 = vor.u32 %v1959_v42, %v1958_v63  ;;  %v1961_v14 = vshll.u32 %v3966_v20, %v1946_v49  ;;  %v1962_v18 = vshrl.u32 %v6247_v27, %v1947_v0 }
 0x3da   : > { %v1708_v36 = vsel %vm5195_vm10, %v5028_v31, %v1705_v29  ;;  %v1806_v46 = vcvt.s32.f32 %v1799_v59  ;;  %v1892_v48 = vsub.s32 %v1888_v13, %v1891_v8  ;;  %vm1964_vm8 = vcmp.lt.s32.totalorder %v5189_v41, 1 }
 0x3db   : > { %v1804_v24 = vand.u32 2147483647, %v1803_v58  ;;  %v1963_v6 = vor.u32 %v1962_v18, %v1961_v14  ;;  %vm1966_vm6 = vcmp.lt.s32.totalorder %v5189_v41, 3  ;;  %vm1967_vm11 = vcmp.lt.s32.totalorder %v5189_v41, 4 }
 0x3dc   : > { %v1894_v33 = vsub.s32 0, %v1892_v48  ;;  %v1968_v40 = vsel %vm1964_vm8, %v1948_v47, %v1951_v16  ;;  %v1969_v22 = vsel %vm1967_vm11, %v1957_v35, 2102212464  ;;  %v1972_v49 = vsel %vm1964_vm8, %v1951_v16, %v1954_v43 }
 0x3dd   : > { %v1807_v5 = vmul.f32 %v1806_v46, %v1804_v24  ;;  %v1970_v0 = vsel %vm1966_vm6, %v1954_v43, %v1969_v22  ;;  %v1973_v23 = vsel %vm1967_vm11, %v1960_v51, 920167782  ;;  %v1976_v34 = vsel %vm1964_vm8, %v1954_v43, %v1957_v35 }
 0x3de   : > { %v3369_v37 = vmin.u32 %v1894_v33, %v1892_v48  ;;  %vm1965_vm1 = vcmp.lt.s32.totalorder %v5189_v41, 2  ;;  %v1974_v13 = vsel %vm1966_vm6, %v1957_v35, %v1973_v23  ;;  %v1977_v38 = vsel %vm1967_vm11, %v1963_v6, 1326507024 }
 0x3df   : > { %v1808_v57 = vxor.u32 2147483648, %v1807_v5  ;;  %v1971_v39 = vsel %vm1965_vm1, %v1968_v40, %v1970_v0  ;;  %v1975_v42 = vsel %vm1965_vm1, %v1972_v49, %v1974_v13  ;;  %v1978_v47 = vsel %vm1966_vm6, %v1960_v51, %v1977_v38  ;;  %v1611_v51 = vpop.f32.mrf.mxu1 }
 0x3e0   : > { %v1896_v29 = vclz %v3369_v37  ;;  %v1979_v59 = vsel %vm1965_vm1, %v1976_v34, %v1978_v47  ;;  %v5236_v1 = vmul.u32.u64.low %v5181_v12, %v1975_v42  ;;  %v5237_v63 = vmul.u32.u64.high %v5181_v12, %v1975_v42, %v5236_v1 }
 0x3e1   : > { %v1809_v8 = vsel %vm1726_vm15, %v1808_v57, %v1807_v5  ;;  %v5243_v16 = vmul.u32.u64.low %v5181_v12, %v1979_v59  ;;  %v5244_v43 = vmul.u32.u64.high %v5181_v12, %v1979_v59, %v5243_v16  ;;  %v3376_v35 = vadd.s32 4294967169, %v5191_v4 }
 0x3e2   : > { %vm5249_vm4 = vcmp.le.f32.partialorder %v1724_v3, 0.7853982  ;;  %v3370_v58 = vadd.s32 4294967294, %v1896_v29  ;;  %3815 = vcosq.f32 %v1708_v36  ;;  %v1884_v14 = vadd.s32 %v5168_v44, %v5176_v11 }
 0x3e3   : > { %v1987_v18 = vmul.u32 %v5181_v12, %v1971_v39  ;;  %v2046_v46 = vadd.s32 1, %v3376_v35  ;;  %v5259_v24 = vsel %vm5249_vm4, %v5032_v45, %v1809_v8  ;;  %v1990_v3 = vadd.s32 1, %v5237_v63 }
 0x3e4   : > { %vm3371_vm14 = vcmp.lt.s32.totalorder %v3370_v58, 0  ;;  %v2044_v4 = vor.u32 8388608, %v5203_v28  ;;  %vm1989_vm5 = vc.u32 %v5244_v43, %v5236_v1  ;;  %v5266_v44 = vadd.f32 %v1611_v51, %v5024_v52 }
 0x3e5   : > { %v1899_v6 = vsel %vm3371_vm14, 0, %v3370_v58  ;;  %vm2047_vm3 = vcmp.gt.s32.totalorder %v2046_v46, 0  ;;  %3817 = vsinq.f32 %v1708_v36  ;;  %v1991_v33 = vsel %vm1989_vm5, %v1990_v3, %v5237_v63 }
 0x3e6   : > { %v1900_v11 = vsub.s32 32, %v1899_v6  ;;  %v1904_v12 = vsub.s32 4294967266, %v1899_v6  ;;  %3819 = vcosq.f32 %v5259_v24  ;;  %v1992_v40 = vadd.s32 %v1991_v33, %v1987_v18 }
 0x3e7   : > { %v2048_v22 = vsel %vm2047_vm3, %v2046_v46, 0  ;;  %v1901_v49 = vshll.u32 %v1892_v48, %v1899_v6  ;;  %v5270_v37 = vshll.u32 %v2044_v4, 8  ;;  %v6244_v52 = vand.u32 2147483647, %v5266_v44 }
 0x3e8   : > { %v1902_v5 = vshrl.u32 %v1884_v14, %v1900_v11  ;;  %v1905_v28 = vadd.s32 127, %v1904_v12  ;;  %v2050_v0 = vand.u32 31, %v2048_v22  ;;  %v1993_v23 = vadd.s32 536870912, %v1992_v40 }
 0x3e9   : > { %v2049_v34 = vshrl.u32 %v2048_v22, 5  ;;  %vm1830_vm2 = vcmp.lt.s32.totalorder %v5038_v26, 0  ;;  %vm5288_vm12 = vcmp.le.f32.partialorder %v1828_v61, 0.7853982  ;;  %3821 = vsinq.f32 %v5259_v24 }
 0x3ea   : > { %v1903_v13 = vor.u32 %v1902_v5, %v1901_v49  ;;  %v1906_v36 = vshll.u32 %v1905_v28, 23  ;;  %v2051_v38 = vsub.s32 32, %v2050_v0  ;;  %v2053_v57 = vshll.u32 %v6314_v55, %v2050_v0 }
 0x3eb   : > { %v5275_v39 = vshrl.u32 %v1993_v23, 30  ;;  %v2056_v48 = vshll.u32 %v6315_v30, %v2050_v0  ;;  %v2059_v42 = vshll.u32 %v6316_v15, %v2050_v0  ;;  %v2062_v47 = vshll.u32 %v6279_v2, %v2050_v0  ;;  %v1615_v23 = vpop.f32.mrf.mxu1 }
 0x3ec   : > { %v1907_v29 = vor.u32 4788187, %v1906_v36  ;;  %v1910_v59 = vcvt.s32.f32 %v1903_v13  ;;  %v2052_v63 = vshrl.u32 %v6314_v55, %v2051_v38  ;;  %v2054_v8 = vshrl.u32 %v6315_v30, %v2051_v38 }
 0x3ed   : > { %v1995_v16 = vshll.u32 %v5275_v39, 30  ;;  %v2057_v35 = vshrl.u32 %v6316_v15, %v2051_v38  ;;  %v2060_v58 = vshrl.u32 %v6279_v2, %v2051_v38  ;;  %v2063_v51 = vshrl.u32 %v3966_v20, %v2051_v38 }
 0x3ee   : > { %v1908_v18 = vand.u32 2147483647, %v1907_v29  ;;  %v2055_v46 = vor.u32 %v2054_v8, %v2053_v57  ;;  %v2065_v3 = vshll.u32 %v3966_v20, %v2050_v0  ;;  %v2066_v4 = vshrl.u32 %v6247_v27, %v2051_v38 }
 0x3ef   : > { %v5294_v6 = vsub.s32 %v1992_v40, %v1995_v16  ;;  %v2058_v11 = vor.u32 %v2057_v35, %v2056_v48  ;;  %v2061_v12 = vor.u32 %v2060_v58, %v2059_v42  ;;  %v2064_v33 = vor.u32 %v2063_v51, %v2062_v47  ;;  %v5296_v22 = vpop.eup %3815 }
 0x3f0   : > { %v1911_v49 = vmul.f32 %v1910_v59, %v1908_v18  ;;  %v2067_v5 = vor.u32 %v2066_v4, %v2065_v3  ;;  %vm2068_vm8 = vcmp.lt.s32.totalorder %v2049_v34, 1  ;;  %vm2069_vm6 = vcmp.lt.s32.totalorder %v2049_v34, 2 }
 0x3f1   : > { %v1998_v61 = vsub.s32 0, %v5294_v6  ;;  %vm2070_vm11 = vcmp.lt.s32.totalorder %v2049_v34, 3  ;;  %vm2071_vm1 = vcmp.lt.s32.totalorder %v2049_v34, 4  ;;  %v2072_v28 = vsel %vm2068_vm8, %v2052_v63, %v2055_v46 }
 0x3f2   : > { %v1912_v0 = vxor.u32 2147483648, %v1911_v49  ;;  %v2073_v13 = vsel %vm2071_vm1, %v2061_v12, 2102212464  ;;  %v2076_v36 = vsel %vm2068_vm8, %v2055_v46, %v2058_v11  ;;  %v2077_v40 = vsel %vm2071_vm1, %v2064_v33, 920167782  ;;  %v5299_v38 = vpop.eup %3817  ;;  %v1617_v46 = vpop.f32.mrf.mxu1 }
 0x3f3   : > { %v3373_v57 = vmin.u32 %v1998_v61, %v5294_v6  ;;  %v2074_v48 = vsel %vm2070_vm11, %v2058_v11, %v2073_v13  ;;  %v2078_v42 = vsel %vm2070_vm11, %v2061_v12, %v2077_v40  ;;  %v2080_v47 = vsel %vm2068_vm8, %v2058_v11, %v2061_v12  ;;  %v5304_v29 = vpop.eup %3819 }
 0x3f4   : > { %v1913_v59 = vsel %vm1830_vm2, %v1912_v0, %v1911_v49  ;;  %v2079_v63 = vsel %vm2069_vm6, %v2076_v36, %v2078_v42  ;;  %v2081_v8 = vsel %vm2071_vm1, %v2067_v5, 1326507024  ;;  %v2143_v16 = vand.u32 2139095040, %v5266_v44 }
 0x3f5   : > { %v2000_v35 = vclz %v3373_v57  ;;  %v2082_v58 = vsel %vm2070_vm11, %v2064_v33, %v2081_v8  ;;  %v2147_v51 = vand.u32 8388607, %v6244_v52  ;;  %v5314_v18 = vadd.f32 %v1615_v23, %v5026_v54 }
 0x3f6   : > { %v2075_v3 = vsel %vm2069_vm6, %v2072_v28, %v2074_v48  ;;  %v2083_v4 = vsel %vm2069_vm6, %v2080_v47, %v2082_v58  ;;  %v5319_v11 = vmul.u32.u64.low %v5270_v37, %v2079_v63  ;;  %v5320_v12 = vmul.u32.u64.high %v5270_v37, %v2079_v63, %v5319_v11 }
 0x3f7   : > { %v1916_v49 = vsel %vm5288_vm12, %v5038_v26, %v1913_v59  ;;  %v3374_v33 = vadd.s32 4294967294, %v2000_v35  ;;  %v5326_v5 = vmul.u32.u64.low %v5270_v37, %v2083_v4  ;;  %v5327_v61 = vmul.u32.u64.high %v5270_v37, %v2083_v4, %v5326_v5 }
 0x3f8   : > { %v1988_v28 = vadd.s32 %v5236_v1, %v5244_v43  ;;  %v2144_v34 = vshrl.u32 %v2143_v16, 23  ;;  %v5333_v23 = vadd.f32 %v1617_v46, %v5026_v54  ;;  %v2091_v0 = vmul.u32 %v5270_v37, %v2075_v3 }
 0x3f9   : > { %vm3375_vm14 = vcmp.lt.s32.totalorder %v3374_v33, 0  ;;  %v6243_v13 = vand.u32 2147483647, %v5314_v18  ;;  %v2247_v36 = vand.u32 2139095040, %v5314_v18  ;;  %3823 = vcosq.f32 %v1916_v49 }
 0x3fa   : > { %6323 = vst [vmem:[#allocation7_spill] sm:$0xff] %v5333_v23  ;;  %v2003_v40 = vsel %vm3375_vm14, 0, %v3374_v33  ;;  %v2094_v57 = vadd.s32 1, %v5320_v12  ;;  %v3380_v48 = vadd.s32 4294967169, %v2144_v34  ;;  %3825 = vsinq.f32 %v1916_v49 }
 0x3fb   : > { %v2004_v24 = vsub.s32 32, %v2003_v40  ;;  %v2008_v42 = vsub.s32 4294967266, %v2003_v40  ;;  %v2148_v1 = vor.u32 8388608, %v2147_v51  ;;  %v2005_v43 = vshll.u32 %v5294_v6, %v2003_v40 }
 0x3fc   : > { %vm2093_vm5 = vc.u32 %v5327_v61, %v5319_v11  ;;  %v2150_v54 = vadd.s32 1, %v3380_v48  ;;  %v2248_v47 = vshrl.u32 %v2247_v36, 23  ;;  %v2251_v8 = vand.u32 8388607, %v6243_v13 }
 0x3fd   : > { %v2006_v37 = vshrl.u32 %v1988_v28, %v2004_v24  ;;  %v2009_v59 = vadd.s32 127, %v2008_v42  ;;  %v2095_v63 = vsel %vm2093_vm5, %v2094_v57, %v5320_v12  ;;  %v6246_v58 = vand.u32 2147483647, %v5333_v23 }
 0x3fe   : > { %v2096_v16 = vadd.s32 %v2095_v63, %v2091_v0  ;;  %vm2151_vm3 = vcmp.gt.s32.totalorder %v2150_v54, 0  ;;  %v3384_v35 = vadd.s32 4294967169, %v2248_v47  ;;  %v5345_v6 = vshll.u32 %v2148_v1, 8 }
 0x3ff   : > { %v2007_v46 = vor.u32 %v2006_v37, %v2005_v43  ;;  %v2010_v51 = vshll.u32 %v2009_v59, 23  ;;  %v2152_v3 = vsel %vm2151_vm3, %v2150_v54, 0  ;;  %vm6261_vm8 = vcmp.lt.s32.totalorder %v5043_v7, 0  ;;  %v5368_v37 = vpop.eup %3821 }
 0x400   : > { %v5349_v4 = vadd.s32 %v5319_v11, %v5327_v61  ;;  %v2097_v49 = vadd.s32 536870912, %v2096_v16  ;;  %v2154_v12 = vand.u32 31, %v2152_v3  ;;  %v2252_v33 = vor.u32 8388608, %v2251_v8 }
 0x401   : > { %vm5353_vm6 = vcmp.le.f32.partialorder %v1932_v17, 0.7853982  ;;  %v2011_v28 = vor.u32 4788187, %v2010_v51  ;;  %v2014_v34 = vcvt.s32.f32 %v2007_v46  ;;  %v2153_v0 = vshrl.u32 %v2152_v3, 5 }
 0x402   : > { %v2254_v36 = vadd.s32 1, %v3384_v35  ;;  %v5357_v40 = vshrl.u32 %v2097_v49, 30  ;;  %v2155_v57 = vsub.s32 32, %v2154_v12  ;;  %v2157_v48 = vshll.u32 %v6314_v55, %v2154_v12 }
 0x403   : > { %v2351_v11 = vand.u32 2139095040, %v5333_v23  ;;  %v2012_v61 = vand.u32 2147483647, %v2011_v28  ;;  %v2160_v24 = vshll.u32 %v6315_v30, %v2154_v12  ;;  %v2163_v42 = vshll.u32 %v6316_v15, %v2154_v12 }
 0x404   : > { %v2166_v17 = vshll.u32 %v6279_v2, %v2154_v12  ;;  %v2099_v1 = vshll.u32 %v5357_v40, 30  ;;  %v2158_v43 = vshrl.u32 %v6315_v30, %v2155_v57  ;;  %v2161_v54 = vshrl.u32 %v6316_v15, %v2155_v57 }
 0x405   : > { %v2169_v47 = vshll.u32 %v3966_v20, %v2154_v12  ;;  %v2015_v59 = vmul.f32 %v2014_v34, %v2012_v61  ;;  %v2164_v63 = vshrl.u32 %v6279_v2, %v2155_v57  ;;  %v2167_v8 = vshrl.u32 %v3966_v20, %v2155_v57 }
 0x406   : > { %v2170_v35 = vshrl.u32 %v6247_v27, %v2155_v57  ;;  %v5373_v46 = vsub.s32 %v2096_v16, %v2099_v1  ;;  %v2156_v51 = vshrl.u32 %v6314_v55, %v2155_v57  ;;  %v2159_v3 = vor.u32 %v2158_v43, %v2157_v48  ;;  %v5376_v28 = vpop.eup %3823 }
 0x407   : > { %v2162_v49 = vor.u32 %v2161_v54, %v2160_v24  ;;  %v2016_v13 = vxor.u32 2147483648, %v2015_v59  ;;  %v2165_v52 = vor.u32 %v2164_v63, %v2163_v42  ;;  %v2168_v12 = vor.u32 %v2167_v8, %v2166_v17  ;;  %v5378_v19 = vpop.eup %3825 }
 0x408   : > { %vm2172_vm11 = vcmp.lt.s32.totalorder %v2153_v0, 1  ;;  %v2102_v34 = vsub.s32 0, %v5373_v46  ;;  %v2171_v61 = vor.u32 %v2170_v35, %v2169_v47  ;;  %vm2174_vm1 = vcmp.lt.s32.totalorder %v2153_v0, 3 }
 0x409   : > { %vm2175_vm14 = vcmp.lt.s32.totalorder %v2153_v0, 4  ;;  %v2017_v16 = vsel %vm6261_vm8, %v2016_v13, %v2015_v59  ;;  %v2176_v57 = vsel %vm2172_vm11, %v2156_v51, %v2159_v3  ;;  %v2180_v24 = vsel %vm2172_vm11, %v2159_v3, %v2162_v49 }
 0x40a   : > { %v2177_v48 = vsel %vm2175_vm14, %v2165_v52, 2102212464  ;;  %v2020_v42 = vsel %vm5353_vm6, %v5043_v7, %v2017_v16  ;;  %v3377_v17 = vmin.u32 %v2102_v34, %v5373_v46  ;;  %v2181_v43 = vsel %vm2175_vm14, %v2168_v12, 920167782 }
 0x40b   : > { %v2178_v1 = vsel %vm2174_vm1, %v2162_v49, %v2177_v48  ;;  %vm2173_vm5 = vcmp.lt.s32.totalorder %v2153_v0, 2  ;;  %v2182_v54 = vsel %vm2174_vm1, %v2165_v52, %v2181_v43  ;;  %v2184_v13 = vsel %vm2172_vm11, %v2162_v49, %v2165_v52 }
 0x40c   : > { %v5394_v47 = vshll.u32 %v2252_v33, 8  ;;  %3827 = vcosq.f32 %v2020_v42  ;;  %v2104_v59 = vclz %v3377_v17  ;;  %v2183_v63 = vsel %vm2173_vm5, %v2180_v24, %v2182_v54 }
 0x40d   : > { %v2185_v8 = vsel %vm2175_vm14, %v2171_v61, 1326507024  ;;  %v2179_v35 = vsel %vm2173_vm5, %v2176_v57, %v2178_v1  ;;  %v5399_v3 = vmul.u32.u64.low %v5345_v6, %v2183_v63  ;;  %v5400_v34 = vmul.u32.u64.high %v5345_v6, %v2183_v63, %v5399_v3 }
 0x40e   : > { %v2186_v51 = vsel %vm2174_vm1, %v2168_v12, %v2185_v8  ;;  %v3378_v16 = vadd.s32 4294967294, %v2104_v59  ;;  %vm2255_vm3 = vcmp.gt.s32.totalorder %v2254_v36, 0  ;;  %v2352_v43 = vshrl.u32 %v2351_v11, 23 }
 0x40f   : > { %v2187_v48 = vsel %vm2173_vm5, %v2184_v13, %v2186_v51  ;;  %v2256_v49 = vsel %vm2255_vm3, %v2254_v36, 0  ;;  %v5409_v61 = vand.u32 8388607, %v6246_v58  ;;  %3829 = vsinq.f32 %v2020_v42 }
 0x410   : > { %v5404_v52 = vmul.u32.u64.low %v5345_v6, %v2187_v48  ;;  %v5405_v33 = vmul.u32.u64.high %v5345_v6, %v2187_v48, %v5404_v52  ;;  %vm3379_vm11 = vcmp.lt.s32.totalorder %v3378_v16, 0  ;;  %v2195_v0 = vmul.u32 %v5345_v6, %v2179_v35 }
 0x411   : > { %v2258_v12 = vand.u32 31, %v2256_v49  ;;  %v2107_v57 = vsel %vm3379_vm11, 0, %v3378_v16  ;;  %v2198_v24 = vadd.s32 1, %v5400_v34  ;;  %v5413_v17 = vshrl.u32 %v2256_v49, 5 }
 0x412   : > { %v5415_v11 = vadd.s32 4294967169, %v2352_v43  ;;  %v2108_v1 = vsub.s32 32, %v2107_v57  ;;  %v2112_v54 = vsub.s32 4294967266, %v2107_v57  ;;  %v2109_v59 = vshll.u32 %v5373_v46, %v2107_v57 }
 0x413   : > { %v2259_v13 = vsub.s32 32, %v2258_v12  ;;  %vm2197_vm1 = vc.u32 %v5405_v33, %v5399_v3  ;;  %v2261_v6 = vshll.u32 %v6314_v55, %v2258_v12  ;;  %v2264_v51 = vshll.u32 %v6315_v30, %v2258_v12 }
 0x414   : > { %v2110_v63 = vshrl.u32 %v5349_v4, %v2108_v1  ;;  %v2113_v8 = vadd.s32 127, %v2112_v54  ;;  %v2199_v35 = vsel %vm2197_vm1, %v2198_v24, %v5400_v34  ;;  %v2267_v57 = vshll.u32 %v6316_v15, %v2258_v12 }
 0x415   : > { %v2200_v16 = vadd.s32 %v2199_v35, %v2195_v0  ;;  %v2260_v48 = vshrl.u32 %v6314_v55, %v2259_v13  ;;  %v2262_v43 = vshrl.u32 %v6315_v30, %v2259_v13  ;;  %v2265_v46 = vshrl.u32 %v6316_v15, %v2259_v13 }
 0x416   : > { %v2111_v52 = vor.u32 %v2110_v63, %v2109_v59  ;;  %v2114_v49 = vshll.u32 %v2113_v8, 23  ;;  %v2268_v58 = vshrl.u32 %v6279_v2, %v2259_v13  ;;  %vm6259_vm14 = vcmp.lt.s32.totalorder %v5126_v62, 0 }
 0x417   : > { %v2201_v4 = vadd.s32 536870912, %v2200_v16  ;;  %v2263_v1 = vor.u32 %v2262_v43, %v2261_v6  ;;  %v2270_v34 = vshll.u32 %v6279_v2, %v2258_v12  ;;  %v2271_v0 = vshrl.u32 %v3966_v20, %v2259_v13 }
 0x418   : > { %v6326_v24 = vand.u32 2147483647, %v5126_v62  ;;  %v6327_v54 = vmov 0  ;;  %v2115_v59 = vor.u32 4788187, %v2114_v49  ;;  %v2118_v63 = vcvt.s32.f32 %v2111_v52 }
 0x419   : > { %v2266_v8 = vor.u32 %v2265_v46, %v2264_v51  ;;  %v2269_v35 = vor.u32 %v2268_v58, %v2267_v57  ;;  %v5440_v42 = vpop.eup %3827  ;;  %v5442_v36 = vshrl.u32 %v2201_v4, 30  ;;  %v2272_v27 = vor.u32 %v2271_v0, %v2270_v34 }
 0x41a   : > { %vm5436_vm5 = vcmp.le.f32.partialorder %v6326_v24, 0.7853982  ;;  %v2273_v6 = vshll.u32 %v3966_v20, %v2258_v12  ;;  %v6331_v43 = vmov 1326507024   ;;  %v2116_v23 = vand.u32 2147483647, %v2115_v59 }
 0x41b   : > { %v6328_v54 = vsel %vm5436_vm5, 4294967295, %v6327_v54  ;;  %6330 = vst [vmem:[#allocation9_spill] sm:$0xff] %v5442_v36  ;;  %v2274_v25 = vshrl.u32 %v6331_v43, %v2259_v13  ;;  %vm2276_vm3 = vcmp.lt.s32.totalorder %v5413_v17, 1  ;;  %vm2278_vm11 = vcmp.lt.s32.totalorder %v5413_v17, 3 }
 0x41c   : > { %6329 = vst [vmem:[#allocation8_spill] sm:$0xff] %v6328_v54  ;;  %vm2279_vm1 = vcmp.lt.s32.totalorder %v5413_v17, 4  ;;  %v2203_v52 = vshll.u32 %v5442_v36, 30  ;;  %v2280_v58 = vsel %vm2276_vm3, %v2260_v48, %v2263_v1  ;;  %v2119_v49 = vmul.f32 %v2118_v63, %v2116_v23  ;;  %v5456_v4 = vpop.eup %3829 }
 0x41d   : > { %v2275_v51 = vor.u32 %v2274_v25, %v2273_v6  ;;  %v2281_v46 = vsel %vm2279_vm1, %v2269_v35, 2102212464  ;;  %v2284_v57 = vsel %vm2276_vm3, %v2263_v1, %v2266_v8  ;;  %v2285_v13 = vsel %vm2279_vm1, %v2272_v27, 920167782 }
 0x41e   : > { %v2282_v12 = vsel %vm2278_vm11, %v2266_v8, %v2281_v46  ;;  %v5458_v34 = vsub.s32 %v2200_v16, %v2203_v52  ;;  %vm2277_vm9 = vcmp.lt.s32.totalorder %v5413_v17, 2  ;;  %v2286_v25 = vsel %vm2278_vm11, %v2269_v35, %v2285_v13 }
 0x41f   : > { %v2288_v48 = vsel %vm2276_vm3, %v2266_v8, %v2269_v35  ;;  %v2120_v0 = vxor.u32 2147483648, %v2119_v49  ;;  %v2283_v24 = vsel %vm2277_vm9, %v2280_v58, %v2282_v12  ;;  %v2287_v23 = vsel %vm2277_vm9, %v2284_v57, %v2286_v25 }
 0x420   : > { %v2289_v59 = vsel %vm2279_vm1, %v2275_v51, 1326507024  ;;  %v2206_v1 = vsub.s32 0, %v5458_v34  ;;  %v5469_v16 = vmul.u32.u64.low %v5394_v47, %v2287_v23  ;;  %v5470_v6 = vmul.u32.u64.high %v5394_v47, %v2287_v23, %v5469_v16 }
 0x421   : > { %v2290_v63 = vsel %vm2278_vm11, %v2272_v27, %v2289_v59  ;;  %v2121_v52 = vsel %vm6259_vm14, %v2120_v0, %v2119_v49  ;;  %v2196_v8 = vadd.s32 %v5399_v3, %v5405_v33  ;;  %v2358_v58 = vadd.s32 1, %v5415_v11 }
 0x422   : > { %v2291_v35 = vsel %vm2277_vm9, %v2288_v48, %v2290_v63  ;;  %v2124_v51 = vsel %vm5436_vm5, %v5126_v62, %v2121_v52  ;;  %v3381_v27 = vmin.u32 %v2206_v1, %v5458_v34  ;;  %v2299_v12 = vmul.u32 %v5394_v47, %v2283_v24 }
 0x423   : > { %v5483_v17 = vmul.u32.u64.low %v5394_v47, %v2291_v35  ;;  %v5484_v46 = vmul.u32.u64.high %v5394_v47, %v2291_v35, %v5483_v17  ;;  %vm2359_vm3 = vcmp.gt.s32.totalorder %v2358_v58, 0  ;;  %v6332_v49 = vor.u32 8388608, %v5409_v61 }
 0x424   : > { %v6333_v3 = vsub.s32 4, %v5112_v56  ;;  %3831 = vcosq.f32 %v2124_v51  ;;  %v2208_v11 = vclz %v3381_v27  ;;  %v2302_v13 = vadd.s32 1, %v5470_v6 }
 0x425   : > { %v5489_v57 = vshll.u32 %v6332_v49, 8  ;;  %v2360_v25 = vsel %vm2359_vm3, %v2358_v58, 0  ;;  %3833 = vsinq.f32 %v2124_v51  ;;  %vm2301_vm9 = vc.u32 %v5484_v46, %v5469_v16 }
 0x426   : > { %v1707_v33 = vsel %vm1622_vm13, %v6333_v3, %v5112_v56  ;;  %v2362_v48 = vand.u32 31, %v2360_v25  ;;  %v3382_v0 = vadd.s32 4294967294, %v2208_v11  ;;  %v5502_v24 = vshrl.u32 %v2360_v25, 5 }
 0x427   : > { %v1709_v47 = vsel %vm5195_vm10, 0, %v1707_v33  ;;  %v2303_v23 = vsel %vm2301_vm9, %v2302_v13, %v5470_v6  ;;  %vm6260_vm11 = vcmp.lt.s32.totalorder %v5266_v44, 0  ;;  %vm1712_vm14 = vweird.f32 %v5028_v31 }
 0x428   : > { %v2363_v59 = vsub.s32 32, %v2362_v48  ;;  %v2365_v1 = vshll.u32 %v6314_v55, %v2362_v48  ;;  %v1713_v63 = vadd.s32 3, %v1709_v47  ;;  %vm3383_vm13 = vcmp.lt.s32.totalorder %v3382_v0, 0 }
 0x429   : > { %v2304_v52 = vadd.s32 %v2303_v23, %v2299_v12  ;;  %v2368_v32 = vshll.u32 %v6315_v30, %v2362_v48  ;;  %v2371_v35 = vshll.u32 %v6316_v15, %v2362_v48  ;;  %v2211_v58 = vsel %vm3383_vm13, 0, %v3382_v0 }
 0x42a   : > { %v2366_v51 = vshrl.u32 %v6315_v30, %v2363_v59  ;;  %v2369_v27 = vshrl.u32 %v6316_v15, %v2363_v59  ;;  %v2374_v17 = vshll.u32 %v6279_v2, %v2362_v48  ;;  %v2212_v49 = vsub.s32 32, %v2211_v58 }
 0x42b   : > { %v2216_v3 = vsub.s32 4294967266, %v2211_v58  ;;  %v2305_v6 = vadd.s32 536870912, %v2304_v52  ;;  %v2364_v33 = vshrl.u32 %v6314_v55, %v2363_v59  ;;  %v2213_v11 = vshll.u32 %v5458_v34, %v2211_v58 }
 0x42c   : > { %v2367_v13 = vor.u32 %v2366_v51, %v2365_v1  ;;  %v2372_v12 = vshrl.u32 %v6279_v2, %v2363_v59  ;;  %v2375_v25 = vshrl.u32 %v3966_v20, %v2363_v59  ;;  %v2214_v47 = vshrl.u32 %v2196_v8, %v2212_v49 }
 0x42d   : > { %v2217_v0 = vadd.s32 127, %v2216_v3  ;;  %v5516_v23 = vshrl.u32 %v2305_v6, 30  ;;  %v2370_v56 = vor.u32 %v2369_v27, %v2368_v32  ;;  %v2377_v30 = vshll.u32 %v3966_v20, %v2362_v48 }
 0x42e   : > { %v2373_v61 = vor.u32 %v2372_v12, %v2371_v35  ;;  %v2376_v15 = vor.u32 %v2375_v25, %v2374_v17  ;;  %v2378_v36 = vshrl.u32 %v6331_v43, %v2363_v59  ;;  %v2215_v54 = vor.u32 %v2214_v47, %v2213_v11 }
 0x42f   : > { %v2218_v55 = vshll.u32 %v2217_v0, 23  ;;  %v2307_v34 = vshll.u32 %v5516_v23, 30  ;;  %vm2380_vm10 = vcmp.lt.s32.totalorder %v5502_v24, 1  ;;  %vm2381_vm1 = vcmp.lt.s32.totalorder %v5502_v24, 2 }
 0x430   : > { %v2379_v8 = vor.u32 %v2378_v36, %v2377_v30  ;;  %vm2382_vm3 = vcmp.lt.s32.totalorder %v5502_v24, 3  ;;  %vm2383_vm9 = vcmp.lt.s32.totalorder %v5502_v24, 4  ;;  %v6334_v48 = vand.u32 2147483647, %v5266_v44 }
 0x431   : > { %v2219_v1 = vor.u32 4788187, %v2218_v55  ;;  %v5532_v32 = vsub.s32 %v2304_v52, %v2307_v34  ;;  %v2384_v35 = vsel %vm2380_vm10, %v2364_v33, %v2367_v13  ;;  %v2385_v30 = vsel %vm2383_vm9, %v2373_v61, 2102212464  ;;  %v5538_v36 = vpop.eup %3831 }
 0x432   : > { %vm5528_vm13 = vcmp.le.f32.partialorder %v6334_v48, 0.7853982  ;;  %v2222_v58 = vcvt.s32.f32 %v2215_v54  ;;  %v2386_v51 = vsel %vm2382_vm3, %v2370_v56, %v2385_v30  ;;  %v2388_v27 = vsel %vm2380_vm10, %v2367_v13, %v2370_v56  ;;  %v5547_v52 = vpop.eup %3833 }
 0x433   : > { %v2389_v55 = vsel %vm2383_vm9, %v2376_v15, 920167782  ;;  %v2220_v17 = vand.u32 2147483647, %v2219_v1  ;;  %v2310_v49 = vsub.s32 0, %v5532_v32  ;;  %v2392_v54 = vsel %vm2380_vm10, %v2370_v56, %v2373_v61 }
 0x434   : > { %v2390_v3 = vsel %vm2382_vm3, %v2373_v61, %v2389_v55  ;;  %v2300_v6 = vadd.s32 %v5469_v16, %v5484_v46  ;;  %v2393_v11 = vsel %vm2383_vm9, %v2379_v8, 1326507024  ;;  %v1714_v13 = vand.u32 3, %v1713_v63 }
 0x435   : > { %v2391_v33 = vsel %vm2381_vm1, %v2388_v27, %v2390_v3  ;;  %v2223_v12 = vmul.f32 %v2222_v58, %v2220_v17  ;;  %v3385_v25 = vmin.u32 %v2310_v49, %v5532_v32  ;;  %v2394_v47 = vsel %vm2382_vm3, %v2376_v15, %v2393_v11 }
 0x436   : > { %v2459_v0 = vstv %s2455_s26  ;;  %v2387_v61 = vsel %vm2381_vm1, %v2384_v35, %v2386_v51  ;;  %v2395_v16 = vsel %vm2381_vm1, %v2392_v54, %v2394_v47  ;;  %vm1715_vm10 = vcmp.lt.s32.totalorder %v1714_v13, 2  ;;  %s3232_s26 = sshll.u32 %s350_s25, 4  ;;  %s3233_s26 = int_to_ptr.vmem [resolvable:$true] %s3232_s26 }
 0x437   : > { %v5569_v46 = vmul.u32.u64.low %v5489_v57, %v2391_v33  ;;  %v5570_v56 = vmul.u32.u64.high %v5489_v57, %v2391_v33, %v5569_v46  ;;  %v2224_v34 = vxor.u32 2147483648, %v2223_v12  ;;  %v2312_v63 = vclz %v3385_v25  ;;  %s3863_s0 = scalar_lea.vmem %s3233_s26, 16  ;;  %p3870_p7 = scmp.lt.s32.totalorder %s3233_s26, %s3868_s8 }
 0x438   : > { %v5574_v8 = vmul.u32.u64.low %v5489_v57, %v2395_v16  ;;  %v5575_v48 = vmul.u32.u64.high %v5489_v57, %v2395_v16, %v5574_v8  ;;  %vm1716_vm3 = vcmp.eq.s32.totalorder %v1714_v13, 0  ;;  %vm1719_vm9 = vcmp.eq.s32.totalorder %v1714_v13, 2  ;;  %p3864_p4 = scmp.ne.s32.totalorder %s3233_s26, %s3863_s0 }
 0x439   : > { %v2460_v15 = vadd.s32 %v2459_v0, %v4408_v21  ;;  %v2225_v24 = vsel %vm6260_vm11, %v2224_v34, %v2223_v12  ;;  %v3386_v1 = vadd.s32 4294967294, %v2312_v63  ;;  %v6337_v35 = vxor.u32 2147483648, %v5299_v38 }
 0x43a   : > { %v6338_v58 = vxor.u32 2147483648, %v5296_v22  ;;  %v2228_v27 = vsel %vm5528_vm13, %v5266_v44, %v2225_v24  ;;  %v2406_v55 = vadd.s32 1, %v5570_v56  ;;  %v1810_v49 = vsub.s32 4, %v5150_v60  ;;  %p3865_p5 = pnand %p3864_p4, %p4074_p3 }
 0x43b   : > { %v1718_v30 = vsel %vm1716_vm3, %v5296_v22, %v6337_v35  ;;  %vm3387_vm1 = vcmp.lt.s32.totalorder %v3386_v1, 0  ;;  %v2403_v3 = vmul.u32 %v5489_v57, %v2387_v61  ;;  %vm2405_vm11 = vc.u32 %v5575_v48, %v5569_v46 }
 0x43c   : > { %v1721_v51 = vsel %vm1719_vm9, %v6338_v58, %v5299_v38  ;;  %vm2462_vm3 = vcmp.ge.s32.totalorder %v2460_v15, 0  ;;  %3835 = vcosq.f32 %v2228_v27  ;;  %v2315_v54 = vsel %vm3387_vm1, 0, %v3386_v1  ;;  %p3866_p6 = pneg %p3865_p5 }
 0x43d   : > { %v1722_v17 = vsel %vm1715_vm10, %v1718_v30, %v1721_v51  ;;  %v2407_v22 = vsel %vm2405_vm11, %v2406_v55, %v5570_v56  ;;  %v2316_v33 = vsub.s32 32, %v2315_v54  ;;  %v2317_v11 = vshll.u32 %v5532_v32, %v2315_v54 }
 0x43e   : > { %v1723_v38 = vsel %vm1712_vm14, nan, %v1722_v17  ;;  %v2320_v13 = vsub.s32 4294967266, %v2315_v54  ;;  %v2408_v12 = vadd.s32 %v2407_v22, %v2403_v3  ;;  %vm2464_vm10 = vcmp.lt.s32.totalorder %v2460_v15, 520 }
 0x43f   : > { %v1811_v57 = vsel %vm1726_vm15, %v1810_v49, %v5150_v60  ;;  %vm1816_vm9 = vweird.f32 %v5032_v45  ;;  %v1821_v25 = vxor.u32 2147483648, %v5368_v37  ;;  %v1824_v47 = vxor.u32 2147483648, %v5304_v29  ;;  %vm5605_vm14 = vmand %vm2462_vm3, %vm2464_vm10 }
 0x440   : > { %v2318_v61 = vshrl.u32 %v2300_v6, %v2316_v33  ;;  %v2321_v16 = vadd.s32 127, %v2320_v13  ;;  %v2409_v31 = vadd.s32 536870912, %v2408_v12  ;;  %v1813_v32 = vsel %vm5249_vm4, 0, %v1811_v57 }
 0x441   : > { %v2472_v60 = vsel %vm5605_vm14, %v1723_v38, 0.0  ;;  %v1817_v34 = vadd.s32 3, %v1813_v32  ;;  %v2461_v63 = vadd.s32 %v2459_v0, %v4785_v50  ;;  %v1914_v8 = vsub.s32 4, %v5210_v10 }
 0x442   : > { %v2319_v24 = vor.u32 %v2318_v61, %v2317_v11  ;;  %v2322_v6 = vshll.u32 %v2321_v16, 23  ;;  %v5615_v1 = vshrl.u32 %v2409_v31, 30  ;;  %v3582_v15 = vsel %vm4750_vm7, %v2472_v60, 0 }
 0x443   : > { %v5622_v41 = vsel %vm4760_vm0, %v1723_v38, %v3582_v15  ;;  %v1818_v35 = vand.u32 3, %v1817_v34  ;;  %vm2463_vm4 = vcmp.ge.s32.totalorder %v2461_v63, 0  ;;  %vm2465_vm11 = vcmp.lt.s32.totalorder %v2461_v63, 520  ;;  %v2504_v38 = vld [vmem:[%s6217_s6 + $0x8] sm:$0xff] }
 0x444   : > { %v6341_v50 = vand.u32 2147483647, %v5314_v18  ;;  %v2323_v30 = vor.u32 4788187, %v2322_v6  ;;  %v2326_v58 = vcvt.s32.f32 %v2319_v24  ;;  %v2411_v51 = vshll.u32 %v5615_v1, 30  ;;  %2543 = vrot.lane.b32.xlu1 %v5622_v41, %s3960_s30  ;;  %vm5644_vm15 = vmand %vm2463_vm4, %vm2465_vm11 }
 0x445   : > { %v1915_v55 = vsel %vm1830_vm2, %v1914_v8, %v5210_v10  ;;  %vm1819_vm3 = vcmp.lt.s32.totalorder %v1818_v35, 2  ;;  %vm1820_vm10 = vcmp.eq.s32.totalorder %v1818_v35, 0  ;;  %vm1823_vm8 = vcmp.eq.s32.totalorder %v1818_v35, 2 }
 0x446   : > { %vm5626_vm1 = vcmp.le.f32.partialorder %v6341_v50, 0.7853982  ;;  %v1917_v17 = vsel %vm5288_vm12, 0, %v1915_v55  ;;  %v2324_v49 = vand.u32 2147483647, %v2323_v30  ;;  %v5638_v3 = vsub.s32 %v2408_v12, %v2411_v51 }
 0x447   : > { %v1822_v54 = vsel %vm1820_vm10, %v5304_v29, %v1821_v25  ;;  %v1825_v22 = vsel %vm1823_vm8, %v1824_v47, %v5368_v37  ;;  %v2404_v10 = vadd.s32 %v5569_v46, %v5575_v48  ;;  %v1921_v11 = vadd.s32 3, %v1917_v17 }
 0x448   : > { %v1826_v33 = vsel %vm1819_vm3, %v1822_v54, %v1825_v22  ;;  %v1925_v14 = vxor.u32 2147483648, %v5378_v19  ;;  %v2327_v13 = vmul.f32 %v2326_v58, %v2324_v49  ;;  %v2414_v12 = vsub.s32 0, %v5638_v3 }
 0x449   : > { %v1827_v29 = vsel %vm1816_vm9, nan, %v1826_v33  ;;  %v1928_v37 = vxor.u32 2147483648, %v5376_v28  ;;  %3837 = vsinq.f32 %v2228_v27  ;;  %v1922_v25 = vand.u32 3, %v1921_v11  ;;  %v5658_v46 = vpop.eup %3835 }
 0x44a   : > { %v2473_v57 = vsel %vm5644_vm15, %v1827_v29, 0.0  ;;  %v2018_v47 = vsub.s32 4, %v5275_v39  ;;  %v2328_v48 = vxor.u32 2147483648, %v2327_v13  ;;  %v3389_v61 = vmin.u32 %v2414_v12, %v5638_v3 }
 0x44b   : > { %v3586_v16 = vsel %vm4750_vm7, %v2473_v57, 0  ;;  %vm1920_vm2 = vweird.f32 %v5038_v26  ;;  %vm1923_vm12 = vcmp.lt.s32.totalorder %v1922_v25, 2  ;;  %vm1924_vm8 = vcmp.eq.s32.totalorder %v1922_v25, 0  ;;  %v6350_v57 = vld [vmem:[#allocation9_spill] sm:$0xff] }
 0x44c   : > { %v5666_v45 = vsel %vm4760_vm0, %v1827_v29, %v3586_v16  ;;  %vm1927_vm9 = vcmp.eq.s32.totalorder %v1922_v25, 2  ;;  %vm6346_vm4 = vcmp.lt.s32.totalorder %v5314_v18, 0  ;;  %v2416_v31 = vclz %v3389_v61 }
 0x44d   : > { %v2329_v27 = vsel %vm6346_vm4, %v2328_v48, %v2327_v13  ;;  %2545 = vrot.lane.b32.xlu0 %v5666_v45, %s3960_s30  ;;  %v1926_v32 = vsel %vm1924_vm8, %v5376_v28, %v1925_v14  ;;  %v1929_v60 = vsel %vm1927_vm9, %v1928_v37, %v5378_v19  ;;  %vm6347_vm11 = vcmp.lt.s32.totalorder %v5043_v7, 0 }
 0x44e   : > { %v2332_v34 = vsel %vm5626_vm1, %v5314_v18, %v2329_v27  ;;  %v1930_v63 = vsel %vm1923_vm12, %v1926_v32, %v1929_v60  ;;  %v2019_v8 = vsel %vm6347_vm11, %v2018_v47, %v5275_v39  ;;  %vm2024_vm3 = vweird.f32 %v5043_v7  ;;  %v6351_v27 = vld [vmem:[#allocation7_spill] sm:$0xff] }
 0x44f   : > { %v2029_v24 = vxor.u32 2147483648, %v5456_v4  ;;  %v3390_v6 = vadd.s32 4294967294, %v2416_v31  ;;  %v1931_v15 = vsel %vm1920_vm2, nan, %v1930_v63  ;;  %v2021_v19 = vsel %vm5353_vm6, 0, %v2019_v8 }
 0x450   : > { %v2032_v28 = vxor.u32 2147483648, %v5440_v42  ;;  %3839 = vsinq.f32 %v2332_v34  ;;  %v2474_v35 = vsel %vm5605_vm14, %v1931_v15, 0.0  ;;  %v2025_v50 = vadd.s32 3, %v2021_v19 }
 0x451   : > { %v2122_v39 = vsub.s32 4, %v5357_v40  ;;  %3841 = vcosq.f32 %v2332_v34  ;;  %vm3391_vm10 = vcmp.lt.s32.totalorder %v3390_v6, 0  ;;  %v3590_v30 = vsel %vm4750_vm7, %v2474_v35, 0 }
 0x452   : > { %v2133_v26 = vxor.u32 2147483648, %v5547_v52  ;;  %v2419_v58 = vsel %vm3391_vm10, 0, %v3390_v6  ;;  %v5695_v5 = vsel %vm4760_vm0, %v1931_v15, %v3590_v30  ;;  %v2026_v51 = vand.u32 3, %v2025_v50  ;;  %v3132_v6 = vld [vmem:[#allocation2] sm:$0x1] }
 0x453   : > { %vm6348_vm6 = vcmp.lt.s32.totalorder %v5126_v62, 0  ;;  %v2420_v17 = vsub.s32 32, %v2419_v58  ;;  %v2421_v49 = vshll.u32 %v5638_v3, %v2419_v58  ;;  %v2424_v54 = vsub.s32 4294967266, %v2419_v58  ;;  %2547 = vrot.lane.b32.xlu1 %v5695_v5, %s3960_s30 }
 0x454   : > { %v2123_v55 = vsel %vm6348_vm6, %v2122_v39, %v5357_v40  ;;  %vm2027_vm2 = vcmp.lt.s32.totalorder %v2026_v51, 2  ;;  %vm2028_vm12 = vcmp.eq.s32.totalorder %v2026_v51, 0  ;;  %vm2031_vm8 = vcmp.eq.s32.totalorder %v2026_v51, 2 }
 0x455   : > { %v2125_v33 = vsel %vm5436_vm5, 0, %v2123_v55  ;;  %v2422_v14 = vshrl.u32 %v2404_v10, %v2420_v17  ;;  %v2425_v13 = vadd.s32 127, %v2424_v54  ;;  %v2030_v12 = vsel %vm2028_vm12, %v5440_v42, %v2029_v24 }
 0x456   : > { %v2129_v11 = vadd.s32 3, %v2125_v33  ;;  %v2033_v40 = vsel %vm2031_vm8, %v2032_v28, %v5456_v4  ;;  %v2136_v3 = vxor.u32 2147483648, %v5538_v36  ;;  %v2226_v25 = vsub.s32 4, %v6350_v57  ;;  %v3838_v47 = vpop.eup %3837 }
 0x457   : > { %v2034_v29 = vsel %vm2027_vm2, %v2030_v12, %v2033_v40  ;;  %v2423_v48 = vor.u32 %v2422_v14, %v2421_v49  ;;  %v2426_v61 = vshll.u32 %v2425_v13, 23  ;;  %vm2350_vm5 = vcmp.lt.s32.totalorder %v6351_v27, 0 }
 0x458   : > { %v2130_v37 = vand.u32 3, %v2129_v11  ;;  %v2035_v16 = vsel %vm2024_vm3, nan, %v2034_v29  ;;  %vm2128_vm9 = vweird.f32 %v5126_v62  ;;  %vm6352_vm10 = vcmp.lt.s32.totalorder %v5266_v44, 0 }
 0x459   : > { %v2475_v10 = vsel %vm5644_vm15, %v2035_v16, 0.0  ;;  %v2427_v42 = vor.u32 4788187, %v2426_v61  ;;  %v2227_v60 = vsel %vm6352_vm10, %v2226_v25, %v6350_v57  ;;  %v2430_v63 = vcvt.s32.f32 %v2423_v48 }
 0x45a   : > { %vm2132_vm4 = vcmp.eq.s32.totalorder %v2130_v37, 0  ;;  %v3594_v4 = vsel %vm4750_vm7, %v2475_v10, 0  ;;  %vm2135_vm11 = vcmp.eq.s32.totalorder %v2130_v37, 2  ;;  %vm2131_vm3 = vcmp.lt.s32.totalorder %v2130_v37, 2 }
 0x45b   : > { %v2134_v31 = vsel %vm2132_vm4, %v5538_v36, %v2133_v26  ;;  %v5720_v32 = vsel %vm4760_vm0, %v2035_v16, %v3594_v4  ;;  %v2137_v7 = vsel %vm2135_vm11, %v2136_v3, %v5547_v52  ;;  %v2428_v34 = vand.u32 2147483647, %v2427_v42 }
 0x45c   : > { %2549 = vrot.lane.b32.xlu0 %v5720_v32, %s3960_s30  ;;  %v2138_v8 = vsel %vm2131_vm3, %v2134_v31, %v2137_v7  ;;  %v2229_v36 = vsel %vm5528_vm13, 0, %v2227_v60  ;;  %v6353_v24 = vand.u32 2147483647, %v6351_v27  ;;  %v2330_v19 = vsub.s32 4, %v5516_v23 }
 0x45d   : > { %v2139_v52 = vsel %vm2128_vm9, nan, %v2138_v8  ;;  %v2233_v15 = vadd.s32 3, %v2229_v36  ;;  %v3840_v28 = vpop.eup %3839  ;;  %v2431_v35 = vmul.f32 %v2430_v63, %v2428_v34  ;;  %v2237_v39 = vxor.u32 2147483648, %v3838_v47 }
 0x45e   : > { %vm5732_vm6 = vcmp.le.f32.partialorder %v6353_v24, 0.7853982  ;;  %v2476_v50 = vsel %vm5605_vm14, %v2139_v52, 0.0  ;;  %v2240_v59 = vxor.u32 2147483648, %v5658_v46  ;;  %v3842_v30 = vpop.eup %3841  ;;  %vm2232_vm13 = vweird.f32 %v5266_v44 }
 0x45f   : > { %v3598_v26 = vsel %vm4750_vm7, %v2476_v50, 0  ;;  %v2234_v58 = vand.u32 3, %v2233_v15  ;;  %vm6356_vm2 = vcmp.lt.s32.totalorder %v5314_v18, 0  ;;  %v2432_v51 = vxor.u32 2147483648, %v2431_v35  ;;  %v2503_v15 = vld [vmem:[%s6217_s6] sm:$0xff] }
 0x460   : > { %v2331_v62 = vsel %vm6356_vm2, %v2330_v19, %v5516_v23  ;;  %v5750_v55 = vsel %vm4760_vm0, %v2139_v52, %v3598_v26  ;;  %v2434_v49 = vsub.s32 4, %v5615_v1  ;;  %v2341_v22 = vxor.u32 2147483648, %v3840_v28  ;;  %v2505_v52 = vld [vmem:[%s6217_s6 + $0x10] sm:$0xff] }
 0x461   : > { %v2333_v17 = vsel %vm5626_vm1, 0, %v2331_v62  ;;  %2551 = vrot.lane.b32.xlu1 %v5750_v55, %s3960_s30  ;;  %vm2236_vm12 = vcmp.eq.s32.totalorder %v2234_v58, 0  ;;  %vm2239_vm8 = vcmp.eq.s32.totalorder %v2234_v58, 2  ;;  %v2433_v23 = vsel %vm2350_vm5, %v2432_v51, %v2431_v35 }
 0x462   : > { %v2337_v54 = vadd.s32 3, %v2333_v17  ;;  %vm2235_vm9 = vcmp.lt.s32.totalorder %v2234_v58, 2  ;;  %v2238_v33 = vsel %vm2236_vm12, %v5658_v46, %v2237_v39  ;;  %v2241_v11 = vsel %vm2239_vm8, %v2240_v59, %v3838_v47 }
 0x463   : > { %v2436_v0 = vsel %vm5732_vm6, %v6351_v27, %v2433_v23  ;;  %v2242_v14 = vsel %vm2235_vm9, %v2238_v33, %v2241_v11  ;;  %v2344_v12 = vxor.u32 2147483648, %v3842_v30  ;;  %v2435_v46 = vsel %vm2350_vm5, %v2434_v49, %v5615_v1 }
 0x464   : > { %v2338_v13 = vand.u32 3, %v2337_v54  ;;  %3843 = vcosq.f32 %v2436_v0  ;;  %v2243_v40 = vsel %vm2232_vm13, nan, %v2242_v14  ;;  %vm2336_vm3 = vweird.f32 %v5314_v18 }
 0x465   : > { %3845 = vsinq.f32 %v2436_v0  ;;  %v2477_v29 = vsel %vm5644_vm15, %v2243_v40, 0.0  ;;  %v2437_v1 = vsel %vm5732_vm6, 0, %v2435_v46  ;;  %vm2440_vm6 = vweird.f32 %v6351_v27  ;;  %v2506_v27 = vld [vmem:[%s6217_s6 + $0x18] sm:$0xff]  ;;  %v2499_v46 = vld [vmem:[%s6216_s5] sm:$0xff] }
 0x466   : > { %vm2340_vm1 = vcmp.eq.s32.totalorder %v2338_v13, 0  ;;  %v3602_v37 = vsel %vm4750_vm7, %v2477_v29, 0  ;;  %vm2343_vm4 = vcmp.eq.s32.totalorder %v2338_v13, 2  ;;  %vm2339_vm11 = vcmp.lt.s32.totalorder %v2338_v13, 2 }
 0x467   : > { %v2342_v3 = vsel %vm2340_vm1, %v3842_v30, %v2341_v22  ;;  %v5774_v57 = vsel %vm4760_vm0, %v2243_v40, %v3602_v37  ;;  %v2345_v44 = vsel %vm2343_vm4, %v2344_v12, %v3840_v28  ;;  %v2441_v16 = vadd.s32 3, %v2437_v1 }
 0x468   : > { %2553 = vrot.lane.b32.xlu0 %v5774_v57, %s3960_s30  ;;  %v2346_v25 = vsel %vm2339_vm11, %v2342_v3, %v2345_v44  ;;  %vm6361_vm8 = vcmask 1039360   ;;  %vm6365_vm11 = vcmask 785408   ;;  %v6366_v37 = vmov 0.0  }
 0x469   : > { %v2347_v47 = vsel %vm2336_vm3, nan, %v2346_v25  ;;  %v2442_v18 = vand.u32 3, %v2441_v16  ;;  %vm6362_vm9 = vmmov %vm6361_vm8 }
 0x46a   : > { %v2478_v48 = vsel %vm5605_vm14, %v2347_v47, 0.0  ;;  %vm6363_vm1 = vmmov %vm6361_vm8 }
 0x46b   : > { %v3606_v61 = vsel %vm4750_vm7, %v2478_v48, 0  ;;  %vm2447_vm14 = vcmp.eq.s32.totalorder %v2442_v18, 2  ;;  %vm2444_vm5 = vcmp.eq.s32.totalorder %v2442_v18, 0  ;;  %vm2443_vm10 = vcmp.lt.s32.totalorder %v2442_v18, 2  ;;  %vm6364_vm4 = vmmov %vm6363_vm1 }
 0x46c   : > { %v5787_v10 = vsel %vm4760_vm0, %v2347_v47, %v3606_v61  ;;  %vm6367_vm3 = vmmov %vm6365_vm11 }
 0x46d   : > { %2555 = vrot.lane.b32.xlu1 %v5787_v10, %s3960_s30 }
 0x471   : > { %v3844_v42 = vpop.eup %3843  ;;  %2523 = vrot.lane.b32.xlu1 %v5750_v55, %s6304_s10 }
 0x472   : > { %v3846_v4 = vpop.eup %3845  ;;  %v2448_v31 = vxor.u32 2147483648, %v3844_v42 }
 0x473   : > { %v2445_v56 = vxor.u32 2147483648, %v3846_v4 }
 0x474   : > { %v2449_v7 = vsel %vm2447_vm14, %v2448_v31, %v3846_v4  ;;  %vm6368_vm14 = vmmov %vm6367_vm3 }
 0x475   : > { %v2446_v60 = vsel %vm2444_vm5, %v3844_v42, %v2445_v56  ;;  %2527 = vrot.lane.b32.xlu1 %v5787_v10, %s6304_s10  ;;  %vm6369_vm5 = vmmov %vm6367_vm3 }
 0x476   : > { %v2450_v34 = vsel %vm2443_vm10, %v2446_v60, %v2449_v7 }
 0x477   : > { %v2451_v63 = vsel %vm2440_vm6, nan, %v2450_v34 }
 0x478   : > { %v2479_v8 = vsel %vm5644_vm15, %v2451_v63, 0.0  ;;  %vm6357_vm15 = vcmask 1031168  }
 0x479   : > { %v3610_v36 = vsel %vm4750_vm7, %v2479_v8, 0  ;;  %2519 = vrot.lane.b32.xlu1 %v5695_v5, %s6304_s10  ;;  %vm6358_vm13 = vmmov %vm6357_vm15 }
 0x47a   : > { %v3643_v24 = vsel %vm4760_vm0, %v2451_v63, %v3610_v36  ;;  %vm6359_vm2 = vmmov %vm6358_vm13 }
 0x47b   : > { %2557 = vrot.lane.b32.xlu0 %v3643_v24, %s3960_s30  ;;  %vm6360_vm12 = vmmov %vm6359_vm2  ;;  %s3413_s30 = sshll.u32 %s3228_s22, 4  ;;  %s3869_s22 = scalar_lea.vmem %s3868_s8, 32 }
 0x47c   : > { %p3871_p9 = scmp.lt.s32.totalorder %s3869_s22, %s3863_s0 }
 0x47d   : > { %2515 = vrot.lane.b32.xlu1 %v5622_v41, %s6304_s10 }
 0x47e   : > { %p3872_p10 = por %p3871_p9, %p3870_p7 }
 0x47f   : > { %2525 = vrot.lane.b32.xlu0 %v5774_v57, %s6304_s10 }
 0x480   : > { %p3873_p11 = pnand %p3872_p10, %p3866_p6 }
 0x481   : > { %2588 = vperm.xlu1 %3781, %v2506_v27  }
 0x483   : > { %2529 = vrot.lane.b32.xlu0 %v3643_v24, %s6304_s10 }
 0x485   : > { %2578 = vperm.xlu1 %3781, %v2504_v38  }
 0x487   : > { %2521 = vrot.lane.b32.xlu0 %v5720_v32, %s6304_s10 }
 0x489   : > { %3135 = vperm.xlu1 %3781, %v3132_v6  }
 0x48b   : > { %2517 = vrot.lane.b32.xlu0 %v5666_v45, %s6304_s10  ;;  %s6165_s10 = scalar_lea.hbm %s6220_s9, %s3413_s30 }
 0x48f   : > { %2583 = vperm.xlu0 %3780, %v2505_v52  }
 0x493   : > { %2573 = vperm.xlu0 %3780, %v2503_v15  }
 0x4b6   : > { %v2544_v19 = vpop.permute.xlu1 %2543 }
 0x4bf   : > { %v2546_v35 = vpop.permute.xlu0 %2545 }
 0x4c0   : > { %v2559_v22 = vsel %vm6360_vm12, %v2544_v19, %v2546_v35 }
 0x4c5   : > { %v2548_v28 = vpop.permute.xlu1 %2547 }
 0x4ce   : > { %v2550_v39 = vpop.permute.xlu0 %2549 }
 0x4cf   : > { %v2560_v54 = vsel %vm6359_vm2, %v2548_v28, %v2550_v39 }
 0x4d3   : > { %v2552_v50 = vpop.permute.xlu1 %2551 }
 0x4da   : > { %v2554_v30 = vpop.permute.xlu0 %2553 }
 0x4db   : > { %v2561_v51 = vsel %vm6358_vm13, %v2552_v50, %v2554_v30 }
 0x4df   : > { %v2556_v59 = vpop.permute.xlu1 %2555 }
 0x4e3   : > { %v2524_v26 = vpop.permute.xlu1 %2523 }
 0x4e7   : > { %v2528_v49 = vpop.permute.xlu1 %2527 }
 0x4eb   : > { %v2520_v11 = vpop.permute.xlu1 %2519 }
 0x4ed   : > { %v2558_v58 = vpop.permute.xlu0 %2557 }
 0x4ee   : > { %v2562_v62 = vsel %vm6357_vm15, %v2556_v59, %v2558_v58  ;;  %2611 = vmatprep.subr.mxu0 %v2558_v58  ;;  %v6370_v59 = vmov 683565275  }
 0x4ef   : > { %2612 = vmatpush1.msra.mxu0 %v2562_v62  ;;  %v2516_v12 = vpop.permute.xlu1 %2515 }
 0x4f0   : > { %2613 = vmatprep.subr.mxu0 %v2554_v30 }
 0x4f1   : > { %v2526_v17 = vpop.permute.xlu0 %2525  ;;  %2614 = vmatpush1.msra.mxu0 %v2561_v51  ;;  %v6372_v51 = vmov 2131351028  }
 0x4f2   : > { %2615 = vmatprep.subr.mxu0 %v2550_v39  ;;  %v2533_v0 = vsel %vm6362_vm9, %v2524_v26, %v2526_v17  ;;  %v6371_v26 = vmov 2475754826  }
 0x4f3   : > { %2616 = vmatpush1.msra.mxu0 %v2560_v54 }
 0x4f4   : > { %2617 = vmatprep.subr.mxu0 %v2546_v35 }
 0x4f5   : > { %v2530_v23 = vpop.permute.xlu0 %2529  ;;  %2618 = vmatpush1.msra.mxu0 %v2559_v22 }
 0x4f6   : > { %v2534_v33 = vsel %vm6361_vm8, %v2528_v49, %v2530_v23  ;;  %2619 = vmatprep.subr.mxu0 %v2530_v23 }
 0x4f7   : > { %2620 = vmatpush1.msra.mxu0 %v2534_v33 }
 0x4f8   : > { %2621 = vmatprep.subr.mxu0 %v2526_v17 }
 0x4f9   : > { %v2522_v14 = vpop.permute.xlu0 %2521  ;;  %2622 = vmatpush1.msra.mxu0 %v2533_v0 }
 0x4fa   : > { %v2532_v13 = vsel %vm6363_vm1, %v2520_v11, %v2522_v14  ;;  %2623 = vmatprep.subr.mxu0 %v2522_v14 }
 0x4fb   : > { %2624 = vmatpush1.msra.mxu0 %v2532_v13 }
 0x4fd   : > { %v2518_v40 = vpop.permute.xlu0 %2517 }
 0x4fe   : > { %v2531_v29 = vsel %vm6364_vm4, %v2516_v12, %v2518_v40  ;;  %2625 = vmatprep.subr.mxu0 %v2518_v40 }
 0x4ff   : > { %2626 = vmatpush1.msra.mxu0 %v2531_v29 }
 0x500   : > { %2627 = vmatprep.subr.mxu0 %v3643_v24 }
 0x501   : > { %2628 = vmatpush1.msra.mxu0 %v5787_v10 }
 0x502   : > { %2629 = vmatprep.subr.mxu0 %v5774_v57 }
 0x503   : > { %2630 = vmatpush1.msra.mxu0 %v5750_v55  ;;  %v2500_v55 = vld [vmem:[%s6216_s5 + $0x8] sm:$0xff] }
 0x504   : > { %2631 = vmatprep.subr.mxu0 %v5720_v32  ;;  %v5860_v32 = vpop.permute.xlu1 %2588 }
 0x505   : > { %2632 = vmatpush1.msra.mxu0 %v5695_v5  ;;  %v2501_v5 = vld [vmem:[%s6216_s5 + $0x10] sm:$0xff] }
 0x506   : > { %2633 = vmatprep.subr.mxu0 %v5666_v45 }
 0x507   : > { %2634 = vmatpush1.msra.mxu0 %v5622_v41  ;;  %v2502_v41 = vld [vmem:[%s6216_s5 + $0x18] sm:$0xff] }
 0x508   : > { %3392 = vmatmul.mubr.msk.f32.vlgmr.msra.gmra.mxu0 %vm6365_vm11, %v2499_v46  ;;  %v2579_v48 = vpop.permute.xlu1 %2578 }
 0x509   : > { %2672 = vmatprep.mubr.f32.mxu0 %v6366_v37 }
 0x50a   : > { %v2584_v45 = vpop.permute.xlu0 %2583 }
 0x50c   : > { %3393 = vmatmul.mubr.msk.f32.gmra.mxu0 %vm6367_vm3, %v2500_v55 }
 0x50d   : > { %2677 = vmatprep.mubr.f32.mxu0 %v6366_v37 }
 0x50e   : > { %v2574_v3 = vpop.permute.xlu0 %2573 }
 0x510   : > { %3394 = vmatmul.mubr.msk.f32.gmra.mxu0 %vm6368_vm14, %v2501_v5 }
 0x511   : > { %2682 = vmatprep.mubr.f32.mxu0 %v6366_v37 }
 0x514   : > { %3395 = vmatmul.mubr.msk.f32.gmra.mxu0 %vm6369_vm5, %v2502_v41 }
 0x5c8   : > { %v2669_v57 = vpop.f32.mrf.mxu0 }
 0x5c9   : > { %v5862_v44 = vadd.f32 %v2669_v57, %v2574_v3 }
 0x5ca   : > { %v2671_v25 = vpop.f32.mrf.mxu0 }
 0x5cb   : > { %v2688_v1 = vand.u32 2147483647, %v5862_v44  ;;  %v2691_v47 = vand.u32 2139095040, %v5862_v44 }
 0x5cc   : > { %v2674_v61 = vpop.f32.mrf.mxu0 }
 0x5cd   : > { %v2692_v16 = vshrl.u32 %v2691_v47, 23  ;;  %v5866_v10 = vadd.f32 %v2674_v61, %v2579_v48  ;;  %v2695_v18 = vand.u32 8388607, %v2688_v1 }
 0x5ce   : > { %v2676_v42 = vpop.f32.mrf.mxu0 }
 0x5cf   : > { %v3396_v4 = vadd.s32 4294967169, %v2692_v16  ;;  %v2792_v31 = vand.u32 2147483647, %v5866_v10  ;;  %v2795_v56 = vand.u32 2139095040, %v5866_v10  ;;  %v2696_v34 = vor.u32 8388608, %v2695_v18 }
 0x5d0   : > { %v2679_v7 = vpop.f32.mrf.mxu0 }
 0x5d1   : > { %v2698_v60 = vadd.s32 1, %v3396_v4  ;;  %v2796_v63 = vshrl.u32 %v2795_v56, 23  ;;  %v2799_v8 = vand.u32 8388607, %v2792_v31  ;;  %v5874_v36 = vadd.f32 %v2679_v7, %v2584_v45 }
 0x5d2   : > { %v2681_v24 = vpop.f32.mrf.mxu0  ;;  %v5878_v19 = vshll.u32 %v2696_v34, 8 }
 0x5d3   : > { %vm2699_vm10 = vcmp.gt.s32.totalorder %v2698_v60, 0  ;;  %v3400_v38 = vadd.s32 4294967169, %v2796_v63  ;;  %v2800_v28 = vor.u32 8388608, %v2799_v8  ;;  %v2899_v35 = vand.u32 2139095040, %v5874_v36 }
 0x5d4   : > { %v2700_v27 = vsel %vm2699_vm10, %v2698_v60, 0  ;;  %v5876_v6 = vpop.f32.mrf.mxu0  ;;  %v2896_v7 = vand.u32 2147483647, %v5874_v36 }
 0x5d5   : > { %v2701_v52 = vshrl.u32 %v2700_v27, 5  ;;  %v2702_v15 = vand.u32 31, %v2700_v27  ;;  %v2802_v62 = vadd.s32 1, %v3400_v38  ;;  %v2840_v38 = vshll.u32 %v2800_v28, 8 }
 0x5d6   : > { %v2686_v50 = vpop.f32.mrf.mxu0 }
 0x5d7   : > { %v2703_v39 = vsub.s32 32, %v2702_v15  ;;  %v2705_v30 = vshll.u32 %v6370_v59, %v2702_v15  ;;  %v2708_v58 = vshll.u32 %v6371_v26, %v2702_v15  ;;  %v2711_v17 = vshll.u32 %v6372_v51, %v2702_v15 }
 0x5d8   : > { %v2714_v49 = vshll.u32 %v6279_v2, %v2702_v15  ;;  %v2717_v54 = vshll.u32 %v3966_v20, %v2702_v15  ;;  %vm2720_vm6 = vcmp.lt.s32.totalorder %v2701_v52, 1  ;;  %vm2721_vm15 = vcmp.lt.s32.totalorder %v2701_v52, 2 }
 0x5d9   : > { %v2706_v22 = vshrl.u32 %v6371_v26, %v2703_v39  ;;  %v2709_v23 = vshrl.u32 %v6372_v51, %v2703_v39  ;;  %v2712_v33 = vshrl.u32 %v6279_v2, %v2703_v39  ;;  %v2704_v11 = vshrl.u32 %v6370_v59, %v2703_v39 }
 0x5da   : > { %v2715_v0 = vshrl.u32 %v3966_v20, %v2703_v39  ;;  %v2718_v14 = vshrl.u32 %v6331_v43, %v2703_v39  ;;  %vm2722_vm13 = vcmp.lt.s32.totalorder %v2701_v52, 3  ;;  %vm2803_vm2 = vcmp.gt.s32.totalorder %v2802_v62, 0 }
 0x5db   : > { %v2707_v13 = vor.u32 %v2706_v22, %v2705_v30  ;;  %v2710_v12 = vor.u32 %v2709_v23, %v2708_v58  ;;  %v2713_v40 = vor.u32 %v2712_v33, %v2711_v17  ;;  %vm2723_vm12 = vcmp.lt.s32.totalorder %v2701_v52, 4 }
 0x5dc   : > { %v2716_v29 = vor.u32 %v2715_v0, %v2714_v49  ;;  %v2719_v46 = vor.u32 %v2718_v14, %v2717_v54  ;;  %v2804_v55 = vsel %vm2803_vm2, %v2802_v62, 0  ;;  %v2900_v15 = vshrl.u32 %v2899_v35, 23 }
 0x5dd   : > { %v2724_v5 = vsel %vm2720_vm6, %v2704_v11, %v2707_v13  ;;  %v2725_v41 = vsel %vm2723_vm12, %v2713_v40, 2102212464  ;;  %v2728_v45 = vsel %vm2720_vm6, %v2707_v13, %v2710_v12  ;;  %v2732_v3 = vsel %vm2720_vm6, %v2710_v12, %v2713_v40 }
 0x5de   : > { %v2726_v57 = vsel %vm2722_vm13, %v2710_v12, %v2725_v41  ;;  %v2729_v25 = vsel %vm2723_vm12, %v2716_v29, 920167782  ;;  %v2733_v47 = vsel %vm2723_vm12, %v2719_v46, 1326507024  ;;  %v2805_v48 = vshrl.u32 %v2804_v55, 5 }
 0x5df   : > { %v2727_v61 = vsel %vm2721_vm15, %v2724_v5, %v2726_v57  ;;  %v2730_v16 = vsel %vm2722_vm13, %v2713_v40, %v2729_v25  ;;  %v2734_v18 = vsel %vm2722_vm13, %v2716_v29, %v2733_v47  ;;  %v2806_v42 = vand.u32 31, %v2804_v55 }
 0x5e0   : > { %v2731_v4 = vsel %vm2721_vm15, %v2728_v45, %v2730_v16  ;;  %v2735_v56 = vsel %vm2721_vm15, %v2732_v3, %v2734_v18  ;;  %v2743_v24 = vmul.u32 %v5878_v19, %v2727_v61  ;;  %vm2824_vm8 = vcmp.lt.s32.totalorder %v2805_v48, 1 }
 0x5e1   : > { %v5903_v60 = vmul.u32.u64.low %v5878_v19, %v2735_v56  ;;  %v5904_v34 = vmul.u32.u64.high %v5878_v19, %v2735_v56, %v5903_v60  ;;  %v5907_v63 = vmul.u32.u64.low %v5878_v19, %v2731_v4  ;;  %v5908_v8 = vmul.u32.u64.high %v5878_v19, %v2731_v4, %v5907_v63 }
 0x5e2   : > { %v2807_v27 = vsub.s32 32, %v2806_v42  ;;  %v2809_v50 = vshll.u32 %v6370_v59, %v2806_v42  ;;  %v2812_v52 = vshll.u32 %v6371_v26, %v2806_v42  ;;  %v2815_v39 = vshll.u32 %v6372_v51, %v2806_v42 }
 0x5e3   : > { %v2818_v17 = vshll.u32 %v6279_v2, %v2806_v42  ;;  %vm2745_vm9 = vc.u32 %v5904_v34, %v5907_v63  ;;  %v2746_v19 = vadd.s32 1, %v5908_v8  ;;  %v2821_v35 = vshll.u32 %v3966_v20, %v2806_v42 }
 0x5e4   : > { %v2810_v30 = vshrl.u32 %v6371_v26, %v2807_v27  ;;  %v2813_v58 = vshrl.u32 %v6372_v51, %v2807_v27  ;;  %v2816_v62 = vshrl.u32 %v6279_v2, %v2807_v27  ;;  %v2819_v28 = vshrl.u32 %v3966_v20, %v2807_v27 }
 0x5e5   : > { %v2822_v23 = vshrl.u32 %v6331_v43, %v2807_v27  ;;  %v2747_v33 = vsel %vm2745_vm9, %v2746_v19, %v5908_v8  ;;  %vm2826_vm1 = vcmp.lt.s32.totalorder %v2805_v48, 3  ;;  %vm2827_vm4 = vcmp.lt.s32.totalorder %v2805_v48, 4 }
 0x5e6   : > { %v2811_v49 = vor.u32 %v2810_v30, %v2809_v50  ;;  %v2814_v54 = vor.u32 %v2813_v58, %v2812_v52  ;;  %v2817_v22 = vor.u32 %v2816_v62, %v2815_v39  ;;  %v2820_v11 = vor.u32 %v2819_v28, %v2818_v17 }
 0x5e7   : > { %v2748_v0 = vadd.s32 %v2747_v33, %v2743_v24  ;;  %v2808_v14 = vshrl.u32 %v6370_v59, %v2807_v27  ;;  %v2823_v13 = vor.u32 %v2822_v23, %v2821_v35  ;;  %v3404_v55 = vadd.s32 4294967169, %v2900_v15 }
 0x5e8   : > { %v2829_v12 = vsel %vm2827_vm4, %v2817_v22, 2102212464  ;;  %v2832_v40 = vsel %vm2824_vm8, %v2811_v49, %v2814_v54  ;;  %v2833_v29 = vsel %vm2827_vm4, %v2820_v11, 920167782  ;;  %v2836_v46 = vsel %vm2824_vm8, %v2814_v54, %v2817_v22 }
 0x5e9   : > { %v2749_v5 = vadd.s32 536870912, %v2748_v0  ;;  %vm2825_vm11 = vcmp.lt.s32.totalorder %v2805_v48, 2  ;;  %v2834_v41 = vsel %vm2826_vm1, %v2817_v22, %v2833_v29  ;;  %v2837_v45 = vsel %vm2827_vm4, %v2823_v13, 1326507024 }
 0x5ea   : > { %v2828_v3 = vsel %vm2824_vm8, %v2808_v14, %v2811_v49  ;;  %v2830_v57 = vsel %vm2826_vm1, %v2814_v54, %v2829_v12  ;;  %v2835_v25 = vsel %vm2825_vm11, %v2832_v40, %v2834_v41  ;;  %v2838_v47 = vsel %vm2826_vm1, %v2820_v11, %v2837_v45 }
 0x5eb   : > { %v5933_v61 = vshrl.u32 %v2749_v5, 30  ;;  %v2839_v16 = vsel %vm2825_vm11, %v2836_v46, %v2838_v47  ;;  %v5935_v18 = vmul.u32.u64.low %v2840_v38, %v2835_v25  ;;  %v5936_v42 = vmul.u32.u64.high %v2840_v38, %v2835_v25, %v5935_v18 }
 0x5ec   : > { %v5939_v4 = vmul.u32.u64.low %v2840_v38, %v2839_v16  ;;  %v5940_v56 = vmul.u32.u64.high %v2840_v38, %v2839_v16, %v5939_v4  ;;  %v2906_v60 = vadd.s32 1, %v3404_v55  ;;  %v2831_v8 = vsel %vm2825_vm11, %v2828_v3, %v2830_v57 }
 0x5ed   : > { %v2903_v24 = vand.u32 8388607, %v2896_v7  ;;  %v2751_v27 = vshll.u32 %v5933_v61, 30  ;;  %v2850_v48 = vadd.s32 1, %v5936_v42  ;;  %v2847_v50 = vmul.u32 %v2840_v38, %v2831_v8 }
 0x5ee   : > { %vm2907_vm3 = vcmp.gt.s32.totalorder %v2906_v60, 0  ;;  %vm2849_vm14 = vc.u32 %v5940_v56, %v5935_v18  ;;  %v5951_v17 = vadd.f32 %v5876_v6, %v5860_v32 }
 0x5ef   : > { %v2908_v15 = vsel %vm2907_vm3, %v2906_v60, 0  ;;  %v2851_v39 = vsel %vm2849_vm14, %v2850_v48, %v5936_v42  ;;  %v2904_v58 = vor.u32 8388608, %v2903_v24  ;;  %v5953_v19 = vsub.s32 %v2748_v0, %v2751_v27 }
 0x5f0   : > { %v2910_v52 = vand.u32 31, %v2908_v15  ;;  %v2852_v30 = vadd.s32 %v2851_v39, %v2847_v50  ;;  %v2909_v28 = vshrl.u32 %v2908_v15, 5  ;;  %v3003_v55 = vand.u32 2139095040, %v5951_v17 }
 0x5f1   : > { %v2754_v40 = vsub.s32 0, %v5953_v19  ;;  %v2944_v3 = vshll.u32 %v2904_v58, 8 }
 0x5f2   : > { %v2911_v62 = vsub.s32 32, %v2910_v52  ;;  %v2913_v35 = vshll.u32 %v6370_v59, %v2910_v52  ;;  %v2916_v38 = vshll.u32 %v6371_v26, %v2910_v52  ;;  %v2853_v49 = vadd.s32 536870912, %v2852_v30 }
 0x5f3   : > { %v2919_v23 = vshll.u32 %v6372_v51, %v2910_v52  ;;  %v2922_v11 = vshll.u32 %v6279_v2, %v2910_v52  ;;  %v2925_v12 = vshll.u32 %v3966_v20, %v2910_v52  ;;  %vm2928_vm5 = vcmp.lt.s32.totalorder %v2909_v28, 1 }
 0x5f4   : > { %v2914_v54 = vshrl.u32 %v6371_v26, %v2911_v62  ;;  %v2917_v22 = vshrl.u32 %v6372_v51, %v2911_v62  ;;  %v2920_v33 = vshrl.u32 %v6279_v2, %v2911_v62  ;;  %v2923_v32 = vshrl.u32 %v3966_v20, %v2911_v62 }
 0x5f5   : > { %v2926_v6 = vshrl.u32 %v6331_v43, %v2911_v62  ;;  %v5964_v0 = vshrl.u32 %v2853_v49, 30  ;;  %v2912_v45 = vshrl.u32 %v6370_v59, %v2911_v62  ;;  %vm2931_vm10 = vcmp.lt.s32.totalorder %v2909_v28, 4 }
 0x5f6   : > { %v2915_v14 = vor.u32 %v2914_v54, %v2913_v35  ;;  %v2918_v13 = vor.u32 %v2917_v22, %v2916_v38  ;;  %v2921_v29 = vor.u32 %v2920_v33, %v2919_v23  ;;  %v2924_v46 = vor.u32 %v2923_v32, %v2922_v11 }
 0x5f7   : > { %v2855_v5 = vshll.u32 %v5964_v0, 30  ;;  %v2927_v41 = vor.u32 %v2926_v6, %v2925_v12  ;;  %v3397_v42 = vmin.u32 %v2754_v40, %v5953_v19  ;;  %vm2929_vm6 = vcmp.lt.s32.totalorder %v2909_v28, 2 }
 0x5f8   : > { %v2933_v25 = vsel %vm2931_vm10, %v2921_v29, 2102212464  ;;  %v2936_v47 = vsel %vm2928_vm5, %v2915_v14, %v2918_v13  ;;  %v2937_v16 = vsel %vm2931_vm10, %v2924_v46, 920167782  ;;  %vm2930_vm15 = vcmp.lt.s32.totalorder %v2909_v28, 3 }
 0x5f9   : > { %v5971_v57 = vsub.s32 %v2852_v30, %v2855_v5  ;;  %v3004_v4 = vshrl.u32 %v3003_v55, 23  ;;  %v2932_v60 = vsel %vm2928_vm5, %v2912_v45, %v2915_v14  ;;  %v2938_v8 = vsel %vm2930_vm15, %v2921_v29, %v2937_v16 }
 0x5fa   : > { %v2940_v24 = vsel %vm2928_vm5, %v2918_v13, %v2921_v29  ;;  %v2941_v27 = vsel %vm2931_vm10, %v2927_v41, 1326507024  ;;  %v2934_v15 = vsel %vm2930_vm15, %v2918_v13, %v2933_v25  ;;  %v2939_v50 = vsel %vm2929_vm6, %v2936_v47, %v2938_v8 }
 0x5fb   : > { %v2858_v48 = vsub.s32 0, %v5971_v57  ;;  %v2942_v52 = vsel %vm2930_vm15, %v2924_v46, %v2941_v27  ;;  %v5975_v30 = vmul.u32.u64.low %v2944_v3, %v2939_v50  ;;  %v5976_v58 = vmul.u32.u64.high %v2944_v3, %v2939_v50, %v5975_v30 }
 0x5fc   : > { %v2943_v39 = vsel %vm2929_vm6, %v2940_v24, %v2942_v52  ;;  %v2756_v38 = vclz %v3397_v42  ;;  %v2935_v28 = vsel %vm2929_vm6, %v2932_v60, %v2934_v15  ;;  %v3408_v49 = vadd.s32 4294967169, %v3004_v4 }
 0x5fd   : > { %v5979_v62 = vmul.u32.u64.low %v2944_v3, %v2943_v39  ;;  %v5980_v35 = vmul.u32.u64.high %v2944_v3, %v2943_v39, %v5979_v62  ;;  %v3401_v54 = vmin.u32 %v2858_v48, %v5971_v57  ;;  %v2954_v22 = vadd.s32 1, %v5976_v58 }
 0x5fe   : > { %v3010_v23 = vadd.s32 1, %v3408_v49  ;;  %v2951_v33 = vmul.u32 %v2944_v3, %v2935_v28  ;;  %v3398_v11 = vadd.s32 4294967294, %v2756_v38  ;;  %v3000_v40 = vand.u32 2147483647, %v5951_v17 }
 0x5ff   : > { %vm2953_vm13 = vc.u32 %v5980_v35, %v5975_v30  ;;  %v2860_v6 = vclz %v3401_v54  ;;  %vm3968_vm5 = vmmov 0   ;;  %vm2898_vm10 = vcmp.lt.s32.totalorder %v5874_v36, 0 }
 0x600   : > { %v2955_v32 = vsel %vm2953_vm13, %v2954_v22, %v5976_v58  ;;  %vm3011_vm2 = vcmp.gt.s32.totalorder %v3010_v23, 0  ;;  %vm3399_vm12 = vcmp.lt.s32.totalorder %v3398_v11, 0  ;;  %v3007_v3 = vand.u32 8388607, %v3000_v40  ;;  %3429 = vmatprep.mubr.msk.f32.mxu1 %vm3968_vm5, %v6366_v37 }
 0x601   : > { %v2956_v14 = vadd.s32 %v2955_v32, %v2951_v33  ;;  %v3012_v13 = vsel %vm3011_vm2, %v3010_v23, 0  ;;  %v3402_v46 = vadd.s32 4294967294, %v2860_v6  ;;  %v5990_v41 = vsel %vm3399_vm12, 0, %v3398_v11 }
 0x602   : > { %v3014_v29 = vand.u32 31, %v3012_v13  ;;  %v3013_v47 = vshrl.u32 %v3012_v13, 5  ;;  %v3008_v38 = vor.u32 8388608, %v3007_v3  ;;  %vm2794_vm15 = vcmp.lt.s32.totalorder %v5866_v10, 0 }
 0x603   : > { %v2957_v12 = vadd.s32 536870912, %v2956_v14  ;;  %vm3403_vm8 = vcmp.lt.s32.totalorder %v3402_v46, 0  ;;  %vm6054_vm13 = vcmp.le.f32.partialorder %v2896_v7, 0.7853982  ;;  %vm2690_vm2 = vcmp.lt.s32.totalorder %v5862_v44, 0 }
 0x604   : > { %v3015_v5 = vsub.s32 32, %v3014_v29  ;;  %v3017_v16 = vshll.u32 %v6370_v59, %v3014_v29  ;;  %v3020_v42 = vshll.u32 %v6371_v26, %v3014_v29  ;;  %v3023_v8 = vshll.u32 %v6372_v51, %v3014_v29 }
 0x605   : > { %v5988_v55 = vshrl.u32 %v2957_v12, 30  ;;  %v3026_v15 = vshll.u32 %v6279_v2, %v3014_v29  ;;  %v6008_v62 = vsel %vm3403_vm8, 0, %v3402_v46  ;;  %vm3032_vm9 = vcmp.lt.s32.totalorder %v3013_v47, 1 }
 0x606   : > { %v3018_v25 = vshrl.u32 %v6371_v26, %v3015_v5  ;;  %v3021_v4 = vshrl.u32 %v6372_v51, %v3015_v5  ;;  %v3024_v24 = vshrl.u32 %v6279_v2, %v3015_v5  ;;  %v3027_v50 = vshrl.u32 %v3966_v20, %v3015_v5 }
 0x607   : > { %v2959_v45 = vshll.u32 %v5988_v55, 30  ;;  %v3029_v26 = vshll.u32 %v3966_v20, %v3014_v29  ;;  %v3030_v58 = vshrl.u32 %v6331_v43, %v3015_v5  ;;  %vm3033_vm1 = vcmp.lt.s32.totalorder %v3013_v47, 2 }
 0x608   : > { %v3019_v27 = vor.u32 %v3018_v25, %v3017_v16  ;;  %v3022_v48 = vor.u32 %v3021_v4, %v3020_v42  ;;  %v3025_v39 = vor.u32 %v3024_v24, %v3023_v8  ;;  %v3028_v28 = vor.u32 %v3027_v50, %v3026_v15 }
 0x609   : > { %v5999_v60 = vsub.s32 %v2956_v14, %v2959_v45  ;;  %v3031_v49 = vor.u32 %v3030_v58, %v3029_v26  ;;  %vm3035_vm4 = vcmp.lt.s32.totalorder %v3013_v47, 4  ;;  %vm3034_vm11 = vcmp.lt.s32.totalorder %v3013_v47, 3 }
 0x60a   : > { %v3037_v2 = vsel %vm3035_vm4, %v3025_v39, 2102212464  ;;  %v3040_v54 = vsel %vm3032_vm9, %v3019_v27, %v3022_v48  ;;  %v3041_v22 = vsel %vm3035_vm4, %v3028_v28, 920167782  ;;  %v3016_v20 = vshrl.u32 %v6370_v59, %v3015_v5 }
 0x60b   : > { %v2962_v52 = vsub.s32 0, %v5999_v60  ;;  %v3042_v33 = vsel %vm3034_vm11, %v3025_v39, %v3041_v22  ;;  %v3044_v43 = vsel %vm3032_vm9, %v3022_v48, %v3025_v39  ;;  %v2868_v11 = vsub.s32 4294967266, %v6008_v62 }
 0x60c   : > { %v3043_v32 = vsel %vm3033_vm1, %v3040_v54, %v3042_v33  ;;  %v3045_v6 = vsel %vm3035_vm4, %v3031_v49, 1326507024  ;;  %v3048_v14 = vshll.u32 %v3008_v38, 8  ;;  %v3036_v12 = vsel %vm3032_vm9, %v3016_v20, %v3019_v27 }
 0x60d   : > { %v3405_v51 = vmin.u32 %v2962_v52, %v5999_v60  ;;  %v3038_v29 = vsel %vm3034_vm11, %v3022_v48, %v3037_v2  ;;  %v3046_v46 = vsel %vm3034_vm11, %v3028_v28, %v3045_v6  ;;  %v2764_v45 = vsub.s32 4294967266, %v5990_v41 }
 0x60e   : > { %v3047_v3 = vsel %vm3033_vm1, %v3044_v43, %v3046_v46  ;;  %v6019_v25 = vmul.u32.u64.low %v3048_v14, %v3043_v32  ;;  %v6020_v59 = vmul.u32.u64.high %v3048_v14, %v3043_v32, %v6019_v25  ;;  %v3039_v4 = vsel %vm3033_vm1, %v3036_v12, %v3038_v29 }
 0x60f   : > { %v2964_v23 = vclz %v3405_v51  ;;  %v6023_v5 = vmul.u32.u64.low %v3048_v14, %v3047_v3  ;;  %v6024_v16 = vmul.u32.u64.high %v3048_v14, %v3047_v3, %v6023_v5  ;;  %v2869_v8 = vadd.s32 127, %v2868_v11 }
 0x610   : > { %v2765_v48 = vadd.s32 127, %v2764_v45  ;;  %v2952_v15 = vadd.s32 %v5975_v30, %v5980_v35  ;;  %v3058_v50 = vadd.s32 1, %v6020_v59  ;;  %v2864_v52 = vsub.s32 32, %v6008_v62 }
 0x611   : > { %v3406_v13 = vadd.s32 4294967294, %v2964_v23  ;;  %v3055_v26 = vmul.u32 %v3048_v14, %v3039_v4  ;;  %vm3057_vm14 = vc.u32 %v6024_v16, %v6019_v25  ;;  %v2760_v58 = vsub.s32 32, %v5990_v41 }
 0x612   : > { %v2848_v47 = vadd.s32 %v5935_v18, %v5940_v56  ;;  %v3059_v38 = vsel %vm3057_vm14, %v3058_v50, %v6020_v59  ;;  %v2870_v28 = vshll.u32 %v2869_v8, 23  ;;  %v2744_v35 = vadd.s32 %v5907_v63, %v5904_v34 }
 0x613   : > { %vm3407_vm3 = vcmp.lt.s32.totalorder %v3406_v13, 0  ;;  %v3060_v30 = vadd.s32 %v3059_v38, %v3055_v26  ;;  %v2766_v2 = vshll.u32 %v2765_v48, 23  ;;  %v2865_v43 = vshll.u32 %v5971_v57, %v6008_v62 }
 0x614   : > { %v2967_v42 = vsel %vm3407_vm3, 0, %v3406_v13  ;;  %v2866_v54 = vshrl.u32 %v2848_v47, %v2864_v52  ;;  %v2762_v33 = vshrl.u32 %v2744_v35, %v2760_v58  ;;  %v2871_v18 = vor.u32 4788187, %v2870_v28 }
 0x615   : > { %v2968_v24 = vsub.s32 32, %v2967_v42  ;;  %v2972_v27 = vsub.s32 4294967266, %v2967_v42  ;;  %v2969_v22 = vshll.u32 %v5999_v60, %v2967_v42  ;;  %v3061_v20 = vadd.s32 536870912, %v3060_v30 }
 0x616   : > { %v2761_v32 = vshll.u32 %v5953_v19, %v5990_v41  ;;  %v2767_v34 = vor.u32 4788187, %v2766_v2  ;;  %v2867_v63 = vor.u32 %v2866_v54, %v2865_v43  ;;  %v2872_v13 = vand.u32 2147483647, %v2871_v18 }
 0x617   : > { %v2973_v39 = vadd.s32 127, %v2972_v27  ;;  %v2970_v51 = vshrl.u32 %v2952_v15, %v2968_v24  ;;  %v6042_v11 = vshrl.u32 %v3061_v20, 30  ;;  %v3056_v52 = vadd.s32 %v6019_v25, %v6024_v16 }
 0x618   : > { %v2763_v14 = vor.u32 %v2762_v33, %v2761_v32  ;;  %v2768_v57 = vand.u32 2147483647, %v2767_v34  ;;  %v2874_v62 = vcvt.s32.f32 %v2867_v63  ;;  %vm6065_vm12 = vcmp.le.f32.partialorder %v2792_v31, 0.7853982 }
 0x619   : > { %v2974_v49 = vshll.u32 %v2973_v39, 23  ;;  %v2971_v56 = vor.u32 %v2970_v51, %v2969_v22  ;;  %v3063_v60 = vshll.u32 %v6042_v11, 30  ;;  %vm6079_vm8 = vcmp.le.f32.partialorder %v2688_v1, 0.7853982 }
 0x61a   : > { %v2770_v3 = vcvt.s32.f32 %v2763_v14  ;;  %v2875_v59 = vmul.f32 %v2874_v62, %v2872_v13  ;;  %v2982_v2 = vsub.s32 4, %v5988_v55  ;;  %v2878_v1 = vsub.s32 4, %v5964_v0 }
 0x61b   : > { %v2975_v23 = vor.u32 4788187, %v2974_v49  ;;  %v2978_v12 = vcvt.s32.f32 %v2971_v56  ;;  %v3064_v29 = vsub.s32 %v3060_v30, %v3063_v60  ;;  %v2774_v33 = vsub.s32 4, %v5933_v61 }
 0x61c   : > { %v2771_v19 = vmul.f32 %v2770_v3, %v2768_v57  ;;  %v2876_v4 = vxor.u32 2147483648, %v2875_v59  ;;  %v2983_v20 = vsel %vm2898_vm10, %v2982_v2, %v5988_v55  ;;  %v2879_v18 = vsel %vm2794_vm15, %v2878_v1, %v5964_v0 }
 0x61d   : > { %v2976_v6 = vand.u32 2147483647, %v2975_v23  ;;  %v3066_v45 = vsub.s32 0, %v3064_v29  ;;  %vm3002_vm9 = vcmp.lt.s32.totalorder %v5951_v17, 0  ;;  %v3086_v56 = vsub.s32 4, %v6042_v11 }
 0x61e   : > { %v2772_v24 = vxor.u32 2147483648, %v2771_v19  ;;  %v2877_v50 = vsel %vm2794_vm15, %v2876_v4, %v2875_v59  ;;  %v2985_v32 = vsel %vm6054_vm13, 0, %v2983_v20  ;;  %vm6101_vm1 = vcmp.le.f32.partialorder %v3000_v40, 0.7853982 }
 0x61f   : > { %v2979_v46 = vmul.f32 %v2978_v12, %v2976_v6  ;;  %v3409_v5 = vmin.u32 %v3066_v45, %v3064_v29  ;;  %v2880_v16 = vsel %vm6065_vm12, %v5866_v10, %v2877_v50  ;;  %v2775_v63 = vsel %vm2690_vm2, %v2774_v33, %v5933_v61 }
 0x620   : > { %v2773_v47 = vsel %vm2690_vm2, %v2772_v24, %v2771_v19  ;;  %v2881_v6 = vsel %vm6065_vm12, 0, %v2879_v18  ;;  %v2989_v60 = vadd.s32 3, %v2985_v32  ;;  %v3087_v40 = vsel %vm3002_vm9, %v3086_v56, %v6042_v11 }
 0x621   : > { %v2980_v41 = vxor.u32 2147483648, %v2979_v46  ;;  %v3068_v42 = vclz %v3409_v5  ;;  %v2776_v30 = vsel %vm6079_vm8, %v5862_v44, %v2773_v47  ;;  %v2777_v13 = vsel %vm6079_vm8, 0, %v2775_v63 }
 0x622   : > { %v3089_v62 = vsel %vm6101_vm1, 0, %v3087_v40  ;;  %v2781_v45 = vadd.s32 3, %v2777_v13  ;;  %v3109_v4 = vstv %s4355_s29  ;;  %vm2988_vm15 = vweird.f32 %v5874_v36 }
 0x623   : > { %v3410_v8 = vadd.s32 4294967294, %v3068_v42  ;;  %v2981_v27 = vsel %vm2898_vm10, %v2980_v41, %v2979_v46  ;;  %v2990_v46 = vand.u32 3, %v2989_v60  ;;  %v3093_v42 = vadd.s32 3, %v3089_v62 }
 0x624   : > { %v2984_v7 = vsel %vm6054_vm13, %v5874_v36, %v2981_v27  ;;  %v2782_v24 = vand.u32 3, %v2781_v45 }
 0x625   : > { %vm3411_vm6 = vcmp.lt.s32.totalorder %v3410_v8, 0  ;;  %3847 = vcosq.f32 %v2984_v7  ;;  %vm2992_vm4 = vcmp.eq.s32.totalorder %v2990_v46, 0  ;;  %vm2995_vm11 = vcmp.eq.s32.totalorder %v2990_v46, 2 }
 0x626   : > { %v3071_v15 = vsel %vm3411_vm6, 0, %v3410_v8  ;;  %3849 = vsinq.f32 %v2984_v7  ;;  %vm2991_vm5 = vcmp.lt.s32.totalorder %v2990_v46, 2  ;;  %vm2784_vm10 = vcmp.eq.s32.totalorder %v2782_v24, 0 }
 0x627   : > { %v3072_v39 = vsub.s32 32, %v3071_v15  ;;  %v3076_v26 = vsub.s32 4294967266, %v3071_v15  ;;  %v3073_v38 = vshll.u32 %v3064_v29, %v3071_v15  ;;  %3851 = vcosq.f32 %v2880_v16 }
 0x628   : > { %3853 = vsinq.f32 %v2880_v16  ;;  %v2885_v29 = vadd.s32 3, %v2881_v6  ;;  %vm2787_vm6 = vcmp.eq.s32.totalorder %v2782_v24, 2  ;;  %v3136_v6 = vpop.permute.xlu1 %3135 }
 0x629   : > { %v3074_v28 = vshrl.u32 %v3056_v52, %v3072_v39  ;;  %v3077_v25 = vadd.s32 127, %v3076_v26  ;;  %3855 = vcosq.f32 %v2776_v30  ;;  %v3110_v52 = vadd.s32 %v3109_v4, %v4408_v21 }
 0x62a   : > { %3857 = vsinq.f32 %v2776_v30  ;;  %v2886_v41 = vand.u32 3, %v2885_v29  ;;  %v3094_v39 = vand.u32 3, %v3093_v42 }
 0x62b   : > { %v3075_v51 = vor.u32 %v3074_v28, %v3073_v38  ;;  %v3078_v49 = vshll.u32 %v3077_v25, 23  ;;  %vm3111_vm2 = vcmp.ge.s32.totalorder %v3110_v52, 0  ;;  %vm3112_vm12 = vcmp.lt.s32.totalorder %v3110_v52, 520 }
 0x62c   : > { %vm2888_vm3 = vcmp.eq.s32.totalorder %v2886_v41, 0  ;;  %vm2891_vm14 = vcmp.eq.s32.totalorder %v2886_v41, 2  ;;  %vm2887_vm13 = vcmp.lt.s32.totalorder %v2886_v41, 2  ;;  %vm3099_vm8 = vcmp.eq.s32.totalorder %v3094_v39, 2 }
 0x62d   : > { %v3079_v35 = vor.u32 4788187, %v3078_v49  ;;  %v3082_v22 = vcvt.s32.f32 %v3075_v51 }
 0x62f   : > { %v3080_v54 = vand.u32 2147483647, %v3079_v35 }
 0x631   : > { %v3083_v23 = vmul.f32 %v3082_v22, %v3080_v54 }
 0x632   : > { %v3848_v14 = vpop.eup %3847 }
 0x633   : > { %v3084_v43 = vxor.u32 2147483648, %v3083_v23  ;;  %v3850_v12 = vpop.eup %3849  ;;  %v2996_v5 = vxor.u32 2147483648, %v3848_v14 }
 0x634   : > { %v3852_v61 = vpop.eup %3851  ;;  %v2993_v59 = vxor.u32 2147483648, %v3850_v12 }
 0x635   : > { %v3085_v55 = vsel %vm3002_vm9, %v3084_v43, %v3083_v23  ;;  %v3854_v57 = vpop.eup %3853  ;;  %v2892_v8 = vxor.u32 2147483648, %v3852_v61  ;;  %v2997_v48 = vsel %vm2995_vm11, %v2996_v5, %v3850_v12  ;;  %vm2783_vm9 = vcmp.lt.s32.totalorder %v2782_v24, 2 }
 0x636   : > { %v3088_v0 = vsel %vm6101_vm1, %v5951_v17, %v3085_v55  ;;  %v3856_v3 = vpop.eup %3855  ;;  %v2889_v11 = vxor.u32 2147483648, %v3854_v57  ;;  %v2994_v27 = vsel %vm2992_vm4, %v3848_v14, %v2993_v59  ;;  %vm3096_vm1 = vcmp.eq.s32.totalorder %v3094_v39, 0  ;;  %v3131_v55 = vld [vmem:[%s6218_s7] sm:$0x1] }
 0x637   : > { %3859 = vcosq.f32 %v3088_v0  ;;  %v3858_v19 = vpop.eup %3857  ;;  %v2788_v50 = vxor.u32 2147483648, %v3856_v3  ;;  %v2893_v58 = vsel %vm2891_vm14, %v2892_v8, %v3854_v57  ;;  %v2998_v7 = vsel %vm2991_vm5, %v2994_v27, %v2997_v48 }
 0x638   : > { %3861 = vsinq.f32 %v3088_v0  ;;  %v2785_v15 = vxor.u32 2147483648, %v3858_v19  ;;  %v2890_v26 = vsel %vm2888_vm3, %v3852_v61, %v2889_v11  ;;  %v2999_v51 = vsel %vm2988_vm15, nan, %v2998_v7  ;;  %vm6122_vm3 = vmand %vm3111_vm2, %vm3112_vm12 }
 0x639   : > { %v2789_v28 = vsel %vm2787_vm6, %v2788_v50, %v3858_v19  ;;  %v2894_v21 = vsel %vm2887_vm13, %v2890_v26, %v2893_v58  ;;  %vm2884_vm4 = vweird.f32 %v5866_v10  ;;  %vm3095_vm11 = vcmp.lt.s32.totalorder %v3094_v39, 2 }
 0x63a   : > { %v2786_v38 = vsel %vm2784_vm10, %v3856_v3, %v2785_v15  ;;  %v2895_v2 = vsel %vm2884_vm4, nan, %v2894_v21  ;;  %vm3092_vm14 = vweird.f32 %v5951_v17  ;;  %v3118_v22 = vsel %vm6122_vm3, %v2999_v51, 0.0 }
 0x63b   : > { %v2790_v30 = vsel %vm2783_vm9, %v2786_v38, %v2789_v28  ;;  %vm2780_vm5 = vweird.f32 %v5862_v44  ;;  %v3117_v20 = vsel %vm6122_vm3, %v2895_v2, 0.0  ;;  %v3655_v17 = vsel %vm4750_vm7, %v3118_v22, 0 }
 0x63c   : > { %v2791_v23 = vsel %vm2780_vm5, nan, %v2790_v30  ;;  %v3651_v18 = vsel %vm4750_vm7, %v3117_v20, 0  ;;  %v3672_v56 = vsel %vm4760_vm0, %v2999_v51, %v3655_v17  ;;  %vm3142_vm10 = vcmask 261120  }
 0x63d   : > { %v3116_v44 = vsel %vm6122_vm3, %v2791_v23, 0.0  ;;  %v3668_v34 = vsel %vm4760_vm0, %v2895_v2, %v3651_v18  ;;  %v3140_v0 = vsub.s32 0, %v6383_v53 }
 0x63e   : > { %v3647_v32 = vsel %vm4750_vm7, %v3116_v44, 0 }
 0x63f   : > { %v3664_v63 = vsel %vm4760_vm0, %v2791_v23, %v3647_v32  ;;  %v3141_v60 = vrot.slane %v3136_v6, %v3140_v0 }
 0x644   : > { %v3860_v47 = vpop.eup %3859 }
 0x645   : > { %v3862_v25 = vpop.eup %3861  ;;  %v3100_v16 = vxor.u32 2147483648, %v3860_v47 }
 0x646   : > { %v3097_v31 = vxor.u32 2147483648, %v3862_v25 }
 0x647   : > { %v3101_v49 = vsel %vm3099_vm8, %v3100_v16, %v3862_v25 }
 0x648   : > { %v3098_v35 = vsel %vm3096_vm1, %v3860_v47, %v3097_v31 }
 0x649   : > { %v3102_v54 = vsel %vm3095_vm11, %v3098_v35, %v3101_v49 }
 0x64a   : > { %v3103_v1 = vsel %vm3092_vm14, nan, %v3102_v54 }
 0x64b   : > { %v3119_v10 = vsel %vm6122_vm3, %v3103_v1, 0.0 }
 0x64c   : > { %v3659_v33 = vsel %vm4750_vm7, %v3119_v10, 0 }
 0x64d   : > { %v3676_v43 = vsel %vm4760_vm0, %v3103_v1, %v3659_v33 }
 0x64e   : > { %3422 = vmatpush3.msra.mxu1 %v3676_v43 }
 0x64f   : > { %3423 = vmatprep.subr.mxu1 %v6366_v37 }
 0x650   : > { %3424 = vmatpush3.msra.mxu1 %v3672_v56 }
 0x651   : > { %3425 = vmatprep.subr.mxu1 %v6366_v37 }
 0x652   : > { %3426 = vmatpush3.msra.mxu1 %v3668_v34 }
 0x653   : > { %3427 = vmatprep.subr.mxu1 %v6366_v37 }
 0x654   : > { %3428 = vmatpush3.msra.mxu1 %v3664_v63 }
 0x655   : > { %3430 = vmatmul.mubr.msk.f32.vlgmr.msra.gmra.mxu1 %vm3142_vm10, %v3131_v55 }
 0x715   : > { %v3212_v14 = vpop.f32.mrf.mxu1 }
 0x716   : > { %v3213_v40 = vadd.f32 %v3212_v14, %v3141_v60 }
 0x717   : > { %v3431_v9 = vpop.f32.mrf.mxu1 }
 0x718   : > { %3216 = vst [vmem:[%s350_s25] sm:$0x1] %v3213_v40 }
 0x719   : > { %3876 = shalt.err (!%p3873_p11)
}
 0x71a   : > { %s3877_s30 = scalar_lea.hbm %s6165_s10, 16  ;;  %s3881_s27 = scalar_lea.hbm %s6220_s9, 160 }
 0x71b   : > { %p3878_p12 = scmp.ne.s32.totalorder %s6165_s10, %s3877_s30  ;;  %p3882_p1 = scmp.lt.s32.totalorder %s6165_s10, %s6220_s9 }
 0x71c   : > { %p3883_p2 = scmp.lt.s32.totalorder %s3881_s27, %s3877_s30 }
 0x71d   : > { %p3879_p13 = pnand %p3878_p12, %p4074_p3 }
 0x71e   : > { %p3884_p4 = por %p3883_p2, %p3882_p1 }
 0x71f   : > { %p3880_p0 = pneg %p3879_p13 }
 0x721   : > { %p3885_p5 = pnand %p3884_p4, %p3880_p0 }
 0x723   : > { %3888 = shalt.err (!%p3885_p5)
}
 0x724   : > { %3677 = dma.vmem_to_hbm [thread:$0]  (%p4074_p3), %s3233_s26, 16, %s6165_s10, %s3218_s15  }
 0x725 PF: > { %p3703_p6 = scmp.ge.s32.totalorder %s3955_s18, 2  ;;  %s3244_s0 = sand.u32 1, %s3927_s11  }
 0x726   : > { %s3245_s8 = scalar_lea.sflag [#allocation4], %s3244_s0 }
 0x727   : > { %p3680_p7 = pnand %p3703_p6, %p4083_p8 }
 0x729   : > { %p3681_p9 = pneg %p3680_p7 }
 0x72b   : > { %3922 = dma.done.wait (%p3681_p9), %s3245_s8, 16  }
 0x72c   : > { %3924 = vsyncadd (%p3681_p9), %s3245_s8, 4294967280  ;;  %s24_s18 = sadd.s32 1, %s3955_s18   ;;  %s6384_s11 = smov %s3931_s12 }
 0x72d   : > { %p21_p10 = scmp.ge.s32.totalorder %s24_s18, 12   ;;  %s6385_s12 = smov %s3935_s13 }
 0x72e   : > { %s6386_s13 = smov %s4092_s28  ;;  %s6387_s14 = smov %s3947_s16 }
 0x72f   : > { %s6388_s15 = smov %s3951_s17  ;;  %s6389_s16 = smov %s6392_s20 }
 0x730   : > { %s6390_s17 = smov %s6396_s21  ;;  %23 = sbr.rel (!%p21_p10) target bundleno = 8 (0x8), region = 115 }
 0x735   :  { %3249 = vsyncpa [#allocation4], 1 }
 0x736   :  { %3251 = vsyncpa [#allocation4 + $0x1], 1 }

</bundles_post_ra>
